<compile_context>
chip_gen: v7x
topology: tpu7x:2x2x1
jax: 0.10.0
libtpu: 0.0.40
codegen_flags: <defaults>
</compile_context>

<pallas_src>
import functools

import numpy as np

import jax
import jax.numpy as jnp
from jax import lax
from jax.experimental import pallas as pl
from jax.experimental.pallas import tpu as pltpu


# ----------------------------- Pallas kernels ------------------------------

def _conv_pool_kernel(xe_ref, xo_ref, me_ref, mo_ref, b_ref, o_ref, *, kh, hp):
    """Fused valid Conv2d(k=kh, stride=1) + MaxPool2d(2, 2) for one image.

    xe_ref : (H/2, W*Cin)         even input rows   (rows = h, lanes = (w, cin))
    xo_ref : (H/2, W*Cin)         odd  input rows
    me_ref : (KH, W*Cin, Wp*Cout) block-Toeplitz weights, even conv columns
    mo_ref : (KH, W*Cin, Wp*Cout) block-Toeplitz weights, odd  conv columns
    b_ref  : (1, Wp*Cout)         bias tiled over pooled output columns
    o_ref  : (1, Hp, Wp*Cout)     pooled output     (rows = ph, lanes = (pw, cout))
    """
    wpc = o_ref.shape[-1]
    acc_ee = jnp.zeros((hp, wpc), jnp.float32)   # conv rows 2ph,   cols 2pw
    acc_eo = jnp.zeros((hp, wpc), jnp.float32)   # conv rows 2ph,   cols 2pw+1
    acc_oe = jnp.zeros((hp, wpc), jnp.float32)   # conv rows 2ph+1, cols 2pw
    acc_oo = jnp.zeros((hp, wpc), jnp.float32)   # conv rows 2ph+1, cols 2pw+1
    for i in range(kh):                          # unrolled (kh == 5)
        me = me_ref[i]                           # (W*Cin, Wp*Cout) bf16
        mo = mo_ref[i]
        # Input rows 2*ph + i   -> even conv rows.
        if i % 2 == 0:
            xr = xe_ref[pl.ds(i // 2, hp), :].astype(jnp.bfloat16)
        else:
            xr = xo_ref[pl.ds((i - 1) // 2, hp), :].astype(jnp.bfloat16)
        acc_ee += jnp.dot(xr, me, preferred_element_type=jnp.float32)
        acc_eo += jnp.dot(xr, mo, preferred_element_type=jnp.float32)
        # Input rows 2*ph + 1 + i -> odd conv rows.
        if i % 2 == 0:
            xr = xo_ref[pl.ds(i // 2, hp), :].astype(jnp.bfloat16)
        else:
            xr = xe_ref[pl.ds((i + 1) // 2, hp), :].astype(jnp.bfloat16)
        acc_oe += jnp.dot(xr, me, preferred_element_type=jnp.float32)
        acc_oo += jnp.dot(xr, mo, preferred_element_type=jnp.float32)
    pooled = jnp.maximum(jnp.maximum(acc_ee, acc_eo), jnp.maximum(acc_oe, acc_oo))
    o_ref[0] = pooled + b_ref[...]               # bias commutes with the max


def _fc_kernel(x_ref, w1_ref, b1_ref, w2_ref, b2_ref, o_ref):
    """Fused Linear(800->512[=500+pad]) + ReLU + Linear(512->2) (fc3 folded into fc2)."""
    x = x_ref[...].astype(jnp.bfloat16)                               # (TM, 800)
    h = jnp.dot(x, w1_ref[...], preferred_element_type=jnp.float32)   # (TM, 512)
    h = jnp.maximum(h + b1_ref[...], 0.0)                             # f32 epilogue
    y = jnp.dot(h, w2_ref[...], preferred_element_type=jnp.float32)   # (TM, 2)
    o_ref[...] = (y + b2_ref[...]).astype(o_ref.dtype)


# ------------------------------ call wrappers -------------------------------

def conv_pool(x, me, mo, brow):
    """x: (N, H, W*Cin) f32 -> (N, Hp, Wp*Cout) f32, one image per grid step."""
    n, h, wc = x.shape
    kh, _, wpc = me.shape
    hp = (h - kh + 1) // 2
    he = h // 2
    # Tiny wrapper split into even/odd input-row planes so every in-kernel access
    # is a contiguous VMEM slice; pooling itself is fully fused in the kernel.
    xe = x[:, 0::2, :]
    xo = x[:, 1::2, :]
    kernel = functools.partial(_conv_pool_kernel, kh=kh, hp=hp)
    flops = int(n * kh * 4 * 2 * hp * wc * wpc)
    bytes_accessed = int(2 * n * he * wc * 4 + 2 * me.size * 2 + brow.size * 4
                         + n * hp * wpc * 4)
    return pl.pallas_call(
        kernel,
        out_shape=jax.ShapeDtypeStruct((n, hp, wpc), jnp.float32),
        grid=(n,),
        in_specs=[
            pl.BlockSpec((None, he, wc), lambda b: (b, 0, 0)),   # even rows, 1 image
            pl.BlockSpec((None, he, wc), lambda b: (b, 0, 0)),   # odd rows,  1 image
            pl.BlockSpec((kh, wc, wpc), lambda b: (0, 0, 0)),    # weights stay resident
            pl.BlockSpec((kh, wc, wpc), lambda b: (0, 0, 0)),
            pl.BlockSpec((1, wpc), lambda b: (0, 0)),
        ],
        out_specs=pl.BlockSpec((1, hp, wpc), lambda b: (b, 0, 0)),
        compiler_params=pltpu.CompilerParams(dimension_semantics=("parallel",)),
        cost_estimate=pl.CostEstimate(flops=flops, transcendentals=0,
                                      bytes_accessed=bytes_accessed),
    )(xe, xo, me, mo, brow)


def fc_fused(x, w1, b1, w2, b2):
    """x: (M, 800) f32 -> (M, 2) f32.  Whole FC stack in one kernel, M tiled."""
    m, k = x.shape
    n1 = w1.shape[1]
    n2 = w2.shape[1]
    if m <= 256:
        tm, xp = m, x
    else:
        tm = 256
        mp = ((m + tm - 1) // tm) * tm
        xp = jnp.pad(x, ((0, mp - m), (0, 0)))
    grid_m = xp.shape[0] // tm
    flops = int(2 * xp.shape[0] * k * n1 + 2 * xp.shape[0] * n1 * n2)
    bytes_accessed = int(xp.size * 4 + w1.size * 2 + b1.size * 4 + w2.size * 4
                         + b2.size * 4 + xp.shape[0] * n2 * 4)
    out = pl.pallas_call(
        _fc_kernel,
        out_shape=jax.ShapeDtypeStruct((xp.shape[0], n2), jnp.float32),
        grid=(grid_m,),
        in_specs=[
            pl.BlockSpec((tm, k), lambda i: (i, 0)),
            pl.BlockSpec((k, n1), lambda i: (0, 0)),
            pl.BlockSpec((1, n1), lambda i: (0, 0)),
            pl.BlockSpec((n1, n2), lambda i: (0, 0)),
            pl.BlockSpec((1, n2), lambda i: (0, 0)),
        ],
        out_specs=pl.BlockSpec((tm, n2), lambda i: (i, 0)),
        compiler_params=pltpu.CompilerParams(dimension_semantics=("parallel",)),
        cost_estimate=pl.CostEstimate(flops=flops, transcendentals=0,
                                      bytes_accessed=bytes_accessed),
    )(xp, w1, b1, w2, b2)
    return out[:m]


# --------------------------- host-side weight prep ---------------------------

def _conv_pool_matrices(w_oihw, bias, w_in):
    """Build block-Toeplitz matrices M_i^{even/odd} (and the tiled bias row) s.t.
    conv_nobias[h, 2*pw + parity, :] == sum_i (x[h + i, :] @ M_i^{parity})[pw*Cout:(pw+1)*Cout]
    with x lanes flattened as (w, cin) and output lanes as (pw, cout)."""
    w = np.asarray(w_oihw, np.float32)            # (Cout, Cin, KH, KW) - PyTorch layout
    cout, cin, kh, kw = w.shape
    wo = w_in - kw + 1
    wp = wo // 2
    me = np.zeros((kh, w_in * cin, wp * cout), np.float32)
    mo = np.zeros((kh, w_in * cin, wp * cout), np.float32)
    for i in range(kh):
        for j in range(kw):
            blk = w[:, :, i, j].T                 # (Cin, Cout)
            for pw in range(wp):
                we, wod = 2 * pw, 2 * pw + 1
                me[i, (we + j) * cin:(we + j + 1) * cin, pw * cout:(pw + 1) * cout] = blk
                mo[i, (wod + j) * cin:(wod + j + 1) * cin, pw * cout:(pw + 1) * cout] = blk
    brow = np.tile(np.asarray(bias, np.float32), wp)[None, :]     # (1, Wp*Cout)
    return (jnp.asarray(me, jnp.bfloat16), jnp.asarray(mo, jnp.bfloat16),
            jnp.asarray(brow, jnp.float32))


def prepare_params(params):
    """One-time host-side preprocessing (outside jit): Toeplitz conv+pool matrices,
    permuted / lane-padded fc1, fc3 folded into fc2, matmul weights cast to bf16."""
    me1, mo1, b1r = _conv_pool_matrices(params["conv1_w"], params["conv1_b"], 28)
    me2, mo2, b2r = _conv_pool_matrices(params["conv2_w"], params["conv2_b"], 12)

    fc1_w = np.asarray(params["fc1_w"], np.float32)   # (500, 800), cols in (c,h,w) order
    fc1_b = np.asarray(params["fc1_b"], np.float32)
    fc2_w = np.asarray(params["fc2_w"], np.float32)   # (10, 500)
    fc2_b = np.asarray(params["fc2_b"], np.float32)
    fc3_w = np.asarray(params["fc3_w"], np.float32)   # (2, 10)
    fc3_b = np.asarray(params["fc3_b"], np.float32)

    # Our conv2 features flatten in (h, w, c) order; PyTorch's view(B, -1) flattens
    # (c, h, w).  Permute fc1's input columns once instead of transposing activations.
    hh, ww, cc = np.meshgrid(np.arange(4), np.arange(4), np.arange(50), indexing="ij")
    perm = (cc * 16 + hh * 4 + ww).reshape(-1)        # ours -> PyTorch input index
    w1 = fc1_w[:, perm].T                             # (800, 500), pre-transposed
    w1p = np.zeros((800, 512), np.float32)            # pad hidden 500 -> 512 lanes
    w1p[:, :500] = w1
    b1p = np.zeros((1, 512), np.float32)
    b1p[0, :500] = fc1_b

    # No nonlinearity between fc2 and fc3: fold into a single 512 -> 2 matmul.
    w23 = fc2_w.T @ fc3_w.T                           # (500, 2)
    w23p = np.zeros((512, 2), np.float32)
    w23p[:500] = w23
    b23 = (fc2_b @ fc3_w.T + fc3_b)[None, :]          # (1, 2)

    return {
        "me1": me1, "mo1": mo1, "b1r": b1r,
        "me2": me2, "mo2": mo2, "b2r": b2r,
        "w1": jnp.asarray(w1p, jnp.bfloat16), "b1": jnp.asarray(b1p, jnp.float32),
        "w23": jnp.asarray(w23p, jnp.float32), "b23": jnp.asarray(b23, jnp.float32),
    }


def init_params(key):
    ks = jax.random.split(key, 10)
    scale = 0.05
    return {
        "conv1_w": scale * jax.random.normal(ks[0], (20, 1, 5, 5), jnp.float32),
        "conv1_b": scale * jax.random.normal(ks[1], (20,), jnp.float32),
        "conv2_w": scale * jax.random.normal(ks[2], (50, 20, 5, 5), jnp.float32),
        "conv2_b": scale * jax.random.normal(ks[3], (50,), jnp.float32),
        "fc1_w": scale * jax.random.normal(ks[4], (500, 800), jnp.float32),
        "fc1_b": scale * jax.random.normal(ks[5], (500,), jnp.float32),
        "fc2_w": scale * jax.random.normal(ks[6], (10, 500), jnp.float32),
        "fc2_b": scale * jax.random.normal(ks[7], (10,), jnp.float32),
        "fc3_w": scale * jax.random.normal(ks[8], (2, 10), jnp.float32),
        "fc3_b": scale * jax.random.normal(ks[9], (2,), jnp.float32),
    }


# ------------------------------ SiameseNetwork ------------------------------

def forward_fused(prep, x_nchw):
    """cnn1 + fc1 stack for a (N, 1, 28, 28) batch -> (N, 2)."""
    n = x_nchw.shape[0]
    x = x_nchw[:, 0, :, :].astype(jnp.float32)                   # (N, 28, 28), Cin = 1
    y = conv_pool(x, prep["me1"], prep["mo1"], prep["b1r"])      # (N, 12, 12*20)
    y = conv_pool(y, prep["me2"], prep["mo2"], prep["b2r"])      # (N, 4, 4*50)
    feat = y.reshape(n, 800)                                     # (h,w,c) flatten; fc1 permuted
    return fc_fused(feat, prep["w1"], prep["b1"], prep["w23"], prep["b23"])


@jax.jit
def siamese_forward(prep, input1, input2):
    b = input1.shape[0]
    # Fuse both Siamese branches into one 2B-batch pass.
    out = forward_fused(prep, jnp.concatenate([input1, input2], axis=0))
    return out[:b], out[b:]


# TODO(synk): the KAF activation branch (flag_kaf=True) is not implemented; this
# reproduces the default flag_kaf=False (ReLU) forward path.


# ----------------------------- plain-JAX reference ---------------------------

def _reference_forward(params, x_nchw):
    hi = lax.Precision.HIGHEST

    def conv(x, w, b):
        y = lax.conv_general_dilated(x, w, (1, 1), "VALID",
                                     dimension_numbers=("NCHW", "OIHW", "NCHW"),
                                     precision=hi)
        return y + b[None, :, None, None]

    def pool(y):
        return jnp.maximum(jnp.maximum(y[:, :, 0::2, 0::2], y[:, :, 0::2, 1::2]),
                           jnp.maximum(y[:, :, 1::2, 0::2], y[:, :, 1::2, 1::2]))

    y = pool(conv(x_nchw, params["conv1_w"], params["conv1_b"]))
    y = pool(conv(y, params["conv2_w"], params["conv2_b"]))
    f = y.reshape(y.shape[0], -1)
    h = jnp.maximum(jnp.dot(f, params["fc1_w"].T, precision=hi) + params["fc1_b"], 0.0)
    z = jnp.dot(h, params["fc2_w"].T, precision=hi) + params["fc2_b"]
    return jnp.dot(z, params["fc3_w"].T, precision=hi) + params["fc3_b"]


if __name__ == "__main__":
    key = jax.random.PRNGKey(0)
    kp, k1, k2 = jax.random.split(key, 3)
    params = init_params(kp)
    prep = prepare_params(params)

    B = 2
    input1 = jax.random.normal(k1, (B, 1, 28, 28), jnp.float32)
    input2 = jax.random.normal(k2, (B, 1, 28, 28), jnp.float32)

    out1, out2 = siamese_forward(prep, input1, input2)
    jax.block_until_ready((out1, out2))
    assert out1.shape == (B, 2) and out2.shape == (B, 2)

    # Sanity check vs. a plain-JAX reference of the PyTorch module (kernels use
    # bf16 MXU inputs with f32 accumulation, hence the loose tolerance).
    ref1 = _reference_forward(params, input1)
    ref2 = _reference_forward(params, input2)
    np.testing.assert_allclose(np.asarray(out1), np.asarray(ref1), rtol=5e-2, atol=2e-2)
    np.testing.assert_allclose(np.asarray(out2), np.asarray(ref2), rtol=5e-2, atol=2e-2)

    print("KERNEL_OK")
</pallas_src>

<mosaic_0001>
module attributes {stable_mosaic.version = 11 : i64} {
  func.func @_conv_pool_kernel(%arg0: i32, %arg1: memref<1x6x240xf32, #tpu.memory_space<vmem>>, %arg2: memref<1x6x240xf32, #tpu.memory_space<vmem>>, %arg3: memref<5x240x200xbf16, #tpu.memory_space<vmem>>, %arg4: memref<5x240x200xbf16, #tpu.memory_space<vmem>>, %arg5: memref<1x200xf32, #tpu.memory_space<vmem>>, %arg6: memref<1x4x200xf32, #tpu.memory_space<vmem>>) attributes {dimension_semantics = [#tpu.dimension_semantics<parallel>], iteration_bounds = array<i64: 4>, scalar_prefetch = 0 : i64, scratch_operands = 0 : i64, tpu.core_type = #tpu.core_type<tc>, window_params = [{transform_indices = @transform_0, window_bounds = array<i64: 1, 6, 240>}, {transform_indices = @transform_1, window_bounds = array<i64: 1, 6, 240>}, {pipeline_mode = #tpu.pipeline_mode<synchronous>, transform_indices = @transform_2, window_bounds = array<i64: 5, 240, 200>}, {pipeline_mode = #tpu.pipeline_mode<synchronous>, transform_indices = @transform_3, window_bounds = array<i64: 5, 240, 200>}, {pipeline_mode = #tpu.pipeline_mode<synchronous>, transform_indices = @transform_4, window_bounds = array<i64: 1, 200>}, {transform_indices = @transform_5, window_bounds = array<i64: 1, 4, 200>}]} {
    %cst = arith.constant 0.000000e+00 : f32
    %0 = vector.broadcast %cst : f32 to vector<4x200xf32>
    %cst_0 = arith.constant 0.000000e+00 : f32
    %1 = vector.broadcast %cst_0 : f32 to vector<4x200xf32>
    %cst_1 = arith.constant 0.000000e+00 : f32
    %2 = vector.broadcast %cst_1 : f32 to vector<4x200xf32>
    %cst_2 = arith.constant 0.000000e+00 : f32
    %3 = vector.broadcast %cst_2 : f32 to vector<4x200xf32>
    %c0 = arith.constant 0 : index
    %c0_3 = arith.constant 0 : index
    %c0_4 = arith.constant 0 : index
    %4 = vector.load %arg3[%c0, %c0_3, %c0_4] : memref<5x240x200xbf16, #tpu.memory_space<vmem>>, vector<1x240x200xbf16>
    %5 = vector.shape_cast %4 : vector<1x240x200xbf16> to vector<240x200xbf16>
    %c0_5 = arith.constant 0 : index
    %c0_6 = arith.constant 0 : index
    %c0_7 = arith.constant 0 : index
    %6 = vector.load %arg4[%c0_5, %c0_6, %c0_7] : memref<5x240x200xbf16, #tpu.memory_space<vmem>>, vector<1x240x200xbf16>
    %7 = vector.shape_cast %6 : vector<1x240x200xbf16> to vector<240x200xbf16>
    %c0_8 = arith.constant 0 : index
    %c0_9 = arith.constant 0 : index
    %c0_10 = arith.constant 0 : index
    %8 = vector.load %arg1[%c0_8, %c0_9, %c0_10] : memref<1x6x240xf32, #tpu.memory_space<vmem>>, vector<1x4x240xf32>
    %9 = vector.shape_cast %8 : vector<1x4x240xf32> to vector<4x240xf32>
    %10 = arith.truncf %9 : vector<4x240xf32> to vector<4x240xbf16>
    %cst_11 = arith.constant dense<0.000000e+00> : vector<4x200xf32>
    %11 = tpu.matmul %10, %5, %cst_11 {dimension_numbers = #tpu.dot_dimension_numbers<[1], [0], [0], [1], [0, 0, 1, 1], [], []>} : vector<4x240xbf16>, vector<240x200xbf16>, vector<4x200xf32> -> vector<4x200xf32>
    %12 = arith.addf %0, %11 : vector<4x200xf32>
    %cst_12 = arith.constant dense<0.000000e+00> : vector<4x200xf32>
    %13 = tpu.matmul %10, %7, %cst_12 {dimension_numbers = #tpu.dot_dimension_numbers<[1], [0], [0], [1], [0, 0, 1, 1], [], []>} : vector<4x240xbf16>, vector<240x200xbf16>, vector<4x200xf32> -> vector<4x200xf32>
    %14 = arith.addf %1, %13 : vector<4x200xf32>
    %c0_13 = arith.constant 0 : index
    %c0_14 = arith.constant 0 : index
    %c0_15 = arith.constant 0 : index
    %15 = vector.load %arg2[%c0_13, %c0_14, %c0_15] : memref<1x6x240xf32, #tpu.memory_space<vmem>>, vector<1x4x240xf32>
    %16 = vector.shape_cast %15 : vector<1x4x240xf32> to vector<4x240xf32>
    %17 = arith.truncf %16 : vector<4x240xf32> to vector<4x240xbf16>
    %cst_16 = arith.constant dense<0.000000e+00> : vector<4x200xf32>
    %18 = tpu.matmul %17, %5, %cst_16 {dimension_numbers = #tpu.dot_dimension_numbers<[1], [0], [0], [1], [0, 0, 1, 1], [], []>} : vector<4x240xbf16>, vector<240x200xbf16>, vector<4x200xf32> -> vector<4x200xf32>
    %19 = arith.addf %2, %18 : vector<4x200xf32>
    %cst_17 = arith.constant dense<0.000000e+00> : vector<4x200xf32>
    %20 = tpu.matmul %17, %7, %cst_17 {dimension_numbers = #tpu.dot_dimension_numbers<[1], [0], [0], [1], [0, 0, 1, 1], [], []>} : vector<4x240xbf16>, vector<240x200xbf16>, vector<4x200xf32> -> vector<4x200xf32>
    %21 = arith.addf %3, %20 : vector<4x200xf32>
    %c1 = arith.constant 1 : index
    %c0_18 = arith.constant 0 : index
    %c0_19 = arith.constant 0 : index
    %22 = vector.load %arg3[%c1, %c0_18, %c0_19] : memref<5x240x200xbf16, #tpu.memory_space<vmem>>, vector<1x240x200xbf16>
    %23 = vector.shape_cast %22 : vector<1x240x200xbf16> to vector<240x200xbf16>
    %c1_20 = arith.constant 1 : index
    %c0_21 = arith.constant 0 : index
    %c0_22 = arith.constant 0 : index
    %24 = vector.load %arg4[%c1_20, %c0_21, %c0_22] : memref<5x240x200xbf16, #tpu.memory_space<vmem>>, vector<1x240x200xbf16>
    %25 = vector.shape_cast %24 : vector<1x240x200xbf16> to vector<240x200xbf16>
    %c0_23 = arith.constant 0 : index
    %c0_24 = arith.constant 0 : index
    %c0_25 = arith.constant 0 : index
    %26 = vector.load %arg2[%c0_23, %c0_24, %c0_25] : memref<1x6x240xf32, #tpu.memory_space<vmem>>, vector<1x4x240xf32>
    %27 = vector.shape_cast %26 : vector<1x4x240xf32> to vector<4x240xf32>
    %28 = arith.truncf %27 : vector<4x240xf32> to vector<4x240xbf16>
    %cst_26 = arith.constant dense<0.000000e+00> : vector<4x200xf32>
    %29 = tpu.matmul %28, %23, %cst_26 {dimension_numbers = #tpu.dot_dimension_numbers<[1], [0], [0], [1], [0, 0, 1, 1], [], []>} : vector<4x240xbf16>, vector<240x200xbf16>, vector<4x200xf32> -> vector<4x200xf32>
    %30 = arith.addf %12, %29 : vector<4x200xf32>
    %cst_27 = arith.constant dense<0.000000e+00> : vector<4x200xf32>
    %31 = tpu.matmul %28, %25, %cst_27 {dimension_numbers = #tpu.dot_dimension_numbers<[1], [0], [0], [1], [0, 0, 1, 1], [], []>} : vector<4x240xbf16>, vector<240x200xbf16>, vector<4x200xf32> -> vector<4x200xf32>
    %32 = arith.addf %14, %31 : vector<4x200xf32>
    %c0_28 = arith.constant 0 : index
    %c1_29 = arith.constant 1 : index
    %c0_30 = arith.constant 0 : index
    %33 = vector.load %arg1[%c0_28, %c1_29, %c0_30] : memref<1x6x240xf32, #tpu.memory_space<vmem>>, vector<1x4x240xf32>
    %34 = vector.shape_cast %33 : vector<1x4x240xf32> to vector<4x240xf32>
    %35 = arith.truncf %34 : vector<4x240xf32> to vector<4x240xbf16>
    %cst_31 = arith.constant dense<0.000000e+00> : vector<4x200xf32>
    %36 = tpu.matmul %35, %23, %cst_31 {dimension_numbers = #tpu.dot_dimension_numbers<[1], [0], [0], [1], [0, 0, 1, 1], [], []>} : vector<4x240xbf16>, vector<240x200xbf16>, vector<4x200xf32> -> vector<4x200xf32>
    %37 = arith.addf %19, %36 : vector<4x200xf32>
    %cst_32 = arith.constant dense<0.000000e+00> : vector<4x200xf32>
    %38 = tpu.matmul %35, %25, %cst_32 {dimension_numbers = #tpu.dot_dimension_numbers<[1], [0], [0], [1], [0, 0, 1, 1], [], []>} : vector<4x240xbf16>, vector<240x200xbf16>, vector<4x200xf32> -> vector<4x200xf32>
    %39 = arith.addf %21, %38 : vector<4x200xf32>
    %c2 = arith.constant 2 : index
    %c0_33 = arith.constant 0 : index
    %c0_34 = arith.constant 0 : index
    %40 = vector.load %arg3[%c2, %c0_33, %c0_34] : memref<5x240x200xbf16, #tpu.memory_space<vmem>>, vector<1x240x200xbf16>
    %41 = vector.shape_cast %40 : vector<1x240x200xbf16> to vector<240x200xbf16>
    %c2_35 = arith.constant 2 : index
    %c0_36 = arith.constant 0 : index
    %c0_37 = arith.constant 0 : index
    %42 = vector.load %arg4[%c2_35, %c0_36, %c0_37] : memref<5x240x200xbf16, #tpu.memory_space<vmem>>, vector<1x240x200xbf16>
    %43 = vector.shape_cast %42 : vector<1x240x200xbf16> to vector<240x200xbf16>
    %c0_38 = arith.constant 0 : index
    %c1_39 = arith.constant 1 : index
    %c0_40 = arith.constant 0 : index
    %44 = vector.load %arg1[%c0_38, %c1_39, %c0_40] : memref<1x6x240xf32, #tpu.memory_space<vmem>>, vector<1x4x240xf32>
    %45 = vector.shape_cast %44 : vector<1x4x240xf32> to vector<4x240xf32>
    %46 = arith.truncf %45 : vector<4x240xf32> to vector<4x240xbf16>
    %cst_41 = arith.constant dense<0.000000e+00> : vector<4x200xf32>
    %47 = tpu.matmul %46, %41, %cst_41 {dimension_numbers = #tpu.dot_dimension_numbers<[1], [0], [0], [1], [0, 0, 1, 1], [], []>} : vector<4x240xbf16>, vector<240x200xbf16>, vector<4x200xf32> -> vector<4x200xf32>
    %48 = arith.addf %30, %47 : vector<4x200xf32>
    %cst_42 = arith.constant dense<0.000000e+00> : vector<4x200xf32>
    %49 = tpu.matmul %46, %43, %cst_42 {dimension_numbers = #tpu.dot_dimension_numbers<[1], [0], [0], [1], [0, 0, 1, 1], [], []>} : vector<4x240xbf16>, vector<240x200xbf16>, vector<4x200xf32> -> vector<4x200xf32>
    %50 = arith.addf %32, %49 : vector<4x200xf32>
    %c0_43 = arith.constant 0 : index
    %c1_44 = arith.constant 1 : index
    %c0_45 = arith.constant 0 : index
    %51 = vector.load %arg2[%c0_43, %c1_44, %c0_45] : memref<1x6x240xf32, #tpu.memory_space<vmem>>, vector<1x4x240xf32>
    %52 = vector.shape_cast %51 : vector<1x4x240xf32> to vector<4x240xf32>
    %53 = arith.truncf %52 : vector<4x240xf32> to vector<4x240xbf16>
    %cst_46 = arith.constant dense<0.000000e+00> : vector<4x200xf32>
    %54 = tpu.matmul %53, %41, %cst_46 {dimension_numbers = #tpu.dot_dimension_numbers<[1], [0], [0], [1], [0, 0, 1, 1], [], []>} : vector<4x240xbf16>, vector<240x200xbf16>, vector<4x200xf32> -> vector<4x200xf32>
    %55 = arith.addf %37, %54 : vector<4x200xf32>
    %cst_47 = arith.constant dense<0.000000e+00> : vector<4x200xf32>
    %56 = tpu.matmul %53, %43, %cst_47 {dimension_numbers = #tpu.dot_dimension_numbers<[1], [0], [0], [1], [0, 0, 1, 1], [], []>} : vector<4x240xbf16>, vector<240x200xbf16>, vector<4x200xf32> -> vector<4x200xf32>
    %57 = arith.addf %39, %56 : vector<4x200xf32>
    %c3 = arith.constant 3 : index
    %c0_48 = arith.constant 0 : index
    %c0_49 = arith.constant 0 : index
    %58 = vector.load %arg3[%c3, %c0_48, %c0_49] : memref<5x240x200xbf16, #tpu.memory_space<vmem>>, vector<1x240x200xbf16>
    %59 = vector.shape_cast %58 : vector<1x240x200xbf16> to vector<240x200xbf16>
    %c3_50 = arith.constant 3 : index
    %c0_51 = arith.constant 0 : index
    %c0_52 = arith.constant 0 : index
    %60 = vector.load %arg4[%c3_50, %c0_51, %c0_52] : memref<5x240x200xbf16, #tpu.memory_space<vmem>>, vector<1x240x200xbf16>
    %61 = vector.shape_cast %60 : vector<1x240x200xbf16> to vector<240x200xbf16>
    %c0_53 = arith.constant 0 : index
    %c1_54 = arith.constant 1 : index
    %c0_55 = arith.constant 0 : index
    %62 = vector.load %arg2[%c0_53, %c1_54, %c0_55] : memref<1x6x240xf32, #tpu.memory_space<vmem>>, vector<1x4x240xf32>
    %63 = vector.shape_cast %62 : vector<1x4x240xf32> to vector<4x240xf32>
    %64 = arith.truncf %63 : vector<4x240xf32> to vector<4x240xbf16>
    %cst_56 = arith.constant dense<0.000000e+00> : vector<4x200xf32>
    %65 = tpu.matmul %64, %59, %cst_56 {dimension_numbers = #tpu.dot_dimension_numbers<[1], [0], [0], [1], [0, 0, 1, 1], [], []>} : vector<4x240xbf16>, vector<240x200xbf16>, vector<4x200xf32> -> vector<4x200xf32>
    %66 = arith.addf %48, %65 : vector<4x200xf32>
    %cst_57 = arith.constant dense<0.000000e+00> : vector<4x200xf32>
    %67 = tpu.matmul %64, %61, %cst_57 {dimension_numbers = #tpu.dot_dimension_numbers<[1], [0], [0], [1], [0, 0, 1, 1], [], []>} : vector<4x240xbf16>, vector<240x200xbf16>, vector<4x200xf32> -> vector<4x200xf32>
    %68 = arith.addf %50, %67 : vector<4x200xf32>
    %c0_58 = arith.constant 0 : index
    %c2_59 = arith.constant 2 : index
    %c0_60 = arith.constant 0 : index
    %69 = vector.load %arg1[%c0_58, %c2_59, %c0_60] : memref<1x6x240xf32, #tpu.memory_space<vmem>>, vector<1x4x240xf32>
    %70 = vector.shape_cast %69 : vector<1x4x240xf32> to vector<4x240xf32>
    %71 = arith.truncf %70 : vector<4x240xf32> to vector<4x240xbf16>
    %cst_61 = arith.constant dense<0.000000e+00> : vector<4x200xf32>
    %72 = tpu.matmul %71, %59, %cst_61 {dimension_numbers = #tpu.dot_dimension_numbers<[1], [0], [0], [1], [0, 0, 1, 1], [], []>} : vector<4x240xbf16>, vector<240x200xbf16>, vector<4x200xf32> -> vector<4x200xf32>
    %73 = arith.addf %55, %72 : vector<4x200xf32>
    %cst_62 = arith.constant dense<0.000000e+00> : vector<4x200xf32>
    %74 = tpu.matmul %71, %61, %cst_62 {dimension_numbers = #tpu.dot_dimension_numbers<[1], [0], [0], [1], [0, 0, 1, 1], [], []>} : vector<4x240xbf16>, vector<240x200xbf16>, vector<4x200xf32> -> vector<4x200xf32>
    %75 = arith.addf %57, %74 : vector<4x200xf32>
    %c4 = arith.constant 4 : index
    %c0_63 = arith.constant 0 : index
    %c0_64 = arith.constant 0 : index
    %76 = vector.load %arg3[%c4, %c0_63, %c0_64] : memref<5x240x200xbf16, #tpu.memory_space<vmem>>, vector<1x240x200xbf16>
    %77 = vector.shape_cast %76 : vector<1x240x200xbf16> to vector<240x200xbf16>
    %c4_65 = arith.constant 4 : index
    %c0_66 = arith.constant 0 : index
    %c0_67 = arith.constant 0 : index
    %78 = vector.load %arg4[%c4_65, %c0_66, %c0_67] : memref<5x240x200xbf16, #tpu.memory_space<vmem>>, vector<1x240x200xbf16>
    %79 = vector.shape_cast %78 : vector<1x240x200xbf16> to vector<240x200xbf16>
    %c0_68 = arith.constant 0 : index
    %c2_69 = arith.constant 2 : index
    %c0_70 = arith.constant 0 : index
    %80 = vector.load %arg1[%c0_68, %c2_69, %c0_70] : memref<1x6x240xf32, #tpu.memory_space<vmem>>, vector<1x4x240xf32>
    %81 = vector.shape_cast %80 : vector<1x4x240xf32> to vector<4x240xf32>
    %82 = arith.truncf %81 : vector<4x240xf32> to vector<4x240xbf16>
    %cst_71 = arith.constant dense<0.000000e+00> : vector<4x200xf32>
    %83 = tpu.matmul %82, %77, %cst_71 {dimension_numbers = #tpu.dot_dimension_numbers<[1], [0], [0], [1], [0, 0, 1, 1], [], []>} : vector<4x240xbf16>, vector<240x200xbf16>, vector<4x200xf32> -> vector<4x200xf32>
    %84 = arith.addf %66, %83 : vector<4x200xf32>
    %cst_72 = arith.constant dense<0.000000e+00> : vector<4x200xf32>
    %85 = tpu.matmul %82, %79, %cst_72 {dimension_numbers = #tpu.dot_dimension_numbers<[1], [0], [0], [1], [0, 0, 1, 1], [], []>} : vector<4x240xbf16>, vector<240x200xbf16>, vector<4x200xf32> -> vector<4x200xf32>
    %86 = arith.addf %68, %85 : vector<4x200xf32>
    %c0_73 = arith.constant 0 : index
    %c2_74 = arith.constant 2 : index
    %c0_75 = arith.constant 0 : index
    %87 = vector.load %arg2[%c0_73, %c2_74, %c0_75] : memref<1x6x240xf32, #tpu.memory_space<vmem>>, vector<1x4x240xf32>
    %88 = vector.shape_cast %87 : vector<1x4x240xf32> to vector<4x240xf32>
    %89 = arith.truncf %88 : vector<4x240xf32> to vector<4x240xbf16>
    %cst_76 = arith.constant dense<0.000000e+00> : vector<4x200xf32>
    %90 = tpu.matmul %89, %77, %cst_76 {dimension_numbers = #tpu.dot_dimension_numbers<[1], [0], [0], [1], [0, 0, 1, 1], [], []>} : vector<4x240xbf16>, vector<240x200xbf16>, vector<4x200xf32> -> vector<4x200xf32>
    %91 = arith.addf %73, %90 : vector<4x200xf32>
    %cst_77 = arith.constant dense<0.000000e+00> : vector<4x200xf32>
    %92 = tpu.matmul %89, %79, %cst_77 {dimension_numbers = #tpu.dot_dimension_numbers<[1], [0], [0], [1], [0, 0, 1, 1], [], []>} : vector<4x240xbf16>, vector<240x200xbf16>, vector<4x200xf32> -> vector<4x200xf32>
    %93 = arith.addf %75, %92 : vector<4x200xf32>
    %94 = arith.maximumf %84, %86 : vector<4x200xf32>
    %95 = arith.maximumf %91, %93 : vector<4x200xf32>
    %96 = arith.maximumf %94, %95 : vector<4x200xf32>
    %c0_78 = arith.constant 0 : index
    %c0_79 = arith.constant 0 : index
    %97 = vector.load %arg5[%c0_78, %c0_79] : memref<1x200xf32, #tpu.memory_space<vmem>>, vector<1x200xf32>
    %98 = vector.broadcast %97 : vector<1x200xf32> to vector<4x200xf32>
    %99 = arith.addf %96, %98 : vector<4x200xf32>
    %c0_80 = arith.constant 0 : index
    %c0_81 = arith.constant 0 : index
    %c0_82 = arith.constant 0 : index
    %100 = vector.load %arg6[%c0_80, %c0_81, %c0_82] : memref<1x4x200xf32, #tpu.memory_space<vmem>>, vector<1x4x200xf32>
    %101 = vector.shape_cast %100 : vector<1x4x200xf32> to vector<4x200xf32>
    %102 = vector.shape_cast %99 : vector<4x200xf32> to vector<1x4x200xf32>
    tpu.vector_store %arg6[%c0_80, %c0_81, %c0_82], %102 {strides = array<i32>} : memref<1x4x200xf32, #tpu.memory_space<vmem>>, vector<1x4x200xf32>,
    return
  }
  func.func @transform_0(%arg0: i32) -> (i32, i32, i32) {
    %c0_i32 = arith.constant 0 : i32
    %c0_i32_0 = arith.constant 0 : i32
    %c0_i32_1 = arith.constant 0 : i32
    return %arg0, %c0_i32, %c0_i32_0 : i32, i32, i32
  }
  func.func @transform_1(%arg0: i32) -> (i32, i32, i32) {
    %c0_i32 = arith.constant 0 : i32
    %c0_i32_0 = arith.constant 0 : i32
    %c0_i32_1 = arith.constant 0 : i32
    return %arg0, %c0_i32, %c0_i32_0 : i32, i32, i32
  }
  func.func @transform_2(%arg0: i32) -> (i32, i32, i32) {
    %c0_i32 = arith.constant 0 : i32
    %c0_i32_0 = arith.constant 0 : i32
    %c0_i32_1 = arith.constant 0 : i32
    %c0_i32_2 = arith.constant 0 : i32
    return %c0_i32, %c0_i32_0, %c0_i32_1 : i32, i32, i32
  }
  func.func @transform_3(%arg0: i32) -> (i32, i32, i32) {
    %c0_i32 = arith.constant 0 : i32
    %c0_i32_0 = arith.constant 0 : i32
    %c0_i32_1 = arith.constant 0 : i32
    %c0_i32_2 = arith.constant 0 : i32
    return %c0_i32, %c0_i32_0, %c0_i32_1 : i32, i32, i32
  }
  func.func @transform_4(%arg0: i32) -> (i32, i32) {
    %c0_i32 = arith.constant 0 : i32
    %c0_i32_0 = arith.constant 0 : i32
    %c0_i32_1 = arith.constant 0 : i32
    return %c0_i32, %c0_i32_0 : i32, i32
  }
  func.func @transform_5(%arg0: i32) -> (i32, i32, i32) {
    %c0_i32 = arith.constant 0 : i32
    %c0_i32_0 = arith.constant 0 : i32
    %c0_i32_1 = arith.constant 0 : i32
    return %arg0, %c0_i32, %c0_i32_0 : i32, i32, i32
  }
}

module attributes {stable_mosaic.version = 11 : i64} {
  func.func @_conv_pool_kernel(%arg0: i32, %arg1: memref<1x14x28xf32, #tpu.memory_space<vmem>>, %arg2: memref<1x14x28xf32, #tpu.memory_space<vmem>>, %arg3: memref<5x28x240xbf16, #tpu.memory_space<vmem>>, %arg4: memref<5x28x240xbf16, #tpu.memory_space<vmem>>, %arg5: memref<1x240xf32, #tpu.memory_space<vmem>>, %arg6: memref<1x12x240xf32, #tpu.memory_space<vmem>>) attributes {dimension_semantics = [#tpu.dimension_semantics<parallel>], iteration_bounds = array<i64: 4>, scalar_prefetch = 0 : i64, scratch_operands = 0 : i64, tpu.core_type = #tpu.core_type<tc>, window_params = [{transform_indices = @transform_0, window_bounds = array<i64: 1, 14, 28>}, {transform_indices = @transform_1, window_bounds = array<i64: 1, 14, 28>}, {pipeline_mode = #tpu.pipeline_mode<synchronous>, transform_indices = @transform_2, window_bounds = array<i64: 5, 28, 240>}, {pipeline_mode = #tpu.pipeline_mode<synchronous>, transform_indices = @transform_3, window_bounds = array<i64: 5, 28, 240>}, {pipeline_mode = #tpu.pipeline_mode<synchronous>, transform_indices = @transform_4, window_bounds = array<i64: 1, 240>}, {transform_indices = @transform_5, window_bounds = array<i64: 1, 12, 240>}]} {
    %cst = arith.constant 0.000000e+00 : f32
    %0 = vector.broadcast %cst : f32 to vector<12x240xf32>
    %cst_0 = arith.constant 0.000000e+00 : f32
    %1 = vector.broadcast %cst_0 : f32 to vector<12x240xf32>
    %cst_1 = arith.constant 0.000000e+00 : f32
    %2 = vector.broadcast %cst_1 : f32 to vector<12x240xf32>
    %cst_2 = arith.constant 0.000000e+00 : f32
    %3 = vector.broadcast %cst_2 : f32 to vector<12x240xf32>
    %c0 = arith.constant 0 : index
    %c0_3 = arith.constant 0 : index
    %c0_4 = arith.constant 0 : index
    %4 = vector.load %arg3[%c0, %c0_3, %c0_4] : memref<5x28x240xbf16, #tpu.memory_space<vmem>>, vector<1x28x240xbf16>
    %5 = vector.shape_cast %4 : vector<1x28x240xbf16> to vector<28x240xbf16>
    %c0_5 = arith.constant 0 : index
    %c0_6 = arith.constant 0 : index
    %c0_7 = arith.constant 0 : index
    %6 = vector.load %arg4[%c0_5, %c0_6, %c0_7] : memref<5x28x240xbf16, #tpu.memory_space<vmem>>, vector<1x28x240xbf16>
    %7 = vector.shape_cast %6 : vector<1x28x240xbf16> to vector<28x240xbf16>
    %c0_8 = arith.constant 0 : index
    %c0_9 = arith.constant 0 : index
    %c0_10 = arith.constant 0 : index
    %8 = vector.load %arg1[%c0_8, %c0_9, %c0_10] : memref<1x14x28xf32, #tpu.memory_space<vmem>>, vector<1x12x28xf32>
    %9 = vector.shape_cast %8 : vector<1x12x28xf32> to vector<12x28xf32>
    %10 = arith.truncf %9 : vector<12x28xf32> to vector<12x28xbf16>
    %cst_11 = arith.constant dense<0.000000e+00> : vector<12x240xf32>
    %11 = tpu.matmul %10, %5, %cst_11 {dimension_numbers = #tpu.dot_dimension_numbers<[1], [0], [0], [1], [0, 0, 1, 1], [], []>} : vector<12x28xbf16>, vector<28x240xbf16>, vector<12x240xf32> -> vector<12x240xf32>
    %12 = arith.addf %0, %11 : vector<12x240xf32>
    %cst_12 = arith.constant dense<0.000000e+00> : vector<12x240xf32>
    %13 = tpu.matmul %10, %7, %cst_12 {dimension_numbers = #tpu.dot_dimension_numbers<[1], [0], [0], [1], [0, 0, 1, 1], [], []>} : vector<12x28xbf16>, vector<28x240xbf16>, vector<12x240xf32> -> vector<12x240xf32>
    %14 = arith.addf %1, %13 : vector<12x240xf32>
    %c0_13 = arith.constant 0 : index
    %c0_14 = arith.constant 0 : index
    %c0_15 = arith.constant 0 : index
    %15 = vector.load %arg2[%c0_13, %c0_14, %c0_15] : memref<1x14x28xf32, #tpu.memory_space<vmem>>, vector<1x12x28xf32>
    %16 = vector.shape_cast %15 : vector<1x12x28xf32> to vector<12x28xf32>
    %17 = arith.truncf %16 : vector<12x28xf32> to vector<12x28xbf16>
    %cst_16 = arith.constant dense<0.000000e+00> : vector<12x240xf32>
    %18 = tpu.matmul %17, %5, %cst_16 {dimension_numbers = #tpu.dot_dimension_numbers<[1], [0], [0], [1], [0, 0, 1, 1], [], []>} : vector<12x28xbf16>, vector<28x240xbf16>, vector<12x240xf32> -> vector<12x240xf32>
    %19 = arith.addf %2, %18 : vector<12x240xf32>
    %cst_17 = arith.constant dense<0.000000e+00> : vector<12x240xf32>
    %20 = tpu.matmul %17, %7, %cst_17 {dimension_numbers = #tpu.dot_dimension_numbers<[1], [0], [0], [1], [0, 0, 1, 1], [], []>} : vector<12x28xbf16>, vector<28x240xbf16>, vector<12x240xf32> -> vector<12x240xf32>
    %21 = arith.addf %3, %20 : vector<12x240xf32>
    %c1 = arith.constant 1 : index
    %c0_18 = arith.constant 0 : index
    %c0_19 = arith.constant 0 : index
    %22 = vector.load %arg3[%c1, %c0_18, %c0_19] : memref<5x28x240xbf16, #tpu.memory_space<vmem>>, vector<1x28x240xbf16>
    %23 = vector.shape_cast %22 : vector<1x28x240xbf16> to vector<28x240xbf16>
    %c1_20 = arith.constant 1 : index
    %c0_21 = arith.constant 0 : index
    %c0_22 = arith.constant 0 : index
    %24 = vector.load %arg4[%c1_20, %c0_21, %c0_22] : memref<5x28x240xbf16, #tpu.memory_space<vmem>>, vector<1x28x240xbf16>
    %25 = vector.shape_cast %24 : vector<1x28x240xbf16> to vector<28x240xbf16>
    %c0_23 = arith.constant 0 : index
    %c0_24 = arith.constant 0 : index
    %c0_25 = arith.constant 0 : index
    %26 = vector.load %arg2[%c0_23, %c0_24, %c0_25] : memref<1x14x28xf32, #tpu.memory_space<vmem>>, vector<1x12x28xf32>
    %27 = vector.shape_cast %26 : vector<1x12x28xf32> to vector<12x28xf32>
    %28 = arith.truncf %27 : vector<12x28xf32> to vector<12x28xbf16>
    %cst_26 = arith.constant dense<0.000000e+00> : vector<12x240xf32>
    %29 = tpu.matmul %28, %23, %cst_26 {dimension_numbers = #tpu.dot_dimension_numbers<[1], [0], [0], [1], [0, 0, 1, 1], [], []>} : vector<12x28xbf16>, vector<28x240xbf16>, vector<12x240xf32> -> vector<12x240xf32>
    %30 = arith.addf %12, %29 : vector<12x240xf32>
    %cst_27 = arith.constant dense<0.000000e+00> : vector<12x240xf32>
    %31 = tpu.matmul %28, %25, %cst_27 {dimension_numbers = #tpu.dot_dimension_numbers<[1], [0], [0], [1], [0, 0, 1, 1], [], []>} : vector<12x28xbf16>, vector<28x240xbf16>, vector<12x240xf32> -> vector<12x240xf32>
    %32 = arith.addf %14, %31 : vector<12x240xf32>
    %c0_28 = arith.constant 0 : index
    %c1_29 = arith.constant 1 : index
    %c0_30 = arith.constant 0 : index
    %33 = vector.load %arg1[%c0_28, %c1_29, %c0_30] : memref<1x14x28xf32, #tpu.memory_space<vmem>>, vector<1x12x28xf32>
    %34 = vector.shape_cast %33 : vector<1x12x28xf32> to vector<12x28xf32>
    %35 = arith.truncf %34 : vector<12x28xf32> to vector<12x28xbf16>
    %cst_31 = arith.constant dense<0.000000e+00> : vector<12x240xf32>
    %36 = tpu.matmul %35, %23, %cst_31 {dimension_numbers = #tpu.dot_dimension_numbers<[1], [0], [0], [1], [0, 0, 1, 1], [], []>} : vector<12x28xbf16>, vector<28x240xbf16>, vector<12x240xf32> -> vector<12x240xf32>
    %37 = arith.addf %19, %36 : vector<12x240xf32>
    %cst_32 = arith.constant dense<0.000000e+00> : vector<12x240xf32>
    %38 = tpu.matmul %35, %25, %cst_32 {dimension_numbers = #tpu.dot_dimension_numbers<[1], [0], [0], [1], [0, 0, 1, 1], [], []>} : vector<12x28xbf16>, vector<28x240xbf16>, vector<12x240xf32> -> vector<12x240xf32>
    %39 = arith.addf %21, %38 : vector<12x240xf32>
    %c2 = arith.constant 2 : index
    %c0_33 = arith.constant 0 : index
    %c0_34 = arith.constant 0 : index
    %40 = vector.load %arg3[%c2, %c0_33, %c0_34] : memref<5x28x240xbf16, #tpu.memory_space<vmem>>, vector<1x28x240xbf16>
    %41 = vector.shape_cast %40 : vector<1x28x240xbf16> to vector<28x240xbf16>
    %c2_35 = arith.constant 2 : index
    %c0_36 = arith.constant 0 : index
    %c0_37 = arith.constant 0 : index
    %42 = vector.load %arg4[%c2_35, %c0_36, %c0_37] : memref<5x28x240xbf16, #tpu.memory_space<vmem>>, vector<1x28x240xbf16>
    %43 = vector.shape_cast %42 : vector<1x28x240xbf16> to vector<28x240xbf16>
    %c0_38 = arith.constant 0 : index
    %c1_39 = arith.constant 1 : index
    %c0_40 = arith.constant 0 : index
    %44 = vector.load %arg1[%c0_38, %c1_39, %c0_40] : memref<1x14x28xf32, #tpu.memory_space<vmem>>, vector<1x12x28xf32>
    %45 = vector.shape_cast %44 : vector<1x12x28xf32> to vector<12x28xf32>
    %46 = arith.truncf %45 : vector<12x28xf32> to vector<12x28xbf16>
    %cst_41 = arith.constant dense<0.000000e+00> : vector<12x240xf32>
    %47 = tpu.matmul %46, %41, %cst_41 {dimension_numbers = #tpu.dot_dimension_numbers<[1], [0], [0], [1], [0, 0, 1, 1], [], []>} : vector<12x28xbf16>, vector<28x240xbf16>, vector<12x240xf32> -> vector<12x240xf32>
    %48 = arith.addf %30, %47 : vector<12x240xf32>
    %cst_42 = arith.constant dense<0.000000e+00> : vector<12x240xf32>
    %49 = tpu.matmul %46, %43, %cst_42 {dimension_numbers = #tpu.dot_dimension_numbers<[1], [0], [0], [1], [0, 0, 1, 1], [], []>} : vector<12x28xbf16>, vector<28x240xbf16>, vector<12x240xf32> -> vector<12x240xf32>
    %50 = arith.addf %32, %49 : vector<12x240xf32>
    %c0_43 = arith.constant 0 : index
    %c1_44 = arith.constant 1 : index
    %c0_45 = arith.constant 0 : index
    %51 = vector.load %arg2[%c0_43, %c1_44, %c0_45] : memref<1x14x28xf32, #tpu.memory_space<vmem>>, vector<1x12x28xf32>
    %52 = vector.shape_cast %51 : vector<1x12x28xf32> to vector<12x28xf32>
    %53 = arith.truncf %52 : vector<12x28xf32> to vector<12x28xbf16>
    %cst_46 = arith.constant dense<0.000000e+00> : vector<12x240xf32>
    %54 = tpu.matmul %53, %41, %cst_46 {dimension_numbers = #tpu.dot_dimension_numbers<[1], [0], [0], [1], [0, 0, 1, 1], [], []>} : vector<12x28xbf16>, vector<28x240xbf16>, vector<12x240xf32> -> vector<12x240xf32>
    %55 = arith.addf %37, %54 : vector<12x240xf32>
    %cst_47 = arith.constant dense<0.000000e+00> : vector<12x240xf32>
    %56 = tpu.matmul %53, %43, %cst_47 {dimension_numbers = #tpu.dot_dimension_numbers<[1], [0], [0], [1], [0, 0, 1, 1], [], []>} : vector<12x28xbf16>, vector<28x240xbf16>, vector<12x240xf32> -> vector<12x240xf32>
    %57 = arith.addf %39, %56 : vector<12x240xf32>
    %c3 = arith.constant 3 : index
    %c0_48 = arith.constant 0 : index
    %c0_49 = arith.constant 0 : index
    %58 = vector.load %arg3[%c3, %c0_48, %c0_49] : memref<5x28x240xbf16, #tpu.memory_space<vmem>>, vector<1x28x240xbf16>
    %59 = vector.shape_cast %58 : vector<1x28x240xbf16> to vector<28x240xbf16>
    %c3_50 = arith.constant 3 : index
    %c0_51 = arith.constant 0 : index
    %c0_52 = arith.constant 0 : index
    %60 = vector.load %arg4[%c3_50, %c0_51, %c0_52] : memref<5x28x240xbf16, #tpu.memory_space<vmem>>, vector<1x28x240xbf16>
    %61 = vector.shape_cast %60 : vector<1x28x240xbf16> to vector<28x240xbf16>
    %c0_53 = arith.constant 0 : index
    %c1_54 = arith.constant 1 : index
    %c0_55 = arith.constant 0 : index
    %62 = vector.load %arg2[%c0_53, %c1_54, %c0_55] : memref<1x14x28xf32, #tpu.memory_space<vmem>>, vector<1x12x28xf32>
    %63 = vector.shape_cast %62 : vector<1x12x28xf32> to vector<12x28xf32>
    %64 = arith.truncf %63 : vector<12x28xf32> to vector<12x28xbf16>
    %cst_56 = arith.constant dense<0.000000e+00> : vector<12x240xf32>
    %65 = tpu.matmul %64, %59, %cst_56 {dimension_numbers = #tpu.dot_dimension_numbers<[1], [0], [0], [1], [0, 0, 1, 1], [], []>} : vector<12x28xbf16>, vector<28x240xbf16>, vector<12x240xf32> -> vector<12x240xf32>
    %66 = arith.addf %48, %65 : vector<12x240xf32>
    %cst_57 = arith.constant dense<0.000000e+00> : vector<12x240xf32>
    %67 = tpu.matmul %64, %61, %cst_57 {dimension_numbers = #tpu.dot_dimension_numbers<[1], [0], [0], [1], [0, 0, 1, 1], [], []>} : vector<12x28xbf16>, vector<28x240xbf16>, vector<12x240xf32> -> vector<12x240xf32>
    %68 = arith.addf %50, %67 : vector<12x240xf32>
    %c0_58 = arith.constant 0 : index
    %c2_59 = arith.constant 2 : index
    %c0_60 = arith.constant 0 : index
    %69 = vector.load %arg1[%c0_58, %c2_59, %c0_60] : memref<1x14x28xf32, #tpu.memory_space<vmem>>, vector<1x12x28xf32>
    %70 = vector.shape_cast %69 : vector<1x12x28xf32> to vector<12x28xf32>
    %71 = arith.truncf %70 : vector<12x28xf32> to vector<12x28xbf16>
    %cst_61 = arith.constant dense<0.000000e+00> : vector<12x240xf32>
    %72 = tpu.matmul %71, %59, %cst_61 {dimension_numbers = #tpu.dot_dimension_numbers<[1], [0], [0], [1], [0, 0, 1, 1], [], []>} : vector<12x28xbf16>, vector<28x240xbf16>, vector<12x240xf32> -> vector<12x240xf32>
    %73 = arith.addf %55, %72 : vector<12x240xf32>
    %cst_62 = arith.constant dense<0.000000e+00> : vector<12x240xf32>
    %74 = tpu.matmul %71, %61, %cst_62 {dimension_numbers = #tpu.dot_dimension_numbers<[1], [0], [0], [1], [0, 0, 1, 1], [], []>} : vector<12x28xbf16>, vector<28x240xbf16>, vector<12x240xf32> -> vector<12x240xf32>
    %75 = arith.addf %57, %74 : vector<12x240xf32>
    %c4 = arith.constant 4 : index
    %c0_63 = arith.constant 0 : index
    %c0_64 = arith.constant 0 : index
    %76 = vector.load %arg3[%c4, %c0_63, %c0_64] : memref<5x28x240xbf16, #tpu.memory_space<vmem>>, vector<1x28x240xbf16>
    %77 = vector.shape_cast %76 : vector<1x28x240xbf16> to vector<28x240xbf16>
    %c4_65 = arith.constant 4 : index
    %c0_66 = arith.constant 0 : index
    %c0_67 = arith.constant 0 : index
    %78 = vector.load %arg4[%c4_65, %c0_66, %c0_67] : memref<5x28x240xbf16, #tpu.memory_space<vmem>>, vector<1x28x240xbf16>
    %79 = vector.shape_cast %78 : vector<1x28x240xbf16> to vector<28x240xbf16>
    %c0_68 = arith.constant 0 : index
    %c2_69 = arith.constant 2 : index
    %c0_70 = arith.constant 0 : index
    %80 = vector.load %arg1[%c0_68, %c2_69, %c0_70] : memref<1x14x28xf32, #tpu.memory_space<vmem>>, vector<1x12x28xf32>
    %81 = vector.shape_cast %80 : vector<1x12x28xf32> to vector<12x28xf32>
    %82 = arith.truncf %81 : vector<12x28xf32> to vector<12x28xbf16>
    %cst_71 = arith.constant dense<0.000000e+00> : vector<12x240xf32>
    %83 = tpu.matmul %82, %77, %cst_71 {dimension_numbers = #tpu.dot_dimension_numbers<[1], [0], [0], [1], [0, 0, 1, 1], [], []>} : vector<12x28xbf16>, vector<28x240xbf16>, vector<12x240xf32> -> vector<12x240xf32>
    %84 = arith.addf %66, %83 : vector<12x240xf32>
    %cst_72 = arith.constant dense<0.000000e+00> : vector<12x240xf32>
    %85 = tpu.matmul %82, %79, %cst_72 {dimension_numbers = #tpu.dot_dimension_numbers<[1], [0], [0], [1], [0, 0, 1, 1], [], []>} : vector<12x28xbf16>, vector<28x240xbf16>, vector<12x240xf32> -> vector<12x240xf32>
    %86 = arith.addf %68, %85 : vector<12x240xf32>
    %c0_73 = arith.constant 0 : index
    %c2_74 = arith.constant 2 : index
    %c0_75 = arith.constant 0 : index
    %87 = vector.load %arg2[%c0_73, %c2_74, %c0_75] : memref<1x14x28xf32, #tpu.memory_space<vmem>>, vector<1x12x28xf32>
    %88 = vector.shape_cast %87 : vector<1x12x28xf32> to vector<12x28xf32>
    %89 = arith.truncf %88 : vector<12x28xf32> to vector<12x28xbf16>
    %cst_76 = arith.constant dense<0.000000e+00> : vector<12x240xf32>
    %90 = tpu.matmul %89, %77, %cst_76 {dimension_numbers = #tpu.dot_dimension_numbers<[1], [0], [0], [1], [0, 0, 1, 1], [], []>} : vector<12x28xbf16>, vector<28x240xbf16>, vector<12x240xf32> -> vector<12x240xf32>
    %91 = arith.addf %73, %90 : vector<12x240xf32>
    %cst_77 = arith.constant dense<0.000000e+00> : vector<12x240xf32>
    %92 = tpu.matmul %89, %79, %cst_77 {dimension_numbers = #tpu.dot_dimension_numbers<[1], [0], [0], [1], [0, 0, 1, 1], [], []>} : vector<12x28xbf16>, vector<28x240xbf16>, vector<12x240xf32> -> vector<12x240xf32>
    %93 = arith.addf %75, %92 : vector<12x240xf32>
    %94 = arith.maximumf %84, %86 : vector<12x240xf32>
    %95 = arith.maximumf %91, %93 : vector<12x240xf32>
    %96 = arith.maximumf %94, %95 : vector<12x240xf32>
    %c0_78 = arith.constant 0 : index
    %c0_79 = arith.constant 0 : index
    %97 = vector.load %arg5[%c0_78, %c0_79] : memref<1x240xf32, #tpu.memory_space<vmem>>, vector<1x240xf32>
    %98 = vector.broadcast %97 : vector<1x240xf32> to vector<12x240xf32>
    %99 = arith.addf %96, %98 : vector<12x240xf32>
    %c0_80 = arith.constant 0 : index
    %c0_81 = arith.constant 0 : index
    %c0_82 = arith.constant 0 : index
    %100 = vector.load %arg6[%c0_80, %c0_81, %c0_82] : memref<1x12x240xf32, #tpu.memory_space<vmem>>, vector<1x12x240xf32>
    %101 = vector.shape_cast %100 : vector<1x12x240xf32> to vector<12x240xf32>
    %102 = vector.shape_cast %99 : vector<12x240xf32> to vector<1x12x240xf32>
    tpu.vector_store %arg6[%c0_80, %c0_81, %c0_82], %102 {strides = array<i32>} : memref<1x12x240xf32, #tpu.memory_space<vmem>>, vector<1x12x240xf32>,
    return
  }
  func.func @transform_0(%arg0: i32) -> (i32, i32, i32) {
    %c0_i32 = arith.constant 0 : i32
    %c0_i32_0 = arith.constant 0 : i32
    %c0_i32_1 = arith.constant 0 : i32
    return %arg0, %c0_i32, %c0_i32_0 : i32, i32, i32
  }
  func.func @transform_1(%arg0: i32) -> (i32, i32, i32) {
    %c0_i32 = arith.constant 0 : i32
    %c0_i32_0 = arith.constant 0 : i32
    %c0_i32_1 = arith.constant 0 : i32
    return %arg0, %c0_i32, %c0_i32_0 : i32, i32, i32
  }
  func.func @transform_2(%arg0: i32) -> (i32, i32, i32) {
    %c0_i32 = arith.constant 0 : i32
    %c0_i32_0 = arith.constant 0 : i32
    %c0_i32_1 = arith.constant 0 : i32
    %c0_i32_2 = arith.constant 0 : i32
    return %c0_i32, %c0_i32_0, %c0_i32_1 : i32, i32, i32
  }
  func.func @transform_3(%arg0: i32) -> (i32, i32, i32) {
    %c0_i32 = arith.constant 0 : i32
    %c0_i32_0 = arith.constant 0 : i32
    %c0_i32_1 = arith.constant 0 : i32
    %c0_i32_2 = arith.constant 0 : i32
    return %c0_i32, %c0_i32_0, %c0_i32_1 : i32, i32, i32
  }
  func.func @transform_4(%arg0: i32) -> (i32, i32) {
    %c0_i32 = arith.constant 0 : i32
    %c0_i32_0 = arith.constant 0 : i32
    %c0_i32_1 = arith.constant 0 : i32
    return %c0_i32, %c0_i32_0 : i32, i32
  }
  func.func @transform_5(%arg0: i32) -> (i32, i32, i32) {
    %c0_i32 = arith.constant 0 : i32
    %c0_i32_0 = arith.constant 0 : i32
    %c0_i32_1 = arith.constant 0 : i32
    return %arg0, %c0_i32, %c0_i32_0 : i32, i32, i32
  }
}

module attributes {stable_mosaic.version = 11 : i64} {
  func.func @_fc_kernel(%arg0: i32, %arg1: memref<4x800xf32, #tpu.memory_space<vmem>>, %arg2: memref<800x512xbf16, #tpu.memory_space<vmem>>, %arg3: memref<1x512xf32, #tpu.memory_space<vmem>>, %arg4: memref<512x2xf32, #tpu.memory_space<vmem>>, %arg5: memref<1x2xf32, #tpu.memory_space<vmem>>, %arg6: memref<4x2xf32, #tpu.memory_space<vmem>>) attributes {dimension_semantics = [#tpu.dimension_semantics<parallel>], iteration_bounds = array<i64: 1>, scalar_prefetch = 0 : i64, scratch_operands = 0 : i64, tpu.core_type = #tpu.core_type<tc>, window_params = [{transform_indices = @transform_0, window_bounds = array<i64: 4, 800>}, {pipeline_mode = #tpu.pipeline_mode<synchronous>, transform_indices = @transform_1, window_bounds = array<i64: 800, 512>}, {pipeline_mode = #tpu.pipeline_mode<synchronous>, transform_indices = @transform_2, window_bounds = array<i64: 1, 512>}, {pipeline_mode = #tpu.pipeline_mode<synchronous>, transform_indices = @transform_3, window_bounds = array<i64: 512, 2>}, {pipeline_mode = #tpu.pipeline_mode<synchronous>, transform_indices = @transform_4, window_bounds = array<i64: 1, 2>}, {transform_indices = @transform_5, window_bounds = array<i64: 4, 2>}]} {
    %c0 = arith.constant 0 : index
    %c0_0 = arith.constant 0 : index
    %0 = vector.load %arg1[%c0, %c0_0] : memref<4x800xf32, #tpu.memory_space<vmem>>, vector<4x800xf32>
    %1 = arith.truncf %0 : vector<4x800xf32> to vector<4x800xbf16>
    %c0_1 = arith.constant 0 : index
    %c0_2 = arith.constant 0 : index
    %2 = vector.load %arg2[%c0_1, %c0_2] : memref<800x512xbf16, #tpu.memory_space<vmem>>, vector<800x512xbf16>
    %cst = arith.constant dense<0.000000e+00> : vector<4x512xf32>
    %3 = tpu.matmul %1, %2, %cst {dimension_numbers = #tpu.dot_dimension_numbers<[1], [0], [0], [1], [0, 0, 1, 1], [], []>} : vector<4x800xbf16>, vector<800x512xbf16>, vector<4x512xf32> -> vector<4x512xf32>
    %c0_3 = arith.constant 0 : index
    %c0_4 = arith.constant 0 : index
    %4 = vector.load %arg3[%c0_3, %c0_4] : memref<1x512xf32, #tpu.memory_space<vmem>>, vector<1x512xf32>
    %5 = vector.broadcast %4 : vector<1x512xf32> to vector<4x512xf32>
    %6 = arith.addf %3, %5 : vector<4x512xf32>
    %cst_5 = arith.constant 0.000000e+00 : f32
    %7 = vector.broadcast %cst_5 : f32 to vector<4x512xf32>
    %8 = arith.maximumf %6, %7 : vector<4x512xf32>
    %c0_6 = arith.constant 0 : index
    %c0_7 = arith.constant 0 : index
    %9 = vector.load %arg4[%c0_6, %c0_7] : memref<512x2xf32, #tpu.memory_space<vmem>>, vector<512x2xf32>
    %cst_8 = arith.constant dense<0.000000e+00> : vector<4x2xf32>
    %10 = tpu.matmul %8, %9, %cst_8 {dimension_numbers = #tpu.dot_dimension_numbers<[1], [0], [0], [1], [0, 0, 1, 1], [], []>} : vector<4x512xf32>, vector<512x2xf32>, vector<4x2xf32> -> vector<4x2xf32>
    %c0_9 = arith.constant 0 : index
    %c0_10 = arith.constant 0 : index
    %11 = vector.load %arg5[%c0_9, %c0_10] : memref<1x2xf32, #tpu.memory_space<vmem>>, vector<1x2xf32>
    %12 = vector.broadcast %11 : vector<1x2xf32> to vector<4x2xf32>
    %13 = arith.addf %10, %12 : vector<4x2xf32>
    %c0_11 = arith.constant 0 : index
    %c0_12 = arith.constant 0 : index
    %14 = vector.load %arg6[%c0_11, %c0_12] : memref<4x2xf32, #tpu.memory_space<vmem>>, vector<4x2xf32>
    tpu.vector_store %arg6[%c0_11, %c0_12], %13 {strides = array<i32>} : memref<4x2xf32, #tpu.memory_space<vmem>>, vector<4x2xf32>,
    return
  }
  func.func @transform_0(%arg0: i32) -> (i32, i32) {
    %c0_i32 = arith.constant 0 : i32
    %c0_i32_0 = arith.constant 0 : i32
    return %arg0, %c0_i32 : i32, i32
  }
  func.func @transform_1(%arg0: i32) -> (i32, i32) {
    %c0_i32 = arith.constant 0 : i32
    %c0_i32_0 = arith.constant 0 : i32
    %c0_i32_1 = arith.constant 0 : i32
    return %c0_i32, %c0_i32_0 : i32, i32
  }
  func.func @transform_2(%arg0: i32) -> (i32, i32) {
    %c0_i32 = arith.constant 0 : i32
    %c0_i32_0 = arith.constant 0 : i32
    %c0_i32_1 = arith.constant 0 : i32
    return %c0_i32, %c0_i32_0 : i32, i32
  }
  func.func @transform_3(%arg0: i32) -> (i32, i32) {
    %c0_i32 = arith.constant 0 : i32
    %c0_i32_0 = arith.constant 0 : i32
    %c0_i32_1 = arith.constant 0 : i32
    return %c0_i32, %c0_i32_0 : i32, i32
  }
  func.func @transform_4(%arg0: i32) -> (i32, i32) {
    %c0_i32 = arith.constant 0 : i32
    %c0_i32_0 = arith.constant 0 : i32
    %c0_i32_1 = arith.constant 0 : i32
    return %c0_i32, %c0_i32_0 : i32, i32
  }
  func.func @transform_5(%arg0: i32) -> (i32, i32) {
    %c0_i32 = arith.constant 0 : i32
    %c0_i32_0 = arith.constant 0 : i32
    return %arg0, %c0_i32 : i32, i32
  }
}

</mosaic_0001>

<bundles_post_ra>
// kernel: siamese_forward.3
= control target key start
LH: loop header
LB: loop body
LE: loop exit
PB: predicated region body
PF: predicated region fallthrough
CT: control target
= control target key end

     0   :  { %10 = vsyncpa [#allocation3], 0  ;;  %s2195_s0 = inlined_call_operand.vmem [shape: f32[4,14,28], index: 0, kind: input, shape index: {}]   ;;  %s2196_s1 = inlined_call_operand.vmem [shape: f32[4,14,28], index: 1, kind: input, shape index: {}]   ;;  %s2197_s2 = inlined_call_operand.hbm [shape: bf16[5,28,240], index: 2, kind: input, shape index: {}]   ;;  %s2198_s3 = inlined_call_operand.hbm [shape: bf16[5,28,240], index: 3, kind: input, shape index: {}]   ;;  %s2199_s4 = inlined_call_operand.vmem [shape: f32[1,240], index: 4, kind: input, shape index: {}]   ;;  %s2200_s5 = inlined_call_operand.vmem [shape: f32[4,12,240], index: 5, kind: output, shape index: {}]  }
   0x1   :  { %11 = vsyncpa [#allocation5], 0  ;;  %s1996_s18 = smov 0  }
   0x2 LB: > { %s2002_s19 = sadd.s32 4294967295, %s1959_s18   ;;  %p1635_p0 = scmp.ge.s32.totalorder %s1959_s18, 1  ;;  %s1959_s18 = sphi %s1996_s18, %s17_s18  }
   0x3   : > { %p163_p1 = scmp.lt.s32.totalorder %s1959_s18, 5  ;;  %s1961_s20 = smov [#allocation2]  }
   0x4   : > { %s175_s21 = sshll.u32 %s1961_s20, 4  ;;  %p2201_p3 = scmp.eq.s32.totalorder %s2002_s19, 0  ;;  %s176_s21 = int_to_ptr.vmem [resolvable:$true] %s175_s21 }
   0x5   : > { %p2006_p2 = pnand %p1635_p0, %p163_p1  ;;  %s1962_s23 = smov [#allocation4]  }
   0x6   : > { %s188_s24 = sshll.u32 %s1962_s23, 4  ;;  %s1889_s28 = scalar_lea.hbm %s2197_s2, 2560  ;;  %s2019_s24 = int_to_ptr.vmem [resolvable:$true] %s188_s24 }
   0x7   : > { %s2203_s22 = scalar_select %p2006_p2, 1, 0 }
   0x8   : > { %p1805_p4 = pneg %p2006_p2  ;;  %p1890_p6 = scmp.ne.s32.totalorder %s2197_s2, %s1889_s28 }
   0x9   : > { %p1896_p10 = scmp.lt.u32.totalorder %s1889_s28, %s2197_s2 }
   0xa   : > { %p2015_p5 = pnand %p2201_p3, %p1805_p4 }
   0xc   : > { %p1891_p7 = pneg %p2015_p5 }
   0xe   : > { %p1892_p8 = pnand %p1891_p7, %p1890_p6 }
  0x10   : > { %p1893_p9 = pneg %p1892_p8 }
  0x12   : > { %p1898_p11 = pnand %p1896_p10, %p1893_p9 }
  0x14   : > { %1901 = shalt.err (!%p1898_p11)
}
  0x15   : > { %s1902_s8 = scalar_lea.vmem %s176_s21, 2560  ;;  %p1910_p1 = scmp.lt.s32.totalorder %s176_s21, %s176_s21 }
  0x16   : > { %p1903_p12 = scmp.ne.s32.totalorder %s176_s21, %s1902_s8  ;;  %p1911_p4 = scmp.lt.s32.totalorder %s1902_s8, %s1902_s8 }
  0x18   : > { %p1905_p13 = pnand %p1903_p12, %p1891_p7  ;;  %p1912_p3 = por %p1911_p4, %p1910_p1 }
  0x1a   : > { %p1906_p0 = pneg %p1905_p13 }
  0x1c   : > { %p1913_p2 = pnand %p1912_p3, %p1906_p0 }
  0x1e   : > { %1916 = shalt.err (!%p1913_p2)
}
  0x1f   : > { %s1963_s9 = smov 128   ;;  %s1964_s10 = smov 8  }
  0x20   : > { %1808 = dma.hbm_to_vmem [thread:$0]  (!%p2015_p5), %s2197_s2, 2560, %s176_s21, [#allocation3], %s1963_s9, %s1963_s9, %s1964_s10  }
  0x21   : > { %s1917_s15 = scalar_lea.hbm %s2198_s3, 2560 }
  0x22   : > { %p1918_p6 = scmp.ne.s32.totalorder %s2198_s3, %s1917_s15  ;;  %p1924_p8 = scmp.lt.u32.totalorder %s1917_s15, %s2198_s3 }
  0x24   : > { %p1920_p2 = pnand %p1918_p6, %p1891_p7 }
  0x26   : > { %p1921_p3 = pneg %p1920_p2 }
  0x28   : > { %p1926_p9 = pnand %p1924_p8, %p1921_p3 }
  0x2a   : > { %1929 = shalt.err (!%p1926_p9)
}
  0x2b   : > { %s1930_s21 = scalar_lea.vmem %s2019_s24, 2560  ;;  %p1938_p13 = scmp.lt.s32.totalorder %s2019_s24, %s2019_s24 }
  0x2c   : > { %p1931_p10 = scmp.ne.s32.totalorder %s2019_s24, %s1930_s21  ;;  %p1939_p0 = scmp.lt.s32.totalorder %s1930_s21, %s1930_s21 }
  0x2e   : > { %p1933_p11 = pnand %p1931_p10, %p1891_p7  ;;  %p1940_p1 = por %p1939_p0, %p1938_p13 }
  0x30   : > { %p1934_p12 = pneg %p1933_p11 }
  0x32   : > { %p1941_p4 = pnand %p1940_p1, %p1934_p12 }
  0x34   : > { %1944 = shalt.err (!%p1941_p4)
}
  0x35   : > { %1811 = dma.hbm_to_vmem [thread:$0]  (!%p2015_p5), %s2198_s3, 2560, %s2019_s24, [#allocation5], %s1963_s9, %s1963_s9, %s1964_s10  }
  0x36   : > { %p2205_p6 = scmp.ne.s32.totalorder %s2203_s22, 0 }
  0x37   : > { %p2206_p2 = scmp.eq.s32.totalorder (!%p2205_p6), %s2002_s19, 0 }
  0x38   : > { %223 = sbr.rel (%p2205_p6) target bundleno = 379 (0x17b), region = 40 }
  0x3f   : > { %1950 = dma.done.wait (%p2206_p2), [#allocation3], 2560   ;;  %p2207_p7 = pmov %p2206_p2 }
  0x40   : > { %p2208_p3 = pmov %p2206_p2 }
  0x41   : > { %1952 = vsyncadd (%p2207_p7), [#allocation3], 4294964736 }
  0x42   : > { %1954 = dma.done.wait (%p2208_p3), [#allocation5], 2560   ;;  %p2209_p8 = pmov %p2206_p2 }
  0x43   : > { %p260_p9 = scmp.lt.s32.totalorder %s2002_s19, 3  ;;  %v1965_v0 = vmov 0   ;;  %v1829_v1 = vld [vmem:[#allocation2 + $0x24] ss:$8 sps:$4 sm:$0xff]   ;;  %v1833_v3 = vld [vmem:[#allocation2 + $0x20] ss:$8 sps:$4 sm:$0xff]  }
  0x44   : > { %1956 = vsyncadd (%p2209_p8), [#allocation5], 4294964736  ;;  %361 = vmatprep.mubr.bf16.mxu0 %v1965_v0  ;;  %498 = vmatprep.mubr.bf16.mxu1 %v1965_v0  ;;  %v1831_v2 = vld [vmem:[#allocation4 + $0x24] ss:$8 sps:$4 sm:$0xff]   ;;  %v1834_v4 = vld [vmem:[#allocation4 + $0x20] ss:$8 sps:$4 sm:$0xff]  }
  0x45   : > { %s2211_s19 = smov (!%p260_p9, %s2002_s19), 3  ;;  %329 = vmatprep.subr.bf16.mxu0 %v1829_v1  ;;  %vm322_vm0 = vcmask 1045504   ;;  %466 = vmatprep.subr.bf16.mxu1 %v1831_v2  ;;  %v1835_v5 = vld [vmem:[#allocation2 + $0x34] ss:$8 sps:$4 sm:$0x3f]   ;;  %vm318_vm1 = vcmask 228352  }
  0x46   : > { %s1730_s22 = sshll.u32 %s2211_s19, 4  ;;  %330 = vmatpush1.bf16.msra.mxu0 %v1833_v3  ;;  %467 = vmatpush1.bf16.msra.mxu1 %v1834_v4  ;;  %v1837_v6 = vld [vmem:[#allocation4 + $0x34] ss:$8 sps:$4 sm:$0x3f]   ;;  %v1841_v14 = vld [vmem:[#allocation2] ss:$8 sps:$4 sm:$0xff]  }
  0x47   : > { %s2090_s28 = scalar_lea.vmem %s2196_s1, %s1730_s22  ;;  %1652 = vmatprep.subr.msk.bf16.mxu0 %vm322_vm0, %v1835_v5  ;;  %v1839_v8 = vld [vmem:[#allocation2 + $0x30] ss:$8 sps:$4 sm:$0x3f]   ;;  %1664 = vmatprep.subr.msk.bf16.mxu1 %vm322_vm0, %v1837_v6  ;;  %v1843_v15 = vld [vmem:[#allocation2 + $0x4] ss:$8 sps:$4 sm:$0xff]   ;;  %s2109_s6 = scalar_lea.vmem %s2195_s0, %s1730_s22  ;;  %vm1539_vm2 = vcmask 916480  }
  0x48   : > { %v287_v7 = vld [vmem:[%s2090_s28] sm:$0xff]  ;;  %v1840_v9 = vld [vmem:[#allocation4 + $0x30] ss:$8 sps:$4 sm:$0x3f]   ;;  %v288_v10 = vld [vmem:[%s2090_s28 + $0x8] sm:$0xf] }
  0x49   : > { %v324_v11 = vsel %vm322_vm0, %v1839_v8, 0  ;;  %v461_v12 = vsel %vm322_vm0, %v1840_v9, 0  ;;  %v2098_v13 = vpack.c.bf16 %v288_v10, %v287_v7  ;;  %v1844_v16 = vld [vmem:[#allocation4] ss:$8 sps:$4 sm:$0xff]   ;;  %v1846_v17 = vld [vmem:[#allocation4 + $0x4] ss:$8 sps:$4 sm:$0xff]  }
  0x4a   : > { %332 = vmatpush1.bf16.msra.mxu0 %v324_v11  ;;  %469 = vmatpush1.bf16.msra.mxu1 %v461_v12  ;;  %v1847_v18 = vld [vmem:[#allocation2 + $0x14] ss:$8 sps:$4 sm:$0x3f]   ;;  %v1851_v20 = vld [vmem:[#allocation2 + $0x10] ss:$8 sps:$4 sm:$0x3f]  }
  0x4b   : > { %399 = vmatprep.subr.bf16.mxu0 %v1843_v15  ;;  %v1849_v19 = vld [vmem:[#allocation4 + $0x14] ss:$8 sps:$4 sm:$0x3f]   ;;  %533 = vmatprep.subr.bf16.mxu1 %v1846_v17  ;;  %v1852_v21 = vld [vmem:[#allocation4 + $0x10] ss:$8 sps:$4 sm:$0x3f]  }
  0x4c   : > { %v394_v22 = vsel %vm322_vm0, %v1851_v20, 0  ;;  %v528_v23 = vsel %vm322_vm0, %v1852_v21, 0  ;;  %v284_v24 = vld [vmem:[%s2109_s6] sm:$0xff]  ;;  %v285_v25 = vld [vmem:[%s2109_s6 + $0x8] sm:$0xf]  ;;  %s1732_s9 = sshll.u32 %s2211_s19, 5 }
  0x4d   : > { %1653 = vmatmul.mubr.msk.bf16.vlgmr.msra.gmra.mrb[0].mxu0 %vm318_vm1, %v2098_v13  ;;  %1665 = vmatmul.mubr.msk.bf16.vlgmr.msra.gmra.mrb[0].mxu1 %vm318_vm1, %v2098_v13  ;;  %v286_v26 = vpack.c.bf16 %v285_v25, %v284_v24  ;;  %v576_v27 = vld [vmem:[%s2109_s6 + $0x1] sm:$0xff]  ;;  %v577_v28 = vld [vmem:[%s2109_s6 + $0x9] sm:$0xf]  ;;  %v1859_v34 = vld [vmem:[#allocation2 + $0x54] ss:$8 sps:$4 sm:$0x3f]   ;;  %s274_s12 = scalar_lea.vmem %s2200_s5, %s1732_s9 }
  0x4e   : > { %400 = vmatpush1.bf16.msra.mxu0 %v1841_v14  ;;  %534 = vmatpush1.bf16.msra.mxu1 %v1844_v16  ;;  %v578_v29 = vpack.c.bf16 %v577_v28, %v576_v27  ;;  %v1855_v30 = vld [vmem:[#allocation2 + $0x44] ss:$8 sps:$4 sm:$0xff]   ;;  %v1853_v32 = vld [vmem:[#allocation2 + $0x40] ss:$8 sps:$4 sm:$0xff]   ;;  %vm1542_vm3 = vcmask 912384  }
  0x4f   : > { %1658 = vmatprep.subr.msk.bf16.mxu0 %vm322_vm0, %v1847_v18  ;;  %1670 = vmatprep.subr.msk.bf16.mxu1 %vm322_vm0, %v1849_v19  ;;  %v1858_v31 = vld [vmem:[#allocation4 + $0x44] ss:$8 sps:$4 sm:$0xff]   ;;  %v1856_v33 = vld [vmem:[#allocation4 + $0x40] ss:$8 sps:$4 sm:$0xff]  }
  0x50   : > { %431 = vmatprep.mubr.bf16.mxu0 %v1965_v0  ;;  %565 = vmatprep.mubr.bf16.mxu1 %v1965_v0  ;;  %v1861_v35 = vld [vmem:[#allocation4 + $0x54] ss:$8 sps:$4 sm:$0x3f]   ;;  %v1863_v36 = vld [vmem:[#allocation2 + $0x50] ss:$8 sps:$4 sm:$0x3f]  }
  0x51   : > { %v1864_v37 = vld [vmem:[#allocation4 + $0x50] ss:$8 sps:$4 sm:$0x3f]   ;;  %v783_v38 = vsel %vm322_vm0, %v1863_v36, 0  ;;  %v906_v40 = vld [vmem:[%s2090_s28 + $0x1] sm:$0xff] }
  0x52   : > { %402 = vmatpush1.bf16.msra.mxu0 %v394_v22  ;;  %536 = vmatpush1.bf16.msra.mxu1 %v528_v23  ;;  %v854_v39 = vsel %vm322_vm0, %v1864_v37, 0  ;;  %v907_v41 = vld [vmem:[%s2090_s28 + $0x9] sm:$0xf]  ;;  %v1871_v47 = vld [vmem:[#allocation2 + $0x74] ss:$8 sps:$4 sm:$0x3f]  }
  0x53   : > { %582 = vmatprep.subr.bf16.mxu0 %v1829_v1  ;;  %668 = vmatprep.subr.bf16.mxu1 %v1831_v2  ;;  %v1867_v42 = vld [vmem:[#allocation2 + $0x64] ss:$8 sps:$4 sm:$0xff]   ;;  %v908_v44 = vpack.c.bf16 %v907_v41, %v906_v40  ;;  %v1865_v45 = vld [vmem:[#allocation2 + $0x60] ss:$8 sps:$4 sm:$0xff]  }
  0x54   : > { %v1870_v43 = vld [vmem:[#allocation4 + $0x64] ss:$8 sps:$4 sm:$0xff]   ;;  %v1868_v46 = vld [vmem:[#allocation4 + $0x60] ss:$8 sps:$4 sm:$0xff]  }
  0x55   : > { %v1873_v48 = vld [vmem:[#allocation4 + $0x74] ss:$8 sps:$4 sm:$0x3f]   ;;  %v1875_v49 = vld [vmem:[#allocation2 + $0x70] ss:$8 sps:$4 sm:$0x3f]  }
  0x56   : > { %v1876_v50 = vld [vmem:[#allocation4 + $0x70] ss:$8 sps:$4 sm:$0x3f]   ;;  %v1035_v51 = vsel %vm322_vm0, %v1875_v49, 0  ;;  %v1158_v53 = vld [vmem:[%s2109_s6 + $0x2] sm:$0xff] }
  0x57   : > { %v1106_v52 = vsel %vm322_vm0, %v1876_v50, 0  ;;  %v1159_v54 = vld [vmem:[%s2109_s6 + $0xa] sm:$0xf]  ;;  %v1883_v60 = vld [vmem:[#allocation2 + $0x94] ss:$8 sps:$4 sm:$0x3f]  }
  0x58   : > { %v1879_v55 = vld [vmem:[#allocation2 + $0x84] ss:$8 sps:$4 sm:$0xff]   ;;  %v1160_v57 = vpack.c.bf16 %v1159_v54, %v1158_v53  ;;  %v1877_v58 = vld [vmem:[#allocation2 + $0x80] ss:$8 sps:$4 sm:$0xff]  }
  0x59   : > { %1659 = vmatmul.mubr.msk.bf16.vlgmr.msra.gmra.mrb[0].mxu0 %vm318_vm1, %v286_v26  ;;  %1671 = vmatmul.mubr.msk.bf16.vlgmr.msra.gmra.mrb[0].mxu1 %vm318_vm1, %v286_v26  ;;  %v1882_v56 = vld [vmem:[#allocation4 + $0x84] ss:$8 sps:$4 sm:$0xff]   ;;  %v1880_v59 = vld [vmem:[#allocation4 + $0x80] ss:$8 sps:$4 sm:$0xff]  }
  0x5a   : > { %583 = vmatpush1.bf16.msra.mxu0 %v1833_v3  ;;  %669 = vmatpush1.bf16.msra.mxu1 %v1834_v4  ;;  %v1885_v61 = vld [vmem:[#allocation4 + $0x94] ss:$8 sps:$4 sm:$0x3f]   ;;  %v1887_v62 = vld [vmem:[#allocation2 + $0x90] ss:$8 sps:$4 sm:$0x3f]  }
  0x5b   : > { %1672 = vmatprep.subr.msk.bf16.mxu0 %vm322_vm0, %v1835_v5  ;;  %1676 = vmatprep.subr.msk.bf16.mxu1 %vm322_vm0, %v1837_v6  ;;  %v1888_v63 = vld [vmem:[#allocation4 + $0x90] ss:$8 sps:$4 sm:$0x3f]   ;;  %v1287_v1 = vsel %vm322_vm0, %v1887_v62, 0  ;;  %v1410_v3 = vld [vmem:[%s2090_s28 + $0x2] sm:$0xff]  ;;  %v1524_v6 = vlaneseq }
  0x5c   : > { %614 = vmatprep.mubr.bf16.mxu0 %v1965_v0  ;;  %700 = vmatprep.mubr.bf16.mxu1 %v1965_v0  ;;  %v1358_v2 = vsel %vm322_vm0, %v1888_v63, 0  ;;  %v1411_v4 = vld [vmem:[%s2090_s28 + $0xa] sm:$0xf]  ;;  %v1522_v20 = vld [vmem:[%s2199_s4] sm:$0x3] }
  0x5d   : > { %v1412_v5 = vpack.c.bf16 %v1411_v4, %v1410_v3 }
  0x5e   : > { %585 = vmatpush1.bf16.msra.mxu0 %v324_v11  ;;  %671 = vmatpush1.bf16.msra.mxu1 %v461_v12  ;;  %v1525_v12 = vshrl.u32 %v1524_v6, 7 }
  0x5f   : > { %625 = vmatprep.subr.bf16.mxu0 %v1843_v15  ;;  %711 = vmatprep.subr.bf16.mxu1 %v1846_v17 }
  0x60   : > { %v1530_v21 = vsub.s32 1, %v1525_v12 }
  0x61   : > { %1673 = vmatmul.mubr.msk.bf16.vlgmr.msra.gmra.mrb[4].mxu0 %vm318_vm1, %v578_v29  ;;  %1677 = vmatmul.mubr.msk.bf16.vlgmr.msra.gmra.mrb[4].mxu1 %vm318_vm1, %v578_v29 }
  0x62   : > { %626 = vmatpush1.bf16.msra.mxu0 %v1841_v14  ;;  %712 = vmatpush1.bf16.msra.mxu1 %v1844_v16 }
  0x63   : > { %1674 = vmatprep.subr.msk.bf16.mxu0 %vm322_vm0, %v1847_v18  ;;  %1678 = vmatprep.subr.msk.bf16.mxu1 %vm322_vm0, %v1849_v19  ;;  %v1526_v19 = vsub.s32 0, %v1525_v12 }
  0x64   : > { %657 = vmatprep.mubr.bf16.mxu0 %v1965_v0  ;;  %743 = vmatprep.mubr.bf16.mxu1 %v1965_v0 }
  0x65   : > { %v1527_v25 = vrot.slane %v1522_v20, %v1526_v19 }
  0x66   : > { %628 = vmatpush1.bf16.msra.mxu0 %v394_v22  ;;  %714 = vmatpush1.bf16.msra.mxu1 %v528_v23 }
  0x67   : > { %788 = vmatprep.subr.bf16.mxu0 %v1855_v30  ;;  %859 = vmatprep.subr.bf16.mxu1 %v1858_v31 }
  0x6d   : > { %1675 = vmatmul.mubr.msk.bf16.vlgmr.msra.gmra.mrb[4].mxu0 %vm318_vm1, %v2098_v13  ;;  %1679 = vmatmul.mubr.msk.bf16.vlgmr.msra.gmra.mrb[4].mxu1 %vm318_vm1, %v2098_v13 }
  0x6e   : > { %789 = vmatpush1.bf16.msra.mxu0 %v1853_v32  ;;  %860 = vmatpush1.bf16.msra.mxu1 %v1856_v33 }
  0x6f   : > { %1684 = vmatprep.subr.msk.bf16.mxu0 %vm322_vm0, %v1859_v34  ;;  %1690 = vmatprep.subr.msk.bf16.mxu1 %vm322_vm0, %v1861_v35 }
  0x70   : > { %820 = vmatprep.mubr.bf16.mxu0 %v1965_v0  ;;  %891 = vmatprep.mubr.bf16.mxu1 %v1965_v0 }
  0x72   : > { %791 = vmatpush1.bf16.msra.mxu0 %v783_v38  ;;  %862 = vmatpush1.bf16.msra.mxu1 %v854_v39 }
  0x73   : > { %912 = vmatprep.subr.bf16.mxu0 %v1855_v30  ;;  %959 = vmatprep.subr.bf16.mxu1 %v1858_v31 }
  0x75   : > { %1685 = vmatmul.mubr.msk.bf16.vlgmr.msra.gmra.mrb[0].mxu0 %vm318_vm1, %v578_v29  ;;  %1691 = vmatmul.mubr.msk.bf16.vlgmr.msra.gmra.mrb[0].mxu1 %vm318_vm1, %v578_v29  ;;  %v1531_v29 = vrot.slane %v1522_v20, %v1530_v21 }
  0x76   : > { %913 = vmatpush1.bf16.msra.mxu0 %v1853_v32  ;;  %960 = vmatpush1.bf16.msra.mxu1 %v1856_v33 }
  0x77   : > { %1692 = vmatprep.subr.msk.bf16.mxu0 %vm322_vm0, %v1859_v34  ;;  %1694 = vmatprep.subr.msk.bf16.mxu1 %vm322_vm0, %v1861_v35 }
  0x78   : > { %944 = vmatprep.mubr.bf16.mxu0 %v1965_v0  ;;  %991 = vmatprep.mubr.bf16.mxu1 %v1965_v0 }
  0x7a   : > { %915 = vmatpush1.bf16.msra.mxu0 %v783_v38  ;;  %962 = vmatpush1.bf16.msra.mxu1 %v854_v39 }
  0x7b   : > { %1040 = vmatprep.subr.bf16.mxu0 %v1867_v42  ;;  %1111 = vmatprep.subr.bf16.mxu1 %v1870_v43 }
  0x7d   : > { %1693 = vmatmul.mubr.msk.bf16.vlgmr.msra.gmra.mrb[4].mxu0 %vm318_vm1, %v908_v44  ;;  %1695 = vmatmul.mubr.msk.bf16.vlgmr.msra.gmra.mrb[4].mxu1 %vm318_vm1, %v908_v44 }
  0x7e   : > { %1041 = vmatpush1.bf16.msra.mxu0 %v1865_v45  ;;  %1112 = vmatpush1.bf16.msra.mxu1 %v1868_v46 }
  0x7f   : > { %1700 = vmatprep.subr.msk.bf16.mxu0 %vm322_vm0, %v1871_v47  ;;  %1706 = vmatprep.subr.msk.bf16.mxu1 %vm322_vm0, %v1873_v48 }
  0x80   : > { %1072 = vmatprep.mubr.bf16.mxu0 %v1965_v0  ;;  %1143 = vmatprep.mubr.bf16.mxu1 %v1965_v0 }
  0x82   : > { %1043 = vmatpush1.bf16.msra.mxu0 %v1035_v51  ;;  %1114 = vmatpush1.bf16.msra.mxu1 %v1106_v52 }
  0x83   : > { %1164 = vmatprep.subr.bf16.mxu0 %v1867_v42  ;;  %1211 = vmatprep.subr.bf16.mxu1 %v1870_v43 }
  0x85   : > { %1701 = vmatmul.mubr.msk.bf16.vlgmr.msra.gmra.mrb[0].mxu0 %vm318_vm1, %v908_v44  ;;  %1707 = vmatmul.mubr.msk.bf16.vlgmr.msra.gmra.mrb[0].mxu1 %vm318_vm1, %v908_v44 }
  0x86   : > { %1165 = vmatpush1.bf16.msra.mxu0 %v1865_v45  ;;  %1212 = vmatpush1.bf16.msra.mxu1 %v1868_v46 }
  0x87   : > { %1708 = vmatprep.subr.msk.bf16.mxu0 %vm322_vm0, %v1871_v47  ;;  %1710 = vmatprep.subr.msk.bf16.mxu1 %vm322_vm0, %v1873_v48 }
  0x88   : > { %1196 = vmatprep.mubr.bf16.mxu0 %v1965_v0  ;;  %1243 = vmatprep.mubr.bf16.mxu1 %v1965_v0 }
  0x8a   : > { %1167 = vmatpush1.bf16.msra.mxu0 %v1035_v51  ;;  %1214 = vmatpush1.bf16.msra.mxu1 %v1106_v52 }
  0x8b   : > { %1292 = vmatprep.subr.bf16.mxu0 %v1879_v55  ;;  %1363 = vmatprep.subr.bf16.mxu1 %v1882_v56 }
  0x8d   : > { %1709 = vmatmul.mubr.msk.bf16.vlgmr.msra.gmra.mrb[4].mxu0 %vm318_vm1, %v1160_v57  ;;  %1711 = vmatmul.mubr.msk.bf16.vlgmr.msra.gmra.mrb[4].mxu1 %vm318_vm1, %v1160_v57 }
  0x8e   : > { %1293 = vmatpush1.bf16.msra.mxu0 %v1877_v58  ;;  %1364 = vmatpush1.bf16.msra.mxu1 %v1880_v59 }
  0x8f   : > { %1716 = vmatprep.subr.msk.bf16.mxu0 %vm322_vm0, %v1883_v60  ;;  %1722 = vmatprep.subr.msk.bf16.mxu1 %vm322_vm0, %v1885_v61 }
  0x90   : > { %1324 = vmatprep.mubr.bf16.mxu0 %v1965_v0  ;;  %1395 = vmatprep.mubr.bf16.mxu1 %v1965_v0 }
  0x92   : > { %1295 = vmatpush1.bf16.msra.mxu0 %v1287_v1  ;;  %1366 = vmatpush1.bf16.msra.mxu1 %v1358_v2 }
  0x93   : > { %1416 = vmatprep.subr.bf16.mxu0 %v1879_v55  ;;  %1463 = vmatprep.subr.bf16.mxu1 %v1882_v56 }
  0x95   : > { %1717 = vmatmul.mubr.msk.bf16.vlgmr.msra.gmra.mrb[0].mxu0 %vm318_vm1, %v1160_v57  ;;  %1723 = vmatmul.mubr.msk.bf16.vlgmr.msra.gmra.mrb[0].mxu1 %vm318_vm1, %v1160_v57 }
  0x96   : > { %1417 = vmatpush1.bf16.msra.mxu0 %v1877_v58  ;;  %1464 = vmatpush1.bf16.msra.mxu1 %v1880_v59 }
  0x97   : > { %1724 = vmatprep.subr.msk.bf16.mxu0 %vm322_vm0, %v1883_v60  ;;  %1726 = vmatprep.subr.msk.bf16.mxu1 %vm322_vm0, %v1885_v61 }
  0x98   : > { %1448 = vmatprep.mubr.bf16.mxu0 %v1965_v0  ;;  %1495 = vmatprep.mubr.bf16.mxu1 %v1965_v0 }
  0x9a   : > { %1419 = vmatpush1.bf16.msra.mxu0 %v1287_v1  ;;  %1466 = vmatpush1.bf16.msra.mxu1 %v1358_v2 }
  0x9d   : > { %1725 = vmatmul.mubr.msk.bf16.vlgmr.msra.gmra.mrb[4].mxu0 %vm318_vm1, %v1412_v5  ;;  %1727 = vmatmul.mubr.msk.bf16.vlgmr.msra.gmra.mrb[4].mxu1 %vm318_vm1, %v1412_v5 }
 0x168   : > { %v1326_v7 = vpop.f32.mrb[0].mxu0  ;;  %v1397_v8 = vpop.f32.mrb[0].mxu1 }
 0x169   : > { %v1510_v9 = vmax.f32 %v1326_v7, %v1397_v8  ;;  %v1328_v10 = vpop.f32.mrb[1].mxu0  ;;  %v1399_v11 = vpop.f32.mrb[1].mxu1 }
 0x16a   : > { %v1511_v13 = vmax.f32 %v1328_v10, %v1399_v11  ;;  %v1330_v14 = vpop.f32.mrb[2].mxu0  ;;  %v1401_v15 = vpop.f32.mrb[2].mxu1 }
 0x16b   : > { %v1512_v16 = vmax.f32 %v1330_v14, %v1401_v15  ;;  %v1332_v0 = vpop.f32.mrb[3].mxu0  ;;  %v1403_v17 = vpop.f32.mrb[3].mxu1 }
 0x16c   : > { %v1513_v18 = vmax.f32 %v1332_v0, %v1403_v17 }
 0x170   : > { %v1450_v22 = vpop.f32.mrb[4].mxu0  ;;  %v1497_v23 = vpop.f32.mrb[4].mxu1 }
 0x171   : > { %v1514_v24 = vmax.f32 %v1450_v22, %v1497_v23  ;;  %v1452_v26 = vpop.f32.mrb[5].mxu0  ;;  %v1499_v27 = vpop.f32.mrb[5].mxu1 }
 0x172   : > { %v1515_v28 = vmax.f32 %v1452_v26, %v1499_v27  ;;  %v1454_v30 = vpop.f32.mrb[6].mxu0  ;;  %v1501_v31 = vpop.f32.mrb[6].mxu1 }
 0x173   : > { %v1518_v32 = vmax.f32 %v1510_v9, %v1514_v24  ;;  %v1516_v33 = vmax.f32 %v1454_v30, %v1501_v31  ;;  %v1456_v34 = vpop.f32.mrb[7].mxu0  ;;  %v1503_v35 = vpop.f32.mrb[7].mxu1 }
 0x174   : > { %v1519_v36 = vmax.f32 %v1511_v13, %v1515_v28  ;;  %v1517_v37 = vmax.f32 %v1456_v34, %v1503_v35 }
 0x175   : > { %v1534_v38 = vadd.f32 %v1527_v25, %v1518_v32  ;;  %v1520_v39 = vmax.f32 %v1512_v16, %v1516_v33 }
 0x176   : > { %v1535_v40 = vadd.f32 %v1531_v29, %v1519_v36  ;;  %v1521_v41 = vmax.f32 %v1513_v18, %v1517_v37 }
 0x177   : > { %1538 = vst [vmem:[%s274_s12] sm:$0xff] %v1534_v38  ;;  %v1536_v42 = vadd.f32 %v1527_v25, %v1520_v39 }
 0x178   : > { %1540 = vst.msk [vmem:[%s274_s12 + $0x8] sm:$0xff] %vm1539_vm2, %v1535_v40  ;;  %v1537_v43 = vadd.f32 %v1531_v29, %v1521_v41 }
 0x179   : > { %1541 = vst [vmem:[%s274_s12 + $0x10] sm:$0xf] %v1536_v42 }
 0x17a   : > { %1543 = vst.msk [vmem:[%s274_s12 + $0x18] sm:$0xf] %vm1542_vm3, %v1537_v43 }
 0x17b PF: > { %s17_s18 = sadd.s32 1, %s1959_s18  }
 0x17c   : > { %p14_p5 = scmp.ge.s32.totalorder %s17_s18, 6  }
 0x17e   :  { %16 = sbr.rel (!%p14_p5) target bundleno = 2 (0x2), region = 90 }
 0x185   :  { %1565 = vsyncpa [#allocation3], 1 }
 0x186   :  { %1567 = vsyncpa [#allocation3 + $0x1], 1 }
 0x187   :  { %1568 = vsyncpa [#allocation5], 1 }

// kernel: siamese_forward.5
= control target key start
LH: loop header
LB: loop body
LE: loop exit
PB: predicated region body
PF: predicated region fallthrough
CT: control target
= control target key end

     0   :  { %vm1263_vm0 = vcmask 261120   ;;  %vm1810_vm1 = vcmask 11264   ;;  %s3341_s1 = inlined_call_operand.vmem [shape: bf16[800,512], index: 1, kind: input, shape index: {}]   ;;  %s3342_s0 = inlined_call_operand.vmem [shape: f32[4,800], index: 0, kind: input, shape index: {}]   ;;  %s3343_s3 = inlined_call_operand.vmem [shape: f32[512,2], index: 3, kind: input, shape index: {}]   ;;  %s3344_s2 = inlined_call_operand.vmem [shape: f32[1,512], index: 2, kind: input, shape index: {}]   ;;  %s3345_s4 = inlined_call_operand.vmem [shape: f32[1,2], index: 4, kind: input, shape index: {}]   ;;  %s3346_s5 = inlined_call_operand.vmem [shape: f32[4,2], index: 5, kind: output, shape index: {}]  }
   0x1   :  { %v2182_v0 = vld [vmem:[%s3341_s1 + $0x4] ss:$16 sps:$4 sm:$0xff]   ;;  %v2184_v1 = vld [vmem:[%s3341_s1 + $0xc] ss:$16 sps:$4 sm:$0xff]   ;;  %v2186_v2 = vld [vmem:[%s3341_s1] ss:$16 sps:$4 sm:$0xff]  }
   0x2   :  { %1267 = vmatprep.subr.bf16.mxu0 %v2182_v0  ;;  %v2187_v3 = vld [vmem:[%s3341_s1 + $0x8] ss:$16 sps:$4 sm:$0xff]   ;;  %1431 = vmatprep.subr.bf16.mxu1 %v2184_v1  ;;  %v2188_v4 = vld [vmem:[%s3341_s1 + $0x24] ss:$16 sps:$4 sm:$0xff]   ;;  %v2190_v5 = vld [vmem:[%s3341_s1 + $0x2c] ss:$16 sps:$4 sm:$0xff]  }
   0x3   :  { %1268 = vmatpush1.bf16.msra.mxu0 %v2186_v2  ;;  %1432 = vmatpush1.bf16.msra.mxu1 %v2187_v3  ;;  %v2192_v6 = vld [vmem:[%s3341_s1 + $0x20] ss:$16 sps:$4 sm:$0xff]   ;;  %v2193_v7 = vld [vmem:[%s3341_s1 + $0x28] ss:$16 sps:$4 sm:$0xff]   ;;  %v2194_v8 = vld [vmem:[%s3341_s1 + $0x44] ss:$16 sps:$4 sm:$0xff]  }
   0x4   :  { %1269 = vmatprep.subr.bf16.mxu0 %v2188_v4  ;;  %1433 = vmatprep.subr.bf16.mxu1 %v2190_v5  ;;  %v2196_v9 = vld [vmem:[%s3341_s1 + $0x4c] ss:$16 sps:$4 sm:$0xff]   ;;  %v2198_v10 = vld [vmem:[%s3341_s1 + $0x40] ss:$16 sps:$4 sm:$0xff]   ;;  %v2199_v11 = vld [vmem:[%s3341_s1 + $0x48] ss:$16 sps:$4 sm:$0xff]  }
   0x5   :  { %v2200_v12 = vld [vmem:[%s3341_s1 + $0x64] ss:$16 sps:$4 sm:$0xff]   ;;  %v2202_v13 = vld [vmem:[%s3341_s1 + $0x6c] ss:$16 sps:$4 sm:$0xff]   ;;  %v2204_v14 = vld [vmem:[%s3341_s1 + $0x60] ss:$16 sps:$4 sm:$0xff]  }
   0x6   :  { %v2205_v15 = vld [vmem:[%s3341_s1 + $0x68] ss:$16 sps:$4 sm:$0xff]   ;;  %v2206_v16 = vld [vmem:[%s3341_s1 + $0x84] ss:$16 sps:$4 sm:$0xff]   ;;  %v2208_v17 = vld [vmem:[%s3341_s1 + $0x8c] ss:$16 sps:$4 sm:$0xff]  }
   0x7   :  { %1270 = vmatpush1.bf16.msra.mxu0 %v2192_v6  ;;  %1434 = vmatpush1.bf16.msra.mxu1 %v2193_v7  ;;  %v2210_v18 = vld [vmem:[%s3341_s1 + $0x80] ss:$16 sps:$4 sm:$0xff]   ;;  %v2211_v19 = vld [vmem:[%s3341_s1 + $0x88] ss:$16 sps:$4 sm:$0xff]   ;;  %v2212_v20 = vld [vmem:[%s3341_s1 + $0xa4] ss:$16 sps:$4 sm:$0xff]  }
   0x8   :  { %1271 = vmatprep.subr.bf16.mxu0 %v2194_v8  ;;  %1435 = vmatprep.subr.bf16.mxu1 %v2196_v9  ;;  %v2214_v21 = vld [vmem:[%s3341_s1 + $0xac] ss:$16 sps:$4 sm:$0xff]   ;;  %v2216_v22 = vld [vmem:[%s3341_s1 + $0xa0] ss:$16 sps:$4 sm:$0xff]   ;;  %v2217_v23 = vld [vmem:[%s3341_s1 + $0xa8] ss:$16 sps:$4 sm:$0xff]  }
   0x9   :  { %v2218_v24 = vld [vmem:[%s3341_s1 + $0xc4] ss:$16 sps:$4 sm:$0xff]   ;;  %v2220_v25 = vld [vmem:[%s3341_s1 + $0xcc] ss:$16 sps:$4 sm:$0xff]   ;;  %v2222_v26 = vld [vmem:[%s3341_s1 + $0xc0] ss:$16 sps:$4 sm:$0xff]  }
   0xa   :  { %v2223_v27 = vld [vmem:[%s3341_s1 + $0xc8] ss:$16 sps:$4 sm:$0xff]   ;;  %v2224_v28 = vld [vmem:[%s3341_s1 + $0xe4] ss:$16 sps:$4 sm:$0xff]   ;;  %v2226_v29 = vld [vmem:[%s3341_s1 + $0xec] ss:$16 sps:$4 sm:$0xff]  }
   0xb   :  { %1272 = vmatpush1.bf16.msra.mxu0 %v2198_v10  ;;  %1436 = vmatpush1.bf16.msra.mxu1 %v2199_v11  ;;  %v2228_v30 = vld [vmem:[%s3341_s1 + $0xe0] ss:$16 sps:$4 sm:$0xff]   ;;  %v2229_v31 = vld [vmem:[%s3341_s1 + $0xe8] ss:$16 sps:$4 sm:$0xff]   ;;  %v2230_v32 = vld [vmem:[%s3341_s1 + $0x104] ss:$16 sps:$4 sm:$0xff]  }
   0xc   :  { %1273 = vmatprep.subr.bf16.mxu0 %v2200_v12  ;;  %1437 = vmatprep.subr.bf16.mxu1 %v2202_v13  ;;  %v2232_v33 = vld [vmem:[%s3341_s1 + $0x10c] ss:$16 sps:$4 sm:$0xff]   ;;  %v2234_v34 = vld [vmem:[%s3341_s1 + $0x100] ss:$16 sps:$4 sm:$0xff]   ;;  %v2235_v35 = vld [vmem:[%s3341_s1 + $0x108] ss:$16 sps:$4 sm:$0xff]  }
   0xd   :  { %v2236_v36 = vld [vmem:[%s3341_s1 + $0x124] ss:$16 sps:$4 sm:$0xff]   ;;  %v2238_v37 = vld [vmem:[%s3341_s1 + $0x12c] ss:$16 sps:$4 sm:$0xff]   ;;  %v2240_v38 = vld [vmem:[%s3341_s1 + $0x120] ss:$16 sps:$4 sm:$0xff]  }
   0xe   :  { %v2241_v39 = vld [vmem:[%s3341_s1 + $0x128] ss:$16 sps:$4 sm:$0xff]   ;;  %v2242_v40 = vld [vmem:[%s3341_s1 + $0x144] ss:$16 sps:$4 sm:$0xff]   ;;  %v2244_v41 = vld [vmem:[%s3341_s1 + $0x14c] ss:$16 sps:$4 sm:$0xff]  }
   0xf   :  { %1274 = vmatpush1.bf16.msra.mxu0 %v2204_v14  ;;  %1438 = vmatpush1.bf16.msra.mxu1 %v2205_v15  ;;  %v2246_v42 = vld [vmem:[%s3341_s1 + $0x140] ss:$16 sps:$4 sm:$0xff]   ;;  %v2247_v43 = vld [vmem:[%s3341_s1 + $0x148] ss:$16 sps:$4 sm:$0xff]   ;;  %v2248_v44 = vld [vmem:[%s3341_s1 + $0x164] ss:$16 sps:$4 sm:$0xff]  }
  0x10   :  { %1275 = vmatprep.subr.bf16.mxu0 %v2206_v16  ;;  %1439 = vmatprep.subr.bf16.mxu1 %v2208_v17  ;;  %v2250_v45 = vld [vmem:[%s3341_s1 + $0x16c] ss:$16 sps:$4 sm:$0xff]   ;;  %v21_v46 = vld [vmem:[%s3342_s0] sm:$0xff]  ;;  %v2253_v49 = vld [vmem:[%s3341_s1 + $0x168] ss:$16 sps:$4 sm:$0xff]  }
  0x11   :  { %v28_v47 = vcombine.high %v21_v46, %v21_v46  ;;  %v2252_v48 = vld [vmem:[%s3341_s1 + $0x160] ss:$16 sps:$4 sm:$0xff]   ;;  %v2254_v50 = vld [vmem:[%s3341_s1 + $0x184] ss:$16 sps:$4 sm:$0xff]   ;;  %v2256_v51 = vld [vmem:[%s3341_s1 + $0x18c] ss:$16 sps:$4 sm:$0xff]   ;;  %v34_v5 = vpack.c.bf16 %v21_v46, %v21_v46 }
  0x12   :  { %v2258_v53 = vld [vmem:[%s3341_s1 + $0x180] ss:$16 sps:$4 sm:$0xff]   ;;  %v2259_v54 = vld [vmem:[%s3341_s1 + $0x188] ss:$16 sps:$4 sm:$0xff]   ;;  %v2260_v55 = vld [vmem:[%s3341_s1 + $0x1a4] ss:$16 sps:$4 sm:$0xff]  }
  0x13   :  { %1276 = vmatpush1.bf16.msra.mxu0 %v2210_v18  ;;  %1440 = vmatpush1.bf16.msra.mxu1 %v2211_v19  ;;  %v35_v52 = vpack.c.bf16 %v28_v47, %v28_v47  ;;  %v2262_v56 = vld [vmem:[%s3341_s1 + $0x1ac] ss:$16 sps:$4 sm:$0xff]   ;;  %v2264_v57 = vld [vmem:[%s3341_s1 + $0x1a0] ss:$16 sps:$4 sm:$0xff]   ;;  %v2265_v58 = vld [vmem:[%s3341_s1 + $0x1a8] ss:$16 sps:$4 sm:$0xff]  }
  0x14   :  { %1277 = vmatprep.subr.bf16.mxu0 %v2212_v20  ;;  %1441 = vmatprep.subr.bf16.mxu1 %v2214_v21  ;;  %v2266_v59 = vld [vmem:[%s3341_s1 + $0x1c4] ss:$16 sps:$4 sm:$0xff]   ;;  %v2268_v60 = vld [vmem:[%s3341_s1 + $0x1cc] ss:$16 sps:$4 sm:$0xff]   ;;  %v2270_v61 = vld [vmem:[%s3341_s1 + $0x1c0] ss:$16 sps:$4 sm:$0xff]  }
  0x15   :  { %1299 = vmatprep.mubr.bf16.mxu0 %v35_v52  ;;  %1463 = vmatprep.mubr.bf16.mxu1 %v35_v52  ;;  %v2271_v62 = vld [vmem:[%s3341_s1 + $0x1c8] ss:$16 sps:$4 sm:$0xff]   ;;  %v2272_v63 = vld [vmem:[%s3341_s1 + $0x1e4] ss:$16 sps:$4 sm:$0xff]   ;;  %v2274_v0 = vld [vmem:[%s3341_s1 + $0x1ec] ss:$16 sps:$4 sm:$0xff]  }
  0x16   :  { %v2276_v1 = vld [vmem:[%s3341_s1 + $0x1e0] ss:$16 sps:$4 sm:$0xff]   ;;  %v2277_v2 = vld [vmem:[%s3341_s1 + $0x1e8] ss:$16 sps:$4 sm:$0xff]   ;;  %v2281_v3 = vld [vmem:[%s3341_s1 + $0x204] ss:$16 sps:$4 sm:$0xff]  }
  0x17   :  { %1278 = vmatpush1.bf16.msra.mxu0 %v2216_v22  ;;  %1442 = vmatpush1.bf16.msra.mxu1 %v2217_v23  ;;  %v2284_v4 = vld [vmem:[%s3341_s1 + $0x20c] ss:$16 sps:$4 sm:$0xff]   ;;  %v2279_v6 = vld [vmem:[%s3341_s1 + $0x200] ss:$16 sps:$4 sm:$0xff]   ;;  %v2282_v7 = vld [vmem:[%s3341_s1 + $0x208] ss:$16 sps:$4 sm:$0xff]  }
  0x18   :  { %1279 = vmatprep.subr.bf16.mxu0 %v2218_v24  ;;  %1443 = vmatprep.subr.bf16.mxu1 %v2220_v25  ;;  %v2287_v8 = vld [vmem:[%s3341_s1 + $0x224] ss:$16 sps:$4 sm:$0xff]   ;;  %v2290_v9 = vld [vmem:[%s3341_s1 + $0x22c] ss:$16 sps:$4 sm:$0xff]   ;;  %v2285_v10 = vld [vmem:[%s3341_s1 + $0x220] ss:$16 sps:$4 sm:$0xff]  }
  0x19   :  { %v2288_v11 = vld [vmem:[%s3341_s1 + $0x228] ss:$16 sps:$4 sm:$0xff]   ;;  %v2293_v12 = vld [vmem:[%s3341_s1 + $0x244] ss:$16 sps:$4 sm:$0xff]   ;;  %v2296_v13 = vld [vmem:[%s3341_s1 + $0x24c] ss:$16 sps:$4 sm:$0xff]  }
  0x1a   :  { %v2291_v14 = vld [vmem:[%s3341_s1 + $0x240] ss:$16 sps:$4 sm:$0xff]   ;;  %v2294_v15 = vld [vmem:[%s3341_s1 + $0x248] ss:$16 sps:$4 sm:$0xff]   ;;  %v2299_v16 = vld [vmem:[%s3341_s1 + $0x264] ss:$16 sps:$4 sm:$0xff]  }
  0x1b   :  { %1280 = vmatpush1.bf16.msra.mxu0 %v2222_v26  ;;  %1444 = vmatpush1.bf16.msra.mxu1 %v2223_v27  ;;  %v2302_v17 = vld [vmem:[%s3341_s1 + $0x26c] ss:$16 sps:$4 sm:$0xff]   ;;  %v2297_v18 = vld [vmem:[%s3341_s1 + $0x260] ss:$16 sps:$4 sm:$0xff]   ;;  %v2300_v19 = vld [vmem:[%s3341_s1 + $0x268] ss:$16 sps:$4 sm:$0xff]  }
  0x1c   :  { %1281 = vmatprep.subr.bf16.mxu0 %v2224_v28  ;;  %1445 = vmatprep.subr.bf16.mxu1 %v2226_v29  ;;  %v2305_v20 = vld [vmem:[%s3341_s1 + $0x284] ss:$16 sps:$4 sm:$0xff]   ;;  %v2308_v21 = vld [vmem:[%s3341_s1 + $0x28c] ss:$16 sps:$4 sm:$0xff]   ;;  %v2303_v22 = vld [vmem:[%s3341_s1 + $0x280] ss:$16 sps:$4 sm:$0xff]  }
  0x1d   :  { %v2306_v23 = vld [vmem:[%s3341_s1 + $0x288] ss:$16 sps:$4 sm:$0xff]   ;;  %v2311_v24 = vld [vmem:[%s3341_s1 + $0x2a4] ss:$16 sps:$4 sm:$0xff]   ;;  %v2314_v25 = vld [vmem:[%s3341_s1 + $0x2ac] ss:$16 sps:$4 sm:$0xff]  }
  0x1e   :  { %v2309_v26 = vld [vmem:[%s3341_s1 + $0x2a0] ss:$16 sps:$4 sm:$0xff]   ;;  %v2312_v27 = vld [vmem:[%s3341_s1 + $0x2a8] ss:$16 sps:$4 sm:$0xff]   ;;  %v2317_v28 = vld [vmem:[%s3341_s1 + $0x2c4] ss:$16 sps:$4 sm:$0xff]  }
  0x1f   :  { %1282 = vmatpush1.bf16.msra.mxu0 %v2228_v30  ;;  %1446 = vmatpush1.bf16.msra.mxu1 %v2229_v31  ;;  %v2320_v29 = vld [vmem:[%s3341_s1 + $0x2cc] ss:$16 sps:$4 sm:$0xff]   ;;  %v2315_v31 = vld [vmem:[%s3341_s1 + $0x2c0] ss:$16 sps:$4 sm:$0xff]   ;;  %v2336_v46 = vld [vmem:[%s3341_s1 + $0x328] ss:$16 sps:$4 sm:$0xff]  }
  0x20   :  { %1283 = vmatprep.subr.bf16.mxu0 %v2230_v32  ;;  %1447 = vmatprep.subr.bf16.mxu1 %v2232_v33  ;;  %v2792_v30 = vld [vmem:[%s3342_s0 + $0x8] sm:$0xff]  ;;  %v2341_v47 = vld [vmem:[%s3341_s1 + $0x344] ss:$16 sps:$4 sm:$0xff]  }
  0x21   :  { %v29_v32 = vcombine.high %v2792_v30, %v2792_v30  ;;  %v2318_v33 = vld [vmem:[%s3341_s1 + $0x2c8] ss:$16 sps:$4 sm:$0xff]   ;;  %v2350_v52 = vld [vmem:[%s3341_s1 + $0x36c] ss:$16 sps:$4 sm:$0xff]  }
  0x23   :  { %1284 = vmatpush1.bf16.msra.mxu0 %v2234_v34  ;;  %1448 = vmatpush1.bf16.msra.mxu1 %v2235_v35  ;;  %v2323_v34 = vld [vmem:[%s3341_s1 + $0x2e4] ss:$16 sps:$4 sm:$0xff]   ;;  %v2326_v35 = vld [vmem:[%s3341_s1 + $0x2ec] ss:$16 sps:$4 sm:$0xff]  }
  0x24   :  { %1285 = vmatprep.subr.bf16.mxu0 %v2236_v36  ;;  %1449 = vmatprep.subr.bf16.mxu1 %v2238_v37  ;;  %v37_v36 = vpack.c.bf16 %v29_v32, %v29_v32  ;;  %v2321_v37 = vld [vmem:[%s3341_s1 + $0x2e0] ss:$16 sps:$4 sm:$0xff]   ;;  %v2411_v32 = vld [vmem:[%s3341_s1 + $0x4ac] ss:$16 sps:$4 sm:$0xff]  }
  0x27   :  { %1286 = vmatpush1.bf16.msra.mxu0 %v2240_v38  ;;  %1450 = vmatpush1.bf16.msra.mxu1 %v2241_v39  ;;  %v2324_v38 = vld [vmem:[%s3341_s1 + $0x2e8] ss:$16 sps:$4 sm:$0xff]   ;;  %v2329_v39 = vld [vmem:[%s3341_s1 + $0x304] ss:$16 sps:$4 sm:$0xff]  }
  0x28   :  { %1287 = vmatprep.subr.bf16.mxu0 %v2242_v40  ;;  %1451 = vmatprep.subr.bf16.mxu1 %v2244_v41  ;;  %v2332_v40 = vld [vmem:[%s3341_s1 + $0x30c] ss:$16 sps:$4 sm:$0xff]   ;;  %v2327_v41 = vld [vmem:[%s3341_s1 + $0x300] ss:$16 sps:$4 sm:$0xff]  }
  0x2b   :  { %1288 = vmatpush1.bf16.msra.mxu0 %v2246_v42  ;;  %1452 = vmatpush1.bf16.msra.mxu1 %v2247_v43  ;;  %v2330_v42 = vld [vmem:[%s3341_s1 + $0x308] ss:$16 sps:$4 sm:$0xff]   ;;  %v2335_v43 = vld [vmem:[%s3341_s1 + $0x324] ss:$16 sps:$4 sm:$0xff]  }
  0x2c   :  { %1289 = vmatprep.subr.bf16.mxu0 %v2248_v44  ;;  %1453 = vmatprep.subr.bf16.mxu1 %v2250_v45  ;;  %v2338_v44 = vld [vmem:[%s3341_s1 + $0x32c] ss:$16 sps:$4 sm:$0xff]   ;;  %v2333_v45 = vld [vmem:[%s3341_s1 + $0x320] ss:$16 sps:$4 sm:$0xff]  }
  0x2f   :  { %1290 = vmatpush1.bf16.msra.mxu0 %v2252_v48  ;;  %1454 = vmatpush1.bf16.msra.mxu1 %v2253_v49  ;;  %v2344_v48 = vld [vmem:[%s3341_s1 + $0x34c] ss:$16 sps:$4 sm:$0xff]   ;;  %v2339_v49 = vld [vmem:[%s3341_s1 + $0x340] ss:$16 sps:$4 sm:$0xff]  }
  0x30   :  { %1291 = vmatprep.subr.bf16.mxu0 %v2254_v50  ;;  %1455 = vmatprep.subr.bf16.mxu1 %v2256_v51  ;;  %v2342_v50 = vld [vmem:[%s3341_s1 + $0x348] ss:$16 sps:$4 sm:$0xff]   ;;  %v2347_v51 = vld [vmem:[%s3341_s1 + $0x364] ss:$16 sps:$4 sm:$0xff]  }
  0x33   :  { %1292 = vmatpush1.bf16.msra.mxu0 %v2258_v53  ;;  %1456 = vmatpush1.bf16.msra.mxu1 %v2259_v54  ;;  %v2345_v53 = vld [vmem:[%s3341_s1 + $0x360] ss:$16 sps:$4 sm:$0xff]   ;;  %v2348_v54 = vld [vmem:[%s3341_s1 + $0x368] ss:$16 sps:$4 sm:$0xff]  }
  0x34   :  { %1293 = vmatprep.subr.bf16.mxu0 %v2260_v55  ;;  %1457 = vmatprep.subr.bf16.mxu1 %v2262_v56  ;;  %v2353_v55 = vld [vmem:[%s3341_s1 + $0x384] ss:$16 sps:$4 sm:$0xff]   ;;  %v2356_v56 = vld [vmem:[%s3341_s1 + $0x38c] ss:$16 sps:$4 sm:$0xff]  }
  0x37   :  { %1294 = vmatpush1.bf16.msra.mxu0 %v2264_v57  ;;  %1458 = vmatpush1.bf16.msra.mxu1 %v2265_v58  ;;  %v2351_v57 = vld [vmem:[%s3341_s1 + $0x380] ss:$16 sps:$4 sm:$0xff]   ;;  %v2354_v58 = vld [vmem:[%s3341_s1 + $0x388] ss:$16 sps:$4 sm:$0xff]  }
  0x38   :  { %1295 = vmatprep.subr.bf16.mxu0 %v2266_v59  ;;  %1459 = vmatprep.subr.bf16.mxu1 %v2268_v60  ;;  %v2359_v59 = vld [vmem:[%s3341_s1 + $0x3a4] ss:$16 sps:$4 sm:$0xff]   ;;  %v2362_v60 = vld [vmem:[%s3341_s1 + $0x3ac] ss:$16 sps:$4 sm:$0xff]  }
  0x3b   :  { %1296 = vmatpush1.bf16.msra.mxu0 %v2270_v61  ;;  %1460 = vmatpush1.bf16.msra.mxu1 %v2271_v62  ;;  %v2357_v61 = vld [vmem:[%s3341_s1 + $0x3a0] ss:$16 sps:$4 sm:$0xff]   ;;  %v2360_v62 = vld [vmem:[%s3341_s1 + $0x3a8] ss:$16 sps:$4 sm:$0xff]  }
  0x3c   :  { %1297 = vmatprep.subr.bf16.mxu0 %v2272_v63  ;;  %1461 = vmatprep.subr.bf16.mxu1 %v2274_v0  ;;  %v2365_v63 = vld [vmem:[%s3341_s1 + $0x3c4] ss:$16 sps:$4 sm:$0xff]   ;;  %v2368_v0 = vld [vmem:[%s3341_s1 + $0x3cc] ss:$16 sps:$4 sm:$0xff]  }
  0x3f   :  { %1298 = vmatpush1.bf16.msra.mxu0 %v2276_v1  ;;  %1462 = vmatpush1.bf16.msra.mxu1 %v2277_v2  ;;  %v2363_v1 = vld [vmem:[%s3341_s1 + $0x3c0] ss:$16 sps:$4 sm:$0xff]   ;;  %v2366_v2 = vld [vmem:[%s3341_s1 + $0x3c8] ss:$16 sps:$4 sm:$0xff]  }
  0x40   :  { %1308 = vmatprep.subr.bf16.mxu0 %v2281_v3  ;;  %1472 = vmatprep.subr.bf16.mxu1 %v2284_v4  ;;  %v2371_v3 = vld [vmem:[%s3341_s1 + $0x3e4] ss:$16 sps:$4 sm:$0xff]   ;;  %v2374_v4 = vld [vmem:[%s3341_s1 + $0x3ec] ss:$16 sps:$4 sm:$0xff]  }
  0x42   :  { %1300 = vmatmul.mubr.bf16.vlgmr.msra.gmra.mrb[0].mxu0 %v34_v5  ;;  %1464 = vmatmul.mubr.bf16.vlgmr.msra.gmra.mrb[0].mxu1 %v34_v5  ;;  %v2369_v5 = vld [vmem:[%s3341_s1 + $0x3e0] ss:$16 sps:$4 sm:$0xff]  }
  0x43   :  { %1309 = vmatpush1.bf16.msra.mxu0 %v2279_v6  ;;  %1473 = vmatpush1.bf16.msra.mxu1 %v2282_v7  ;;  %v2372_v6 = vld [vmem:[%s3341_s1 + $0x3e8] ss:$16 sps:$4 sm:$0xff]   ;;  %v2378_v7 = vld [vmem:[%s3341_s1 + $0x404] ss:$16 sps:$4 sm:$0xff]  }
  0x44   :  { %1310 = vmatprep.subr.bf16.mxu0 %v2287_v8  ;;  %1474 = vmatprep.subr.bf16.mxu1 %v2290_v9  ;;  %v2381_v8 = vld [vmem:[%s3341_s1 + $0x40c] ss:$16 sps:$4 sm:$0xff]   ;;  %v36_v9 = vpack.c.bf16 %v2792_v30, %v2792_v30  ;;  %v2403_v30 = vld [vmem:[%s3341_s1 + $0x488] ss:$16 sps:$4 sm:$0xff]  }
  0x45   :  { %1340 = vmatprep.mubr.bf16.mxu0 %v37_v36  ;;  %1504 = vmatprep.mubr.bf16.mxu1 %v37_v36  ;;  %v2417_v36 = vld [vmem:[%s3341_s1 + $0x4cc] ss:$16 sps:$4 sm:$0xff]  }
  0x47   :  { %1311 = vmatpush1.bf16.msra.mxu0 %v2285_v10  ;;  %1475 = vmatpush1.bf16.msra.mxu1 %v2288_v11  ;;  %v2376_v10 = vld [vmem:[%s3341_s1 + $0x400] ss:$16 sps:$4 sm:$0xff]   ;;  %v2379_v11 = vld [vmem:[%s3341_s1 + $0x408] ss:$16 sps:$4 sm:$0xff]  }
  0x48   :  { %1312 = vmatprep.subr.bf16.mxu0 %v2293_v12  ;;  %1476 = vmatprep.subr.bf16.mxu1 %v2296_v13  ;;  %v2384_v12 = vld [vmem:[%s3341_s1 + $0x424] ss:$16 sps:$4 sm:$0xff]   ;;  %v2387_v13 = vld [vmem:[%s3341_s1 + $0x42c] ss:$16 sps:$4 sm:$0xff]  }
  0x4b   :  { %1313 = vmatpush1.bf16.msra.mxu0 %v2291_v14  ;;  %1477 = vmatpush1.bf16.msra.mxu1 %v2294_v15  ;;  %v2933_v14 = vld [vmem:[%s3342_s0 + $0x10] sm:$0xff] }
  0x4c   :  { %1314 = vmatprep.subr.bf16.mxu0 %v2299_v16  ;;  %1478 = vmatprep.subr.bf16.mxu1 %v2302_v17  ;;  %v30_v15 = vcombine.high %v2933_v14, %v2933_v14  ;;  %v2382_v16 = vld [vmem:[%s3341_s1 + $0x420] ss:$16 sps:$4 sm:$0xff]   ;;  %v2385_v17 = vld [vmem:[%s3341_s1 + $0x428] ss:$16 sps:$4 sm:$0xff]  }
  0x4f   :  { %1315 = vmatpush1.bf16.msra.mxu0 %v2297_v18  ;;  %1479 = vmatpush1.bf16.msra.mxu1 %v2300_v19  ;;  %v2390_v18 = vld [vmem:[%s3341_s1 + $0x444] ss:$16 sps:$4 sm:$0xff]   ;;  %v39_v19 = vpack.c.bf16 %v30_v15, %v30_v15  ;;  %v2473_v15 = vld [vmem:[%s3341_s1 + $0x600] ss:$16 sps:$4 sm:$0xff]  }
  0x50   :  { %1316 = vmatprep.subr.bf16.mxu0 %v2305_v20  ;;  %1480 = vmatprep.subr.bf16.mxu1 %v2308_v21  ;;  %v2393_v20 = vld [vmem:[%s3341_s1 + $0x44c] ss:$16 sps:$4 sm:$0xff]   ;;  %v2388_v21 = vld [vmem:[%s3341_s1 + $0x440] ss:$16 sps:$4 sm:$0xff]  }
  0x53   :  { %1317 = vmatpush1.bf16.msra.mxu0 %v2303_v22  ;;  %1481 = vmatpush1.bf16.msra.mxu1 %v2306_v23  ;;  %v2391_v22 = vld [vmem:[%s3341_s1 + $0x448] ss:$16 sps:$4 sm:$0xff]   ;;  %v2396_v23 = vld [vmem:[%s3341_s1 + $0x464] ss:$16 sps:$4 sm:$0xff]  }
  0x54   :  { %1318 = vmatprep.subr.bf16.mxu0 %v2311_v24  ;;  %1482 = vmatprep.subr.bf16.mxu1 %v2314_v25  ;;  %v2399_v24 = vld [vmem:[%s3341_s1 + $0x46c] ss:$16 sps:$4 sm:$0xff]   ;;  %v2394_v25 = vld [vmem:[%s3341_s1 + $0x460] ss:$16 sps:$4 sm:$0xff]  }
  0x57   :  { %1319 = vmatpush1.bf16.msra.mxu0 %v2309_v26  ;;  %1483 = vmatpush1.bf16.msra.mxu1 %v2312_v27  ;;  %v2397_v26 = vld [vmem:[%s3341_s1 + $0x468] ss:$16 sps:$4 sm:$0xff]   ;;  %v2402_v27 = vld [vmem:[%s3341_s1 + $0x484] ss:$16 sps:$4 sm:$0xff]  }
  0x58   :  { %1320 = vmatprep.subr.bf16.mxu0 %v2317_v28  ;;  %1484 = vmatprep.subr.bf16.mxu1 %v2320_v29  ;;  %v2405_v28 = vld [vmem:[%s3341_s1 + $0x48c] ss:$16 sps:$4 sm:$0xff]   ;;  %v2400_v29 = vld [vmem:[%s3341_s1 + $0x480] ss:$16 sps:$4 sm:$0xff]  }
  0x5b   :  { %1321 = vmatpush1.bf16.msra.mxu0 %v2315_v31  ;;  %1485 = vmatpush1.bf16.msra.mxu1 %v2318_v33  ;;  %v2408_v31 = vld [vmem:[%s3341_s1 + $0x4a4] ss:$16 sps:$4 sm:$0xff]   ;;  %v2406_v33 = vld [vmem:[%s3341_s1 + $0x4a0] ss:$16 sps:$4 sm:$0xff]  }
  0x5c   :  { %1322 = vmatprep.subr.bf16.mxu0 %v2323_v34  ;;  %1486 = vmatprep.subr.bf16.mxu1 %v2326_v35  ;;  %v2409_v34 = vld [vmem:[%s3341_s1 + $0x4a8] ss:$16 sps:$4 sm:$0xff]   ;;  %v2414_v35 = vld [vmem:[%s3341_s1 + $0x4c4] ss:$16 sps:$4 sm:$0xff]  }
  0x5f   :  { %1323 = vmatpush1.bf16.msra.mxu0 %v2321_v37  ;;  %1487 = vmatpush1.bf16.msra.mxu1 %v2324_v38  ;;  %v2412_v37 = vld [vmem:[%s3341_s1 + $0x4c0] ss:$16 sps:$4 sm:$0xff]   ;;  %v2415_v38 = vld [vmem:[%s3341_s1 + $0x4c8] ss:$16 sps:$4 sm:$0xff]  }
  0x60   :  { %1324 = vmatprep.subr.bf16.mxu0 %v2329_v39  ;;  %1488 = vmatprep.subr.bf16.mxu1 %v2332_v40  ;;  %v2420_v39 = vld [vmem:[%s3341_s1 + $0x4e4] ss:$16 sps:$4 sm:$0xff]   ;;  %v2423_v40 = vld [vmem:[%s3341_s1 + $0x4ec] ss:$16 sps:$4 sm:$0xff]  }
  0x63   :  { %1325 = vmatpush1.bf16.msra.mxu0 %v2327_v41  ;;  %1489 = vmatpush1.bf16.msra.mxu1 %v2330_v42  ;;  %v2418_v41 = vld [vmem:[%s3341_s1 + $0x4e0] ss:$16 sps:$4 sm:$0xff]   ;;  %v2421_v42 = vld [vmem:[%s3341_s1 + $0x4e8] ss:$16 sps:$4 sm:$0xff]  }
  0x64   :  { %1326 = vmatprep.subr.bf16.mxu0 %v2335_v43  ;;  %1490 = vmatprep.subr.bf16.mxu1 %v2338_v44  ;;  %v2426_v43 = vld [vmem:[%s3341_s1 + $0x504] ss:$16 sps:$4 sm:$0xff]   ;;  %v2429_v44 = vld [vmem:[%s3341_s1 + $0x50c] ss:$16 sps:$4 sm:$0xff]  }
  0x67   :  { %1327 = vmatpush1.bf16.msra.mxu0 %v2333_v45  ;;  %1491 = vmatpush1.bf16.msra.mxu1 %v2336_v46  ;;  %v2424_v45 = vld [vmem:[%s3341_s1 + $0x500] ss:$16 sps:$4 sm:$0xff]   ;;  %v2427_v46 = vld [vmem:[%s3341_s1 + $0x508] ss:$16 sps:$4 sm:$0xff]  }
  0x68   :  { %1328 = vmatprep.subr.bf16.mxu0 %v2341_v47  ;;  %1492 = vmatprep.subr.bf16.mxu1 %v2344_v48  ;;  %v2432_v47 = vld [vmem:[%s3341_s1 + $0x524] ss:$16 sps:$4 sm:$0xff]   ;;  %v2435_v48 = vld [vmem:[%s3341_s1 + $0x52c] ss:$16 sps:$4 sm:$0xff]  }
  0x6b   :  { %1329 = vmatpush1.bf16.msra.mxu0 %v2339_v49  ;;  %1493 = vmatpush1.bf16.msra.mxu1 %v2342_v50  ;;  %v2430_v49 = vld [vmem:[%s3341_s1 + $0x520] ss:$16 sps:$4 sm:$0xff]   ;;  %v2433_v50 = vld [vmem:[%s3341_s1 + $0x528] ss:$16 sps:$4 sm:$0xff]  }
  0x6c   :  { %1330 = vmatprep.subr.bf16.mxu0 %v2347_v51  ;;  %1494 = vmatprep.subr.bf16.mxu1 %v2350_v52  ;;  %v2438_v51 = vld [vmem:[%s3341_s1 + $0x544] ss:$16 sps:$4 sm:$0xff]   ;;  %v2441_v52 = vld [vmem:[%s3341_s1 + $0x54c] ss:$16 sps:$4 sm:$0xff]  }
  0x6f   :  { %1331 = vmatpush1.bf16.msra.mxu0 %v2345_v53  ;;  %1495 = vmatpush1.bf16.msra.mxu1 %v2348_v54  ;;  %v2436_v53 = vld [vmem:[%s3341_s1 + $0x540] ss:$16 sps:$4 sm:$0xff]   ;;  %v2439_v54 = vld [vmem:[%s3341_s1 + $0x548] ss:$16 sps:$4 sm:$0xff]  }
  0x70   :  { %1332 = vmatprep.subr.bf16.mxu0 %v2353_v55  ;;  %1496 = vmatprep.subr.bf16.mxu1 %v2356_v56  ;;  %v2444_v55 = vld [vmem:[%s3341_s1 + $0x564] ss:$16 sps:$4 sm:$0xff]   ;;  %v2447_v56 = vld [vmem:[%s3341_s1 + $0x56c] ss:$16 sps:$4 sm:$0xff]  }
  0x73   :  { %1333 = vmatpush1.bf16.msra.mxu0 %v2351_v57  ;;  %1497 = vmatpush1.bf16.msra.mxu1 %v2354_v58  ;;  %v2442_v57 = vld [vmem:[%s3341_s1 + $0x560] ss:$16 sps:$4 sm:$0xff]   ;;  %v2445_v58 = vld [vmem:[%s3341_s1 + $0x568] ss:$16 sps:$4 sm:$0xff]  }
  0x74   :  { %1334 = vmatprep.subr.bf16.mxu0 %v2359_v59  ;;  %1498 = vmatprep.subr.bf16.mxu1 %v2362_v60  ;;  %v2450_v59 = vld [vmem:[%s3341_s1 + $0x584] ss:$16 sps:$4 sm:$0xff]   ;;  %v2453_v60 = vld [vmem:[%s3341_s1 + $0x58c] ss:$16 sps:$4 sm:$0xff]  }
  0x77   :  { %1335 = vmatpush1.bf16.msra.mxu0 %v2357_v61  ;;  %1499 = vmatpush1.bf16.msra.mxu1 %v2360_v62  ;;  %v2448_v61 = vld [vmem:[%s3341_s1 + $0x580] ss:$16 sps:$4 sm:$0xff]   ;;  %v2451_v62 = vld [vmem:[%s3341_s1 + $0x588] ss:$16 sps:$4 sm:$0xff]  }
  0x78   :  { %1336 = vmatprep.subr.bf16.mxu0 %v2365_v63  ;;  %1500 = vmatprep.subr.bf16.mxu1 %v2368_v0  ;;  %v2456_v63 = vld [vmem:[%s3341_s1 + $0x5a4] ss:$16 sps:$4 sm:$0xff]   ;;  %v2459_v0 = vld [vmem:[%s3341_s1 + $0x5ac] ss:$16 sps:$4 sm:$0xff]  }
  0x7b   :  { %1337 = vmatpush1.bf16.msra.mxu0 %v2363_v1  ;;  %1501 = vmatpush1.bf16.msra.mxu1 %v2366_v2  ;;  %v2454_v1 = vld [vmem:[%s3341_s1 + $0x5a0] ss:$16 sps:$4 sm:$0xff]   ;;  %v2457_v2 = vld [vmem:[%s3341_s1 + $0x5a8] ss:$16 sps:$4 sm:$0xff]  }
  0x7c   :  { %1338 = vmatprep.subr.bf16.mxu0 %v2371_v3  ;;  %1502 = vmatprep.subr.bf16.mxu1 %v2374_v4  ;;  %v2462_v3 = vld [vmem:[%s3341_s1 + $0x5c4] ss:$16 sps:$4 sm:$0xff]   ;;  %v2465_v4 = vld [vmem:[%s3341_s1 + $0x5cc] ss:$16 sps:$4 sm:$0xff]  }
  0x7f   :  { %1339 = vmatpush1.bf16.msra.mxu0 %v2369_v5  ;;  %1503 = vmatpush1.bf16.msra.mxu1 %v2372_v6  ;;  %v2460_v5 = vld [vmem:[%s3341_s1 + $0x5c0] ss:$16 sps:$4 sm:$0xff]   ;;  %v2463_v6 = vld [vmem:[%s3341_s1 + $0x5c8] ss:$16 sps:$4 sm:$0xff]  }
  0x80   :  { %1349 = vmatprep.subr.bf16.mxu0 %v2378_v7  ;;  %1513 = vmatprep.subr.bf16.mxu1 %v2381_v8  ;;  %v2468_v7 = vld [vmem:[%s3341_s1 + $0x5e4] ss:$16 sps:$4 sm:$0xff]   ;;  %v2471_v8 = vld [vmem:[%s3341_s1 + $0x5ec] ss:$16 sps:$4 sm:$0xff]  }
  0x82   :  { %1341 = vmatmul.mubr.bf16.vlgmr.msra.gmra.mrb[0].mxu0 %v36_v9  ;;  %1505 = vmatmul.mubr.bf16.vlgmr.msra.gmra.mrb[0].mxu1 %v36_v9  ;;  %v2466_v9 = vld [vmem:[%s3341_s1 + $0x5e0] ss:$16 sps:$4 sm:$0xff]  }
  0x83   :  { %1350 = vmatpush1.bf16.msra.mxu0 %v2376_v10  ;;  %1514 = vmatpush1.bf16.msra.mxu1 %v2379_v11  ;;  %v2469_v10 = vld [vmem:[%s3341_s1 + $0x5e8] ss:$16 sps:$4 sm:$0xff]   ;;  %v2475_v11 = vld [vmem:[%s3341_s1 + $0x604] ss:$16 sps:$4 sm:$0xff]  }
  0x84   :  { %1351 = vmatprep.subr.bf16.mxu0 %v2384_v12  ;;  %1515 = vmatprep.subr.bf16.mxu1 %v2387_v13  ;;  %v2478_v12 = vld [vmem:[%s3341_s1 + $0x60c] ss:$16 sps:$4 sm:$0xff]   ;;  %v38_v13 = vpack.c.bf16 %v2933_v14, %v2933_v14 }
  0x85   :  { %1381 = vmatprep.mubr.bf16.mxu0 %v39_v19  ;;  %1545 = vmatprep.mubr.bf16.mxu1 %v39_v19  ;;  %v2484_v14 = vld [vmem:[%s3341_s1 + $0x62c] ss:$16 sps:$4 sm:$0xff]  }
  0x86   :  { %v1616_v19 = vld [vmem:[%s3343_s3 + $0x88] sm:$0xff] }
  0x87   :  { %1352 = vmatpush1.bf16.msra.mxu0 %v2382_v16  ;;  %1516 = vmatpush1.bf16.msra.mxu1 %v2385_v17  ;;  %v2476_v16 = vld [vmem:[%s3341_s1 + $0x608] ss:$16 sps:$4 sm:$0xff]   ;;  %v2481_v17 = vld [vmem:[%s3341_s1 + $0x624] ss:$16 sps:$4 sm:$0xff]  }
  0x88   :  { %1353 = vmatprep.subr.bf16.mxu0 %v2390_v18  ;;  %1517 = vmatprep.subr.bf16.mxu1 %v2393_v20  ;;  %v1615_v18 = vld [vmem:[%s3343_s3 + $0x80] sm:$0xff] }
  0x89   :  { %v1647_v20 = vld [vmem:[%s3343_s3 + $0x180] sm:$0xff] }
  0x8b   :  { %1354 = vmatpush1.bf16.msra.mxu0 %v2388_v21  ;;  %1518 = vmatpush1.bf16.msra.mxu1 %v2391_v22  ;;  %v1648_v21 = vld [vmem:[%s3343_s3 + $0x188] sm:$0xff]  ;;  %v2479_v22 = vld [vmem:[%s3341_s1 + $0x620] ss:$16 sps:$4 sm:$0xff]  }
  0x8c   :  { %1355 = vmatprep.subr.bf16.mxu0 %v2396_v23  ;;  %1519 = vmatprep.subr.bf16.mxu1 %v2399_v24  ;;  %v2482_v23 = vld [vmem:[%s3341_s1 + $0x628] ss:$16 sps:$4 sm:$0xff]   ;;  %v2089_v24 = vpack.c.bf16 %v1616_v19, %v1615_v18  ;;  %v1657_v19 = vld [vmem:[%s3343_s3 + $0x1d0] sm:$0xff] }
  0x8d   :  { %v1626_v18 = vld [vmem:[%s3343_s3 + $0xd8] sm:$0xff] }
  0x8f   :  { %1356 = vmatpush1.bf16.msra.mxu0 %v2394_v25  ;;  %1520 = vmatpush1.bf16.msra.mxu1 %v2397_v26  ;;  %v2121_v25 = vpack.c.bf16 %v1648_v21, %v1647_v20  ;;  %v2485_v26 = vmov 0   ;;  %v1658_v20 = vld [vmem:[%s3343_s3 + $0x1d8] sm:$0xff] }
  0x90   :  { %1357 = vmatprep.subr.bf16.mxu0 %v2402_v27  ;;  %1521 = vmatprep.subr.bf16.mxu1 %v2405_v28  ;;  %v24_v27 = vld [vmem:[%s3342_s0 + $0x18] sm:$0xf]  ;;  %v1599_v28 = vld [vmem:[%s3343_s3] sm:$0xff] }
  0x93   :  { %1358 = vmatpush1.bf16.msra.mxu0 %v2400_v29  ;;  %1522 = vmatpush1.bf16.msra.mxu1 %v2403_v30  ;;  %v1600_v29 = vld [vmem:[%s3343_s3 + $0x8] sm:$0xff]  ;;  %v1631_v30 = vld [vmem:[%s3343_s3 + $0x100] sm:$0xff] }
  0x94   :  { %1359 = vmatprep.subr.bf16.mxu0 %v2408_v31  ;;  %1523 = vmatprep.subr.bf16.mxu1 %v2411_v32  ;;  %v1632_v31 = vld [vmem:[%s3343_s3 + $0x108] sm:$0xff]  ;;  %v1617_v32 = vld [vmem:[%s3343_s3 + $0x90] sm:$0xff] }
  0x97   :  { %1360 = vmatpush1.bf16.msra.mxu0 %v2406_v33  ;;  %1524 = vmatpush1.bf16.msra.mxu1 %v2409_v34  ;;  %v1618_v33 = vld [vmem:[%s3343_s3 + $0x98] sm:$0xff]  ;;  %v1649_v34 = vld [vmem:[%s3343_s3 + $0x190] sm:$0xff] }
  0x98   :  { %1361 = vmatprep.subr.bf16.mxu0 %v2414_v35  ;;  %1525 = vmatprep.subr.bf16.mxu1 %v2417_v36  ;;  %v1650_v35 = vld [vmem:[%s3343_s3 + $0x198] sm:$0xff]  ;;  %v40_v36 = vpack.c.bf16 %v24_v27, %v24_v27  ;;  %v1641_v27 = vld [vmem:[%s3343_s3 + $0x150] sm:$0xff] }
  0x9b   :  { %1362 = vmatpush1.bf16.msra.mxu0 %v2412_v37  ;;  %1526 = vmatpush1.bf16.msra.mxu1 %v2415_v38  ;;  %v2091_v37 = vpack.c.bf16 %v1600_v29, %v1599_v28  ;;  %v2123_v38 = vpack.c.bf16 %v1632_v31, %v1631_v30  ;;  %v1642_v28 = vld [vmem:[%s3343_s3 + $0x158] sm:$0xff]  ;;  %v1627_v29 = vld [vmem:[%s3343_s3 + $0xe0] sm:$0xff]  ;;  %v1628_v30 = vld [vmem:[%s3343_s3 + $0xe8] sm:$0xff] }
  0x9c   :  { %1363 = vmatprep.subr.bf16.mxu0 %v2420_v39  ;;  %1527 = vmatprep.subr.bf16.mxu1 %v2423_v40  ;;  %v1601_v39 = vld [vmem:[%s3343_s3 + $0x10] sm:$0xff]  ;;  %v1602_v40 = vld [vmem:[%s3343_s3 + $0x18] sm:$0xff]  ;;  %v1659_v31 = vld [vmem:[%s3343_s3 + $0x1e0] sm:$0xff] }
  0x9f   :  { %1364 = vmatpush1.bf16.msra.mxu0 %v2418_v41  ;;  %1528 = vmatpush1.bf16.msra.mxu1 %v2421_v42  ;;  %v2093_v41 = vpack.c.bf16 %v1618_v33, %v1617_v32  ;;  %v2125_v42 = vpack.c.bf16 %v1650_v35, %v1649_v34  ;;  %v1660_v32 = vld [vmem:[%s3343_s3 + $0x1e8] sm:$0xff]  ;;  %v2143_v34 = vpack.c.bf16 %v1642_v28, %v1641_v27 }
  0xa0   :  { %1365 = vmatprep.subr.bf16.mxu0 %v2426_v43  ;;  %1529 = vmatprep.subr.bf16.mxu1 %v2429_v44  ;;  %v1633_v43 = vld [vmem:[%s3343_s3 + $0x110] sm:$0xff]  ;;  %v1634_v44 = vld [vmem:[%s3343_s3 + $0x118] sm:$0xff]  ;;  %v2113_v35 = vpack.c.bf16 %v1628_v30, %v1627_v29 }
  0xa3   :  { %1366 = vmatpush1.bf16.msra.mxu0 %v2424_v45  ;;  %1530 = vmatpush1.bf16.msra.mxu1 %v2427_v46  ;;  %v1619_v45 = vld [vmem:[%s3343_s3 + $0xa0] sm:$0xff]  ;;  %v1620_v46 = vld [vmem:[%s3343_s3 + $0xa8] sm:$0xff] }
  0xa4   :  { %1367 = vmatprep.subr.bf16.mxu0 %v2432_v47  ;;  %1531 = vmatprep.subr.bf16.mxu1 %v2435_v48  ;;  %v1651_v47 = vld [vmem:[%s3343_s3 + $0x1a0] sm:$0xff]  ;;  %v1652_v48 = vld [vmem:[%s3343_s3 + $0x1a8] sm:$0xff] }
  0xa7   :  { %1368 = vmatpush1.bf16.msra.mxu0 %v2430_v49  ;;  %1532 = vmatpush1.bf16.msra.mxu1 %v2433_v50  ;;  %v2095_v49 = vpack.c.bf16 %v1602_v40, %v1601_v39  ;;  %v2127_v50 = vpack.c.bf16 %v1634_v44, %v1633_v43  ;;  %v1643_v39 = vld [vmem:[%s3343_s3 + $0x160] sm:$0xff]  ;;  %v1629_v43 = vld [vmem:[%s3343_s3 + $0xf0] sm:$0xff]  ;;  %v1630_v44 = vld [vmem:[%s3343_s3 + $0xf8] sm:$0xff] }
  0xa8   :  { %1369 = vmatprep.subr.bf16.mxu0 %v2438_v51  ;;  %1533 = vmatprep.subr.bf16.mxu1 %v2441_v52  ;;  %v1603_v51 = vld [vmem:[%s3343_s3 + $0x20] sm:$0xff]  ;;  %v1604_v52 = vld [vmem:[%s3343_s3 + $0x28] sm:$0xff] }
  0xab   :  { %1370 = vmatpush1.bf16.msra.mxu0 %v2436_v53  ;;  %1534 = vmatpush1.bf16.msra.mxu1 %v2439_v54  ;;  %v2097_v53 = vpack.c.bf16 %v1620_v46, %v1619_v45  ;;  %v2129_v54 = vpack.c.bf16 %v1652_v48, %v1651_v47  ;;  %v1661_v45 = vld [vmem:[%s3343_s3 + $0x1f0] sm:$0xff]  ;;  %v2117_v46 = vpack.c.bf16 %v1630_v44, %v1629_v43  ;;  %v1662_v47 = vld [vmem:[%s3343_s3 + $0x1f8] sm:$0xff] }
  0xac   :  { %1371 = vmatprep.subr.bf16.mxu0 %v2444_v55  ;;  %1535 = vmatprep.subr.bf16.mxu1 %v2447_v56  ;;  %v1635_v55 = vld [vmem:[%s3343_s3 + $0x120] sm:$0xff]  ;;  %v1636_v56 = vld [vmem:[%s3343_s3 + $0x128] sm:$0xff]  ;;  %v1613_v48 = vld [vmem:[%s3343_s3 + $0x70] sm:$0xff] }
  0xaf   :  { %1372 = vmatpush1.bf16.msra.mxu0 %v2442_v57  ;;  %1536 = vmatpush1.bf16.msra.mxu1 %v2445_v58  ;;  %v1621_v57 = vld [vmem:[%s3343_s3 + $0xb0] sm:$0xff]  ;;  %v1622_v58 = vld [vmem:[%s3343_s3 + $0xb8] sm:$0xff] }
  0xb0   :  { %1373 = vmatprep.subr.bf16.mxu0 %v2450_v59  ;;  %1537 = vmatprep.subr.bf16.mxu1 %v2453_v60  ;;  %v1653_v59 = vld [vmem:[%s3343_s3 + $0x1b0] sm:$0xff]  ;;  %v1654_v60 = vld [vmem:[%s3343_s3 + $0x1b8] sm:$0xff] }
  0xb3   :  { %1374 = vmatpush1.bf16.msra.mxu0 %v2448_v61  ;;  %1538 = vmatpush1.bf16.msra.mxu1 %v2451_v62  ;;  %v2099_v61 = vpack.c.bf16 %v1604_v52, %v1603_v51  ;;  %v2131_v62 = vpack.c.bf16 %v1636_v56, %v1635_v55  ;;  %v1645_v52 = vld [vmem:[%s3343_s3 + $0x170] sm:$0xff]  ;;  %v243_v55 = vlaneseq }
  0xb4   :  { %1375 = vmatprep.subr.bf16.mxu0 %v2456_v63  ;;  %1539 = vmatprep.subr.bf16.mxu1 %v2459_v0  ;;  %v1605_v63 = vld [vmem:[%s3343_s3 + $0x30] sm:$0xff]  ;;  %v1606_v0 = vld [vmem:[%s3343_s3 + $0x38] sm:$0xff] }
  0xb5   :  { %v244_v56 = vshrl.u32 %v243_v55, 7 }
  0xb7   :  { %1376 = vmatpush1.bf16.msra.mxu0 %v2454_v1  ;;  %1540 = vmatpush1.bf16.msra.mxu1 %v2457_v2  ;;  %v2101_v1 = vpack.c.bf16 %v1622_v58, %v1621_v57  ;;  %v2133_v2 = vpack.c.bf16 %v1654_v60, %v1653_v59  ;;  %v245_v57 = vsub.s32 0, %v244_v56  ;;  %v253_v58 = vsub.s32 2, %v244_v56  ;;  %v241_v59 = vld [vmem:[%s3344_s2] sm:$0xf] }
  0xb8   :  { %1377 = vmatprep.subr.bf16.mxu0 %v2462_v3  ;;  %1541 = vmatprep.subr.bf16.mxu1 %v2465_v4  ;;  %v1637_v3 = vld [vmem:[%s3343_s3 + $0x130] sm:$0xff]  ;;  %v1638_v4 = vld [vmem:[%s3343_s3 + $0x138] sm:$0xff]  ;;  %v249_v60 = vsub.s32 1, %v244_v56 }
  0xbb   :  { %1378 = vmatpush1.bf16.msra.mxu0 %v2460_v5  ;;  %1542 = vmatpush1.bf16.msra.mxu1 %v2463_v6  ;;  %v1623_v5 = vld [vmem:[%s3343_s3 + $0xc0] sm:$0xff]  ;;  %v1624_v6 = vld [vmem:[%s3343_s3 + $0xc8] sm:$0xff] }
  0xbc   :  { %1379 = vmatprep.subr.bf16.mxu0 %v2468_v7  ;;  %1543 = vmatprep.subr.bf16.mxu1 %v2471_v8  ;;  %v1655_v7 = vld [vmem:[%s3343_s3 + $0x1c0] sm:$0xff]  ;;  %v1656_v8 = vld [vmem:[%s3343_s3 + $0x1c8] sm:$0xff] }
  0xbf   :  { %1380 = vmatpush1.bf16.msra.mxu0 %v2466_v9  ;;  %1544 = vmatpush1.bf16.msra.mxu1 %v2469_v10  ;;  %v2103_v9 = vpack.c.bf16 %v1606_v0, %v1605_v63  ;;  %v2135_v10 = vpack.c.bf16 %v1638_v4, %v1637_v3  ;;  %v254_v63 = vrot.slane %v241_v59, %v253_v58 }
  0xc0   :  { %1390 = vmatprep.subr.bf16.mxu0 %v2475_v11  ;;  %1554 = vmatprep.subr.bf16.mxu1 %v2478_v12  ;;  %v1607_v11 = vld [vmem:[%s3343_s3 + $0x40] sm:$0xff]  ;;  %v1608_v12 = vld [vmem:[%s3343_s3 + $0x48] sm:$0xff]  ;;  %v250_v0 = vrot.slane %v241_v59, %v249_v60 }
  0xc1   :  { %v2107_v21 = vpack.c.bf16 %v1608_v12, %v1607_v11 }
  0xc2   :  { %1382 = vmatmul.mubr.bf16.vlgmr.msra.gmra.mrb[0].mxu0 %v38_v13  ;;  %1546 = vmatmul.mubr.bf16.vlgmr.msra.gmra.mrb[0].mxu1 %v38_v13  ;;  %v2105_v13 = vpack.c.bf16 %v1624_v6, %v1623_v5 }
  0xc3   :  { %1391 = vmatpush1.bf16.msra.mxu0 %v2473_v15  ;;  %1555 = vmatpush1.bf16.msra.mxu1 %v2476_v16  ;;  %v2137_v15 = vpack.c.bf16 %v1656_v8, %v1655_v7  ;;  %v1639_v16 = vld [vmem:[%s3343_s3 + $0x140] sm:$0xff] }
  0xc4   :  { %1392 = vmatprep.subr.bf16.mxu0 %v2481_v17  ;;  %1556 = vmatprep.subr.bf16.mxu1 %v2484_v14  ;;  %v1640_v17 = vld [vmem:[%s3343_s3 + $0x148] sm:$0xff]  ;;  %v1625_v14 = vld [vmem:[%s3343_s3 + $0xd0] sm:$0xff] }
  0xc5   :  { %1422 = vmatprep.mubr.bf16.mxu0 %v2485_v26  ;;  %1586 = vmatprep.mubr.bf16.mxu1 %v2485_v26  ;;  %v2141_v26 = vpack.c.bf16 %v1658_v20, %v1657_v19  ;;  %v2018_v20 = vld [vmem:[%s3345_s4] ss:$0 sm:$0xff] }
  0xc7   :  { %1393 = vmatpush1.bf16.msra.mxu0 %v2479_v22  ;;  %1557 = vmatpush1.bf16.msra.mxu1 %v2482_v23  ;;  %v2139_v22 = vpack.c.bf16 %v1640_v17, %v1639_v16  ;;  %v1609_v23 = vld [vmem:[%s3343_s3 + $0x50] sm:$0xff] }
  0xc8   :  { %2090 = vmatprep.subr.bf16.mxu0 %v2089_v24  ;;  %2122 = vmatprep.subr.bf16.mxu1 %v2121_v25  ;;  %v1610_v24 = vld [vmem:[%s3343_s3 + $0x58] sm:$0xff]  ;;  %v2109_v25 = vpack.c.bf16 %v1626_v18, %v1625_v14 }
  0xc9   :  { %v2111_v33 = vpack.c.bf16 %v1610_v24, %v1609_v23 }
  0xce   :  { %2016 = vmatmul.mubr.msk.bf16.vlgmr.msra.gmra.mrb[0].mxu0 %vm1263_vm0, %v40_v36  ;;  %2017 = vmatmul.mubr.msk.bf16.vlgmr.msra.gmra.mrb[0].mxu1 %vm1263_vm0, %v40_v36  ;;  %v2145_v36 = vpack.c.bf16 %v1660_v32, %v1659_v31 }
  0xcf   :  { %2092 = vmatpush3.bf16.msra.mxu0 %v2091_v37  ;;  %2124 = vmatpush3.bf16.msra.mxu1 %v2123_v38  ;;  %v1611_v37 = vld [vmem:[%s3343_s3 + $0x60] sm:$0xff]  ;;  %v1612_v38 = vld [vmem:[%s3343_s3 + $0x68] sm:$0xff] }
  0xd0   :  { %2094 = vmatprep.subr.bf16.mxu0 %v2093_v41  ;;  %2126 = vmatprep.subr.bf16.mxu1 %v2125_v42  ;;  %v2115_v40 = vpack.c.bf16 %v1612_v38, %v1611_v37  ;;  %v1644_v41 = vld [vmem:[%s3343_s3 + $0x168] sm:$0xff] }
  0xd1   :  { %v2147_v42 = vpack.c.bf16 %v1644_v41, %v1643_v39 }
  0xd3   :  { %2096 = vmatpush3.bf16.msra.mxu0 %v2095_v49  ;;  %2128 = vmatpush3.bf16.msra.mxu1 %v2127_v50  ;;  %v1614_v49 = vld [vmem:[%s3343_s3 + $0x78] sm:$0xff]  ;;  %v2149_v50 = vpack.c.bf16 %v1662_v47, %v1661_v45 }
  0xd4   :  { %2098 = vmatprep.subr.bf16.mxu0 %v2097_v53  ;;  %2130 = vmatprep.subr.bf16.mxu1 %v2129_v54  ;;  %v2119_v51 = vpack.c.bf16 %v1614_v49, %v1613_v48  ;;  %v1646_v53 = vld [vmem:[%s3343_s3 + $0x178] sm:$0xff] }
  0xd5   :  { %v2151_v54 = vpack.c.bf16 %v1646_v53, %v1645_v52 }
  0xd7   :  { %2100 = vmatpush3.bf16.msra.mxu0 %v2099_v61  ;;  %2132 = vmatpush3.bf16.msra.mxu1 %v2131_v62  ;;  %v257_v61 = vsub.s32 3, %v244_v56  ;;  %v246_v62 = vrot.slane %v241_v59, %v245_v57 }
  0xd8   :  { %2102 = vmatprep.subr.bf16.mxu0 %v2101_v1  ;;  %2134 = vmatprep.subr.bf16.mxu1 %v2133_v2 }
  0xd9   :  { %v258_v1 = vrot.slane %v241_v59, %v257_v61 }
  0xdb   :  { %2104 = vmatpush3.bf16.msra.mxu0 %v2103_v9  ;;  %2136 = vmatpush3.bf16.msra.mxu1 %v2135_v10 }
  0xdc   :  { %2106 = vmatprep.subr.bf16.mxu0 %v2105_v13  ;;  %2138 = vmatprep.subr.bf16.mxu1 %v2137_v15 }
  0xdf   :  { %2108 = vmatpush3.bf16.msra.mxu0 %v2107_v21  ;;  %2140 = vmatpush3.bf16.msra.mxu1 %v2139_v22 }
  0xe0   :  { %2110 = vmatprep.subr.bf16.mxu0 %v2109_v25  ;;  %2142 = vmatprep.subr.bf16.mxu1 %v2141_v26 }
  0xe3   :  { %2112 = vmatpush3.bf16.msra.mxu0 %v2111_v33  ;;  %2144 = vmatpush3.bf16.msra.mxu1 %v2143_v34 }
  0xe4   :  { %2114 = vmatprep.subr.bf16.mxu0 %v2113_v35  ;;  %2146 = vmatprep.subr.bf16.mxu1 %v2145_v36 }
  0xe7   :  { %2116 = vmatpush3.bf16.msra.mxu0 %v2115_v40  ;;  %2148 = vmatpush3.bf16.msra.mxu1 %v2147_v42 }
  0xe8   :  { %2118 = vmatprep.subr.bf16.mxu0 %v2117_v46  ;;  %2150 = vmatprep.subr.bf16.mxu1 %v2149_v50 }
  0xeb   :  { %2120 = vmatpush3.bf16.msra.mxu0 %v2119_v51  ;;  %2152 = vmatpush3.bf16.msra.mxu1 %v2151_v54 }
 0x1a1   :  { %v1424_v2 = vpop.f32.mrb[0].mxu0  ;;  %v1588_v3 = vpop.f32.mrb[0].mxu1 }
 0x1a2   :  { %v2153_v4 = vadd.f32 %v1424_v2, %v246_v62  ;;  %v2155_v5 = vadd.f32 %v1588_v3, %v254_v63  ;;  %v1426_v6 = vpop.f32.mrb[1].mxu0  ;;  %v1590_v7 = vpop.f32.mrb[1].mxu1 }
 0x1a3   :  { %v2154_v8 = vadd.f32 %v1426_v6, %v250_v0  ;;  %v2156_v9 = vadd.f32 %v1590_v7, %v258_v1  ;;  %v1428_v10 = vpop.f32.mrb[2].mxu0  ;;  %v1592_v11 = vpop.f32.mrb[2].mxu1 }
 0x1a4   :  { %v1429_v12 = vpop.f32.mrb[3].mxu0  ;;  %v1593_v13 = vpop.f32.mrb[3].mxu1  ;;  %v1595_v17 = vmax.f32 %v2153_v4, 0.0  ;;  %v1597_v14 = vmax.f32 %v2155_v5, 0.0 }
 0x1a5   :  { %v1596_v15 = vmax.f32 %v2154_v8, 0.0  ;;  %v1598_v16 = vmax.f32 %v2156_v9, 0.0 }
 0x1a7   :  { %1734 = vmatprep.mubr.f32.mxu0 %v1596_v15  ;;  %1804 = vmatprep.mubr.f32.mxu1 %v1598_v16 }
 0x1a8   :  { %1735 = vmatmul.mubr.f32.vlgmr.msra.gmra.mrb[4].mxu0 %v1595_v17  ;;  %1805 = vmatmul.mubr.f32.vlgmr.msra.gmra.mrb[4].mxu1 %v1597_v14 }
 0x27b   :  { %v2051_v18 = vpop.f32.mrb[4].mxu0  ;;  %v2086_v19 = vpop.f32.mrb[4].mxu1 }
 0x27c   :  { %v2052_v21 = vpop.f32.mrb[5].mxu0  ;;  %v2087_v22 = vpop.f32.mrb[5].mxu1 }
 0x27d   :  { %v2053_v23 = vadd.f32 %v2052_v21, %v2051_v18  ;;  %v2088_v24 = vadd.f32 %v2087_v22, %v2086_v19 }
 0x27f   :  { %v1737_v25 = vadd.f32 %v2053_v23, %v2018_v20 }
 0x281   :  { %v1807_v26 = vadd.f32 %v2088_v24, %v1737_v25 }
 0x283   :  { %1811 = vst.msk [vmem:[%s3346_s5] sm:$0xf] %vm1810_vm1, %v1807_v26 }

// kernel: siamese_forward.4
= control target key start
LH: loop header
LB: loop body
LE: loop exit
PB: predicated region body
PF: predicated region fallthrough
CT: control target
= control target key end

     0   :  { %s4212_s18 = smov 0   ;;  %s6431_s0 = inlined_call_operand.vmem [shape: f32[4,6,240], index: 0, kind: input, shape index: {}]   ;;  %s6432_s1 = inlined_call_operand.vmem [shape: f32[4,6,240], index: 1, kind: input, shape index: {}]   ;;  %s6433_s2 = inlined_call_operand.vmem [shape: bf16[5,240,200], index: 2, kind: input, shape index: {}]   ;;  %s6434_s3 = inlined_call_operand.vmem [shape: bf16[5,240,200], index: 3, kind: input, shape index: {}]   ;;  %s6435_s4 = inlined_call_operand.vmem [shape: f32[1,200], index: 4, kind: input, shape index: {}]   ;;  %s6436_s5 = inlined_call_operand.vmem [shape: f32[4,4,200], index: 5, kind: output, shape index: {}]  }
   0x1 LB: > { %s3076_s19 = sadd.s32 4294967295, %s4180_s18   ;;  %p3080_p0 = scmp.ge.s32.totalorder %s4180_s18, 1  ;;  %s4180_s18 = sphi %s4212_s18, %s15_s18  }
   0x2   : > { %p197_p1 = scmp.lt.s32.totalorder %s4180_s18, 5 }
   0x4   : > { %p198_p2 = pnand %p3080_p0, %p197_p1 }
   0x6   : > { %201 = sbr.rel (%p198_p2) target bundleno = 837 (0x345), region = 40 }
   0xd   : > { %v4223_v0 = vld [vmem:[%s6433_s2 + $0xf4] ss:$8 sps:$4 sm:$0xff]   ;;  %v4234_v2 = vld [vmem:[%s6433_s2 + $0xf0] ss:$8 sps:$4 sm:$0xff]   ;;  %v4245_v4 = vld [vmem:[%s6433_s2 + $0x104] ss:$8 sps:$4 sm:$0xff]  }
   0xe   : > { %v4228_v1 = vld [vmem:[%s6434_s3 + $0xf4] ss:$8 sps:$4 sm:$0xff]   ;;  %530 = vmatprep.subr.bf16.mxu0 %v4223_v0  ;;  %v4239_v3 = vld [vmem:[%s6434_s3 + $0xf0] ss:$8 sps:$4 sm:$0xff]   ;;  %v4252_v5 = vld [vmem:[%s6434_s3 + $0x104] ss:$8 sps:$4 sm:$0xff]  }
   0xf   : > { %915 = vmatprep.subr.bf16.mxu1 %v4228_v1  ;;  %531 = vmatpush1.bf16.msra.mxu0 %v4234_v2  ;;  %v4257_v6 = vld [vmem:[%s6433_s2 + $0x100] ss:$8 sps:$4 sm:$0xff]   ;;  %v4269_v8 = vld [vmem:[%s6433_s2 + $0x114] ss:$8 sps:$4 sm:$0xff]   ;;  %v4279_v10 = vld [vmem:[%s6433_s2 + $0x110] ss:$8 sps:$4 sm:$0xff]  }
  0x10   : > { %916 = vmatpush1.bf16.msra.mxu1 %v4239_v3  ;;  %532 = vmatprep.subr.bf16.mxu0 %v4245_v4  ;;  %v4263_v7 = vld [vmem:[%s6434_s3 + $0x100] ss:$8 sps:$4 sm:$0xff]   ;;  %v4274_v9 = vld [vmem:[%s6434_s3 + $0x114] ss:$8 sps:$4 sm:$0xff]   ;;  %v4284_v11 = vld [vmem:[%s6434_s3 + $0x110] ss:$8 sps:$4 sm:$0xff]  }
  0x11   : > { %917 = vmatprep.subr.bf16.mxu1 %v4252_v5  ;;  %v4291_v12 = vld [vmem:[%s6433_s2 + $0x124] ss:$8 sps:$4 sm:$0xff]   ;;  %v4303_v14 = vld [vmem:[%s6433_s2 + $0x120] ss:$8 sps:$4 sm:$0xff]   ;;  %v4315_v16 = vld [vmem:[%s6433_s2 + $0x134] ss:$8 sps:$4 sm:$0xff]  }
  0x12   : > { %v4298_v13 = vld [vmem:[%s6434_s3 + $0x124] ss:$8 sps:$4 sm:$0xff]   ;;  %v4310_v15 = vld [vmem:[%s6434_s3 + $0x120] ss:$8 sps:$4 sm:$0xff]   ;;  %v4322_v17 = vld [vmem:[%s6434_s3 + $0x134] ss:$8 sps:$4 sm:$0xff]  }
  0x13   : > { %533 = vmatpush1.bf16.msra.mxu0 %v4257_v6  ;;  %v4327_v18 = vld [vmem:[%s6433_s2 + $0x130] ss:$8 sps:$4 sm:$0xff]   ;;  %v4339_v20 = vld [vmem:[%s6433_s2 + $0x144] ss:$8 sps:$4 sm:$0xff]   ;;  %v4351_v22 = vld [vmem:[%s6433_s2 + $0x140] ss:$8 sps:$4 sm:$0xff]  }
  0x14   : > { %918 = vmatpush1.bf16.msra.mxu1 %v4263_v7  ;;  %534 = vmatprep.subr.bf16.mxu0 %v4269_v8  ;;  %v4332_v19 = vld [vmem:[%s6434_s3 + $0x130] ss:$8 sps:$4 sm:$0xff]   ;;  %v4346_v21 = vld [vmem:[%s6434_s3 + $0x144] ss:$8 sps:$4 sm:$0xff]   ;;  %v4358_v23 = vld [vmem:[%s6434_s3 + $0x140] ss:$8 sps:$4 sm:$0xff]  }
  0x15   : > { %919 = vmatprep.subr.bf16.mxu1 %v4274_v9  ;;  %v4363_v24 = vld [vmem:[%s6433_s2 + $0x154] ss:$8 sps:$4 sm:$0xff]   ;;  %v4375_v26 = vld [vmem:[%s6433_s2 + $0x150] ss:$8 sps:$4 sm:$0xff]   ;;  %v4387_v28 = vld [vmem:[%s6433_s2 + $0x164] ss:$8 sps:$4 sm:$0xff]  }
  0x16   : > { %v4370_v25 = vld [vmem:[%s6434_s3 + $0x154] ss:$8 sps:$4 sm:$0xff]   ;;  %v4380_v27 = vld [vmem:[%s6434_s3 + $0x150] ss:$8 sps:$4 sm:$0xff]   ;;  %v4394_v29 = vld [vmem:[%s6434_s3 + $0x164] ss:$8 sps:$4 sm:$0xff]  }
  0x17   : > { %535 = vmatpush1.bf16.msra.mxu0 %v4279_v10  ;;  %p230_p3 = scmp.lt.s32.totalorder %s3076_s19, 3  ;;  %v4401_v30 = vld [vmem:[%s6433_s2 + $0x160] ss:$8 sps:$4 sm:$0xff]   ;;  %v4413_v32 = vld [vmem:[%s6433_s2 + $0x174] ss:$8 sps:$4 sm:$0xff]   ;;  %vm526_vm0 = vcmask 916480  }
  0x18   : > { %920 = vmatpush1.bf16.msra.mxu1 %v4284_v11  ;;  %536 = vmatprep.subr.bf16.mxu0 %v4291_v12  ;;  %v4408_v31 = vld [vmem:[%s6434_s3 + $0x160] ss:$8 sps:$4 sm:$0xff]   ;;  %v4420_v33 = vld [vmem:[%s6434_s3 + $0x174] ss:$8 sps:$4 sm:$0xff]   ;;  %v4429_v34 = vld [vmem:[%s6433_s2 + $0x170] ss:$8 sps:$4 sm:$0xff]  }
  0x19   : > { %921 = vmatprep.subr.bf16.mxu1 %v4298_v13  ;;  %s6641_s19 = smov (!%p230_p3, %s3076_s19), 3  ;;  %v4434_v35 = vld [vmem:[%s6434_s3 + $0x170] ss:$8 sps:$4 sm:$0xff]   ;;  %v4441_v36 = vld [vmem:[%s6433_s2 + $0x184] ss:$8 sps:$4 sm:$0xff]   ;;  %vm3005_vm1 = vcmask 1043456  }
  0x1a   : > { %v4448_v37 = vld [vmem:[%s6434_s3 + $0x184] ss:$8 sps:$4 sm:$0xff]   ;;  %s3649_s27 = sshll.u32 %s6641_s19, 4  ;;  %v4454_v38 = vld [vmem:[%s6433_s2 + $0x180] ss:$8 sps:$4 sm:$0xff]   ;;  %s3651_s25 = sshll.u32 %s6641_s19, 3 }
  0x1b   : > { %537 = vmatpush1.bf16.msra.mxu0 %v4303_v14  ;;  %v4461_v39 = vld [vmem:[%s6434_s3 + $0x180] ss:$8 sps:$4 sm:$0xff]   ;;  %v4466_v40 = vld [vmem:[%s6433_s2 + $0x194] ss:$8 sps:$4 sm:$0xff]   ;;  %s4480_s13 = scalar_lea.vmem %s6432_s1, %s3649_s27  ;;  %v4485_v42 = vld [vmem:[%s6433_s2 + $0x190] ss:$8 sps:$4 sm:$0xff]   ;;  %s4739_s11 = scalar_lea.vmem %s6431_s0, %s3649_s27 }
  0x1c   : > { %922 = vmatpush1.bf16.msra.mxu1 %v4310_v15  ;;  %538 = vmatprep.subr.bf16.mxu0 %v4315_v16  ;;  %v4473_v41 = vld [vmem:[%s6434_s3 + $0x194] ss:$8 sps:$4 sm:$0xff]   ;;  %v4490_v43 = vld [vmem:[%s6434_s3 + $0x190] ss:$8 sps:$4 sm:$0xff]   ;;  %v311_v44 = vld [vmem:[%s4480_s13 + $0x8] sm:$0xf]  ;;  %s244_s29 = scalar_lea.vmem %s6436_s5, %s3651_s25 }
  0x1d   : > { %923 = vmatprep.subr.bf16.mxu1 %v4322_v17  ;;  %v4500_v45 = vld [vmem:[%s6433_s2 + $0x1a4] ss:$8 sps:$4 sm:$0xff]   ;;  %v4507_v47 = vpack.c.bf16 %v311_v44, %v311_v44  ;;  %v4518_v48 = vld [vmem:[%s6433_s2 + $0x1a0] ss:$8 sps:$4 sm:$0xff]   ;;  %v4530_v50 = vld [vmem:[%s6433_s2 + $0x1b4] ss:$8 sps:$4 sm:$0xff]  }
  0x1e   : > { %v4505_v46 = vld [vmem:[%s6434_s3 + $0x1a4] ss:$8 sps:$4 sm:$0xff]   ;;  %v4523_v49 = vld [vmem:[%s6434_s3 + $0x1a0] ss:$8 sps:$4 sm:$0xff]   ;;  %v4535_v51 = vld [vmem:[%s6434_s3 + $0x1b4] ss:$8 sps:$4 sm:$0xff]  }
  0x1f   : > { %539 = vmatpush1.bf16.msra.mxu0 %v4327_v18  ;;  %6506 = vst [vmem:[#allocation2_spill] sm:$0xff] %v4507_v47  ;;  %3177 = vmatprep.mubr.msk.bf16.mxu0 %vm526_vm0, %v4507_v47  ;;  %v4542_v52 = vld [vmem:[%s6433_s2 + $0x1b0] ss:$8 sps:$4 sm:$0xff]   ;;  %v4554_v54 = vld [vmem:[%s6433_s2 + $0x1c4] ss:$8 sps:$4 sm:$0xff]   ;;  %vm3006_vm2 = vcmask 588804  }
  0x20   : > { %924 = vmatpush1.bf16.msra.mxu1 %v4332_v19  ;;  %540 = vmatprep.subr.bf16.mxu0 %v4339_v20  ;;  %v4547_v53 = vld [vmem:[%s6434_s3 + $0x1b0] ss:$8 sps:$4 sm:$0xff]   ;;  %6507 = vst [vmem:[#allocation3_spill] sm:$0xff] %v4554_v54  ;;  %v4559_v55 = vld [vmem:[%s6434_s3 + $0x1c4] ss:$8 sps:$4 sm:$0xff]   ;;  %vm3007_vm3 = vmor %vm3006_vm2, %vm3005_vm1 }
  0x21   : > { %925 = vmatprep.subr.bf16.mxu1 %v4346_v21  ;;  %3239 = vmatprep.mubr.msk.bf16.mxu1 %vm526_vm0, %v4507_v47  ;;  %6508 = vst [vmem:[#allocation4_spill] sm:$0xff] %v4559_v55  ;;  %v4566_v56 = vld [vmem:[%s6433_s2 + $0x1c0] ss:$8 sps:$4 sm:$0xff]   ;;  %v4578_v58 = vld [vmem:[%s6433_s2 + $0x1d4] ss:$8 sps:$4 sm:$0xff]  }
  0x22   : > { %6509 = vst [vmem:[#allocation5_spill] sm:$0xff] %v4566_v56  ;;  %v4571_v57 = vld [vmem:[%s6434_s3 + $0x1c0] ss:$8 sps:$4 sm:$0xff]   ;;  %6511 = vst [vmem:[#allocation7_spill] sm:$0xff] %v4578_v58  ;;  %v4583_v59 = vld [vmem:[%s6434_s3 + $0x1d4] ss:$8 sps:$4 sm:$0xff]  }
  0x23   : > { %541 = vmatpush1.bf16.msra.mxu0 %v4351_v22  ;;  %6510 = vst [vmem:[#allocation6_spill] sm:$0xff] %v4571_v57  ;;  %6512 = vst [vmem:[#allocation8_spill] sm:$0xff] %v4583_v59  ;;  %v4588_v60 = vld [vmem:[%s6433_s2 + $0x1d0] ss:$8 sps:$4 sm:$0xff]   ;;  %v310_v62 = vld [vmem:[%s4480_s13] sm:$0xf] }
  0x24   : > { %926 = vmatpush1.bf16.msra.mxu1 %v4358_v23  ;;  %542 = vmatprep.subr.bf16.mxu0 %v4363_v24  ;;  %6513 = vst [vmem:[#allocation9_spill] sm:$0xff] %v4588_v60  ;;  %v4595_v61 = vld [vmem:[%s6434_s3 + $0x1d0] ss:$8 sps:$4 sm:$0xff]   ;;  %v4603_v63 = vld [vmem:[%s6433_s2 + $0x4] ss:$8 sps:$4 sm:$0xff]   ;;  %v4610_v47 = vpack.c.bf16 %v310_v62, %v310_v62 }
  0x25   : > { %927 = vmatprep.subr.bf16.mxu1 %v4370_v25  ;;  %6514 = vst [vmem:[#allocation10_spill] sm:$0xff] %v4595_v61  ;;  %6515 = vst [vmem:[#allocation11_spill] sm:$0xff] %v4603_v63  ;;  %v4608_v44 = vld [vmem:[%s6434_s3 + $0x4] ss:$8 sps:$4 sm:$0xff]   ;;  %v4629_v62 = vld [vmem:[%s6433_s2 + $0x14] ss:$8 sps:$4 sm:$0xff]  }
  0x26   : > { %6516 = vst [vmem:[#allocation12_spill] sm:$0xff] %v4608_v44  ;;  %6517 = vst [vmem:[#allocation13_spill] sm:$0xff] %v4610_v47 }
  0x27   : > { %543 = vmatpush1.bf16.msra.mxu0 %v4375_v26  ;;  %6520 = vst [vmem:[#allocation16_spill] sm:$0xff] %v4629_v62 }
  0x28   : > { %928 = vmatpush1.bf16.msra.mxu1 %v4380_v27  ;;  %544 = vmatprep.subr.bf16.mxu0 %v4387_v28 }
  0x29   : > { %929 = vmatprep.subr.bf16.mxu1 %v4394_v29 }
  0x2b   : > { %545 = vmatpush1.bf16.msra.mxu0 %v4401_v30 }
  0x2c   : > { %930 = vmatpush1.bf16.msra.mxu1 %v4408_v31  ;;  %546 = vmatprep.subr.bf16.mxu0 %v4413_v32 }
  0x2d   : > { %931 = vmatprep.subr.bf16.mxu1 %v4420_v33 }
  0x2f   : > { %547 = vmatpush1.bf16.msra.mxu0 %v4429_v34 }
  0x30   : > { %932 = vmatpush1.bf16.msra.mxu1 %v4434_v35  ;;  %548 = vmatprep.subr.bf16.mxu0 %v4441_v36 }
  0x31   : > { %933 = vmatprep.subr.bf16.mxu1 %v4448_v37 }
  0x33   : > { %549 = vmatpush1.bf16.msra.mxu0 %v4454_v38 }
  0x34   : > { %934 = vmatpush1.bf16.msra.mxu1 %v4461_v39  ;;  %550 = vmatprep.subr.bf16.mxu0 %v4466_v40 }
  0x35   : > { %935 = vmatprep.subr.bf16.mxu1 %v4473_v41 }
  0x37   : > { %551 = vmatpush1.bf16.msra.mxu0 %v4485_v42 }
  0x38   : > { %936 = vmatpush1.bf16.msra.mxu1 %v4490_v43  ;;  %552 = vmatprep.subr.bf16.mxu0 %v4500_v45 }
  0x39   : > { %937 = vmatprep.subr.bf16.mxu1 %v4505_v46 }
  0x3b   : > { %553 = vmatpush1.bf16.msra.mxu0 %v4518_v48 }
  0x3c   : > { %938 = vmatpush1.bf16.msra.mxu1 %v4523_v49  ;;  %554 = vmatprep.subr.bf16.mxu0 %v4530_v50 }
  0x3d   : > { %939 = vmatprep.subr.bf16.mxu1 %v4535_v51 }
  0x3f   : > { %555 = vmatpush1.bf16.msra.mxu0 %v4542_v52 }
  0x40   : > { %940 = vmatpush1.bf16.msra.mxu1 %v4547_v53  ;;  %556 = vmatprep.subr.bf16.mxu0 %v4554_v54 }
  0x41   : > { %941 = vmatprep.subr.bf16.mxu1 %v4559_v55  ;;  %v4921_v55 = vld [vmem:[%s6434_s3 + $0xc0] ss:$8 sps:$4 sm:$0xff]  }
  0x42   : > { %6567 = vst [vmem:[#allocation63_spill] sm:$0xff] %v4921_v55 }
  0x43   : > { %557 = vmatpush1.bf16.msra.mxu0 %v4566_v56  ;;  %v4795_v56 = vld [vmem:[%s6433_s2 + $0x70] ss:$8 sps:$4 sm:$0xff]  }
  0x44   : > { %942 = vmatpush1.bf16.msra.mxu1 %v4571_v57  ;;  %558 = vmatprep.subr.bf16.mxu0 %v4578_v58  ;;  %v4622_v58 = vld [vmem:[%s6434_s3] ss:$8 sps:$4 sm:$0xff]   ;;  %6546 = vst [vmem:[#allocation42_spill] sm:$0xff] %v4795_v56 }
  0x45   : > { %943 = vmatprep.subr.bf16.mxu1 %v4583_v59  ;;  %v4617_v59 = vld [vmem:[%s6433_s2] ss:$8 sps:$4 sm:$0xff]   ;;  %6519 = vst [vmem:[#allocation15_spill] sm:$0xff] %v4622_v58 }
  0x46   : > { %6518 = vst [vmem:[#allocation14_spill] sm:$0xff] %v4617_v59  ;;  %v4769_v57 = vld [vmem:[%s6433_s2 + $0x60] ss:$8 sps:$4 sm:$0xff]  }
  0x47   : > { %559 = vmatpush1.bf16.msra.mxu0 %v4588_v60  ;;  %6542 = vst [vmem:[#allocation38_spill] sm:$0xff] %v4769_v57 }
  0x48   : > { %944 = vmatpush1.bf16.msra.mxu1 %v4595_v61  ;;  %724 = vmatprep.subr.bf16.mxu0 %v4603_v63  ;;  %v4634_v61 = vld [vmem:[%s6434_s3 + $0x14] ss:$8 sps:$4 sm:$0xff]   ;;  %v4648_v63 = vld [vmem:[%s6434_s3 + $0x10] ss:$8 sps:$4 sm:$0xff]  }
  0x49   : > { %1106 = vmatprep.subr.bf16.mxu1 %v4608_v44  ;;  %6521 = vst [vmem:[#allocation17_spill] sm:$0xff] %v4634_v61  ;;  %v4643_v44 = vld [vmem:[%s6433_s2 + $0x10] ss:$8 sps:$4 sm:$0xff]   ;;  %6523 = vst [vmem:[#allocation19_spill] sm:$0xff] %v4648_v63 }
  0x4a   : > { %563 = vmatmul.mubr.bf16.vlgmr.msra.gmra.mrb[0].mxu0 %v4610_v47  ;;  %6522 = vst [vmem:[#allocation18_spill] sm:$0xff] %v4643_v44 }
  0x4b   : > { %948 = vmatmul.mubr.bf16.vlgmr.msra.gmra.mrb[0].mxu1 %v4610_v47  ;;  %725 = vmatpush1.bf16.msra.mxu0 %v4617_v59  ;;  %v4655_v47 = vld [vmem:[%s6433_s2 + $0x24] ss:$8 sps:$4 sm:$0xff]   ;;  %v307_v59 = vld [vmem:[%s4739_s11 + $0x8] sm:$0xf] }
  0x4c   : > { %1107 = vmatpush1.bf16.msra.mxu1 %v4622_v58  ;;  %726 = vmatprep.subr.bf16.mxu0 %v4629_v62  ;;  %6524 = vst [vmem:[#allocation20_spill] sm:$0xff] %v4655_v47  ;;  %v4660_v58 = vld [vmem:[%s6434_s3 + $0x24] ss:$8 sps:$4 sm:$0xff]   ;;  %v4667_v62 = vld [vmem:[%s6433_s2 + $0x20] ss:$8 sps:$4 sm:$0xff]   ;;  %v309_v60 = vpack.c.bf16 %v307_v59, %v307_v59 }
  0x4d   : > { %1108 = vmatprep.subr.bf16.mxu1 %v4634_v61  ;;  %6525 = vst [vmem:[#allocation21_spill] sm:$0xff] %v4660_v58  ;;  %6526 = vst [vmem:[#allocation22_spill] sm:$0xff] %v4667_v62  ;;  %v4672_v61 = vld [vmem:[%s6434_s3 + $0x20] ss:$8 sps:$4 sm:$0xff]   ;;  %v4788_v59 = vld [vmem:[%s6434_s3 + $0x74] ss:$8 sps:$4 sm:$0xff]  }
  0x4e   : > { %6527 = vst [vmem:[#allocation23_spill] sm:$0xff] %v4672_v61  ;;  %3208 = vmatprep.mubr.msk.bf16.mxu0 %vm526_vm0, %v309_v60  ;;  %3270 = vmatprep.mubr.msk.bf16.mxu1 %vm526_vm0, %v309_v60  ;;  %6545 = vst [vmem:[#allocation41_spill] sm:$0xff] %v4788_v59  ;;  %v4800_v60 = vld [vmem:[%s6434_s3 + $0x70] ss:$8 sps:$4 sm:$0xff]  }
  0x4f   : > { %727 = vmatpush1.bf16.msra.mxu0 %v4643_v44  ;;  %v4679_v44 = vld [vmem:[%s6433_s2 + $0x34] ss:$8 sps:$4 sm:$0xff]   ;;  %6547 = vst [vmem:[#allocation43_spill] sm:$0xff] %v4800_v60 }
  0x50   : > { %1109 = vmatpush1.bf16.msra.mxu1 %v4648_v63  ;;  %728 = vmatprep.subr.bf16.mxu0 %v4655_v47  ;;  %6528 = vst [vmem:[#allocation24_spill] sm:$0xff] %v4679_v44  ;;  %v4684_v63 = vld [vmem:[%s6434_s3 + $0x34] ss:$8 sps:$4 sm:$0xff]   ;;  %v4691_v47 = vld [vmem:[%s6433_s2 + $0x30] ss:$8 sps:$4 sm:$0xff]  }
  0x51   : > { %1110 = vmatprep.subr.bf16.mxu1 %v4660_v58  ;;  %6529 = vst [vmem:[#allocation25_spill] sm:$0xff] %v4684_v63  ;;  %6530 = vst [vmem:[#allocation26_spill] sm:$0xff] %v4691_v47  ;;  %v4696_v58 = vld [vmem:[%s6434_s3 + $0x30] ss:$8 sps:$4 sm:$0xff]  }
  0x52   : > { %6531 = vst [vmem:[#allocation27_spill] sm:$0xff] %v4696_v58 }
  0x53   : > { %729 = vmatpush1.bf16.msra.mxu0 %v4667_v62  ;;  %v4703_v62 = vld [vmem:[%s6433_s2 + $0x44] ss:$8 sps:$4 sm:$0xff]  }
  0x54   : > { %1111 = vmatpush1.bf16.msra.mxu1 %v4672_v61  ;;  %730 = vmatprep.subr.bf16.mxu0 %v4679_v44  ;;  %6532 = vst [vmem:[#allocation28_spill] sm:$0xff] %v4703_v62  ;;  %v4708_v61 = vld [vmem:[%s6434_s3 + $0x44] ss:$8 sps:$4 sm:$0xff]   ;;  %v4715_v44 = vld [vmem:[%s6433_s2 + $0x40] ss:$8 sps:$4 sm:$0xff]  }
  0x55   : > { %1112 = vmatprep.subr.bf16.mxu1 %v4684_v63  ;;  %6533 = vst [vmem:[#allocation29_spill] sm:$0xff] %v4708_v61  ;;  %6534 = vst [vmem:[#allocation30_spill] sm:$0xff] %v4715_v44  ;;  %v4720_v63 = vld [vmem:[%s6434_s3 + $0x40] ss:$8 sps:$4 sm:$0xff]  }
  0x56   : > { %6535 = vst [vmem:[#allocation31_spill] sm:$0xff] %v4720_v63 }
  0x57   : > { %731 = vmatpush1.bf16.msra.mxu0 %v4691_v47  ;;  %v4727_v47 = vld [vmem:[%s6433_s2 + $0x54] ss:$8 sps:$4 sm:$0xff]  }
  0x58   : > { %1113 = vmatpush1.bf16.msra.mxu1 %v4696_v58  ;;  %732 = vmatprep.subr.bf16.mxu0 %v4703_v62  ;;  %6536 = vst [vmem:[#allocation32_spill] sm:$0xff] %v4727_v47  ;;  %v4732_v58 = vld [vmem:[%s6434_s3 + $0x54] ss:$8 sps:$4 sm:$0xff]   ;;  %v4751_v62 = vld [vmem:[%s6434_s3 + $0x50] ss:$8 sps:$4 sm:$0xff]  }
  0x59   : > { %1114 = vmatprep.subr.bf16.mxu1 %v4708_v61  ;;  %6537 = vst [vmem:[#allocation33_spill] sm:$0xff] %v4732_v58  ;;  %v4746_v61 = vld [vmem:[%s6433_s2 + $0x50] ss:$8 sps:$4 sm:$0xff]   ;;  %6539 = vst [vmem:[#allocation35_spill] sm:$0xff] %v4751_v62 }
  0x5a   : > { %6538 = vst [vmem:[#allocation34_spill] sm:$0xff] %v4746_v61 }
  0x5b   : > { %733 = vmatpush1.bf16.msra.mxu0 %v4715_v44  ;;  %v4759_v44 = vld [vmem:[%s6433_s2 + $0x64] ss:$8 sps:$4 sm:$0xff]  }
  0x5c   : > { %1115 = vmatpush1.bf16.msra.mxu1 %v4720_v63  ;;  %734 = vmatprep.subr.bf16.mxu0 %v4727_v47  ;;  %6540 = vst [vmem:[#allocation36_spill] sm:$0xff] %v4759_v44  ;;  %v4764_v63 = vld [vmem:[%s6434_s3 + $0x64] ss:$8 sps:$4 sm:$0xff]   ;;  %v4779_v47 = vld [vmem:[%s6433_s2 + $0x74] ss:$8 sps:$4 sm:$0xff]  }
  0x5d   : > { %1116 = vmatprep.subr.bf16.mxu1 %v4732_v58  ;;  %6541 = vst [vmem:[#allocation37_spill] sm:$0xff] %v4764_v63  ;;  %v4774_v58 = vld [vmem:[%s6434_s3 + $0x60] ss:$8 sps:$4 sm:$0xff]   ;;  %6544 = vst [vmem:[#allocation40_spill] sm:$0xff] %v4779_v47 }
  0x5e   : > { %6543 = vst [vmem:[#allocation39_spill] sm:$0xff] %v4774_v58 }
  0x5f   : > { %735 = vmatpush1.bf16.msra.mxu0 %v4746_v61  ;;  %v4824_v61 = vld [vmem:[%s6434_s3 + $0x80] ss:$8 sps:$4 sm:$0xff]  }
  0x60   : > { %1117 = vmatpush1.bf16.msra.mxu1 %v4751_v62  ;;  %736 = vmatprep.subr.bf16.mxu0 %v4759_v44  ;;  %v4805_v62 = vld [vmem:[%s6433_s2 + $0x84] ss:$8 sps:$4 sm:$0xff]   ;;  %6551 = vst [vmem:[#allocation47_spill] sm:$0xff] %v4824_v61 }
  0x61   : > { %1118 = vmatprep.subr.bf16.mxu1 %v4764_v63  ;;  %6548 = vst [vmem:[#allocation44_spill] sm:$0xff] %v4805_v62  ;;  %v4810_v44 = vld [vmem:[%s6434_s3 + $0x84] ss:$8 sps:$4 sm:$0xff]   ;;  %v4819_v63 = vld [vmem:[%s6433_s2 + $0x80] ss:$8 sps:$4 sm:$0xff]  }
  0x62   : > { %6549 = vst [vmem:[#allocation45_spill] sm:$0xff] %v4810_v44  ;;  %6550 = vst [vmem:[#allocation46_spill] sm:$0xff] %v4819_v63 }
  0x63   : > { %737 = vmatpush1.bf16.msra.mxu0 %v4769_v57  ;;  %v4829_v57 = vld [vmem:[%s6433_s2 + $0x94] ss:$8 sps:$4 sm:$0xff]  }
  0x64   : > { %1119 = vmatpush1.bf16.msra.mxu1 %v4774_v58  ;;  %738 = vmatprep.subr.bf16.mxu0 %v4779_v47  ;;  %6552 = vst [vmem:[#allocation48_spill] sm:$0xff] %v4829_v57  ;;  %v4834_v47 = vld [vmem:[%s6434_s3 + $0x94] ss:$8 sps:$4 sm:$0xff]   ;;  %v4848_v58 = vld [vmem:[%s6434_s3 + $0x90] ss:$8 sps:$4 sm:$0xff]  }
  0x65   : > { %1120 = vmatprep.subr.bf16.mxu1 %v4788_v59  ;;  %6553 = vst [vmem:[#allocation49_spill] sm:$0xff] %v4834_v47  ;;  %v4843_v59 = vld [vmem:[%s6433_s2 + $0x90] ss:$8 sps:$4 sm:$0xff]   ;;  %6555 = vst [vmem:[#allocation51_spill] sm:$0xff] %v4848_v58 }
  0x66   : > { %6554 = vst [vmem:[#allocation50_spill] sm:$0xff] %v4843_v59 }
  0x67   : > { %739 = vmatpush1.bf16.msra.mxu0 %v4795_v56  ;;  %v4853_v56 = vld [vmem:[%s6433_s2 + $0xa4] ss:$8 sps:$4 sm:$0xff]  }
  0x68   : > { %1121 = vmatpush1.bf16.msra.mxu1 %v4800_v60  ;;  %740 = vmatprep.subr.bf16.mxu0 %v4805_v62  ;;  %6556 = vst [vmem:[#allocation52_spill] sm:$0xff] %v4853_v56  ;;  %v4858_v62 = vld [vmem:[%s6434_s3 + $0xa4] ss:$8 sps:$4 sm:$0xff]   ;;  %v4872_v60 = vld [vmem:[%s6434_s3 + $0xa0] ss:$8 sps:$4 sm:$0xff]  }
  0x69   : > { %1122 = vmatprep.subr.bf16.mxu1 %v4810_v44  ;;  %6557 = vst [vmem:[#allocation53_spill] sm:$0xff] %v4858_v62  ;;  %v4867_v44 = vld [vmem:[%s6433_s2 + $0xa0] ss:$8 sps:$4 sm:$0xff]   ;;  %6559 = vst [vmem:[#allocation55_spill] sm:$0xff] %v4872_v60 }
  0x6a   : > { %6558 = vst [vmem:[#allocation54_spill] sm:$0xff] %v4867_v44 }
  0x6b   : > { %741 = vmatpush1.bf16.msra.mxu0 %v4819_v63  ;;  %v4877_v63 = vld [vmem:[%s6433_s2 + $0xb4] ss:$8 sps:$4 sm:$0xff]  }
  0x6c   : > { %1123 = vmatpush1.bf16.msra.mxu1 %v4824_v61  ;;  %742 = vmatprep.subr.bf16.mxu0 %v4829_v57  ;;  %6560 = vst [vmem:[#allocation56_spill] sm:$0xff] %v4877_v63  ;;  %v4891_v57 = vld [vmem:[%s6433_s2 + $0xb0] ss:$8 sps:$4 sm:$0xff]  }
  0x6d   : > { %1124 = vmatprep.subr.bf16.mxu1 %v4834_v47  ;;  %v4882_v47 = vld [vmem:[%s6434_s3 + $0xb4] ss:$8 sps:$4 sm:$0xff]   ;;  %6562 = vst [vmem:[#allocation58_spill] sm:$0xff] %v4891_v57  ;;  %v4896_v61 = vld [vmem:[%s6434_s3 + $0xb0] ss:$8 sps:$4 sm:$0xff]  }
  0x6e   : > { %6561 = vst [vmem:[#allocation57_spill] sm:$0xff] %v4882_v47  ;;  %6563 = vst [vmem:[#allocation59_spill] sm:$0xff] %v4896_v61 }
  0x6f   : > { %743 = vmatpush1.bf16.msra.mxu0 %v4843_v59  ;;  %v4901_v59 = vld [vmem:[%s6433_s2 + $0xc4] ss:$8 sps:$4 sm:$0xff]  }
  0x70   : > { %1125 = vmatpush1.bf16.msra.mxu1 %v4848_v58  ;;  %744 = vmatprep.subr.bf16.mxu0 %v4853_v56  ;;  %6564 = vst [vmem:[#allocation60_spill] sm:$0xff] %v4901_v59  ;;  %v4906_v56 = vld [vmem:[%s6434_s3 + $0xc4] ss:$8 sps:$4 sm:$0xff]   ;;  %v4916_v58 = vld [vmem:[%s6433_s2 + $0xc0] ss:$8 sps:$4 sm:$0xff]  }
  0x71   : > { %1126 = vmatprep.subr.bf16.mxu1 %v4858_v62  ;;  %6565 = vst [vmem:[#allocation61_spill] sm:$0xff] %v4906_v56  ;;  %v1148_v62 = vld [vmem:[%s4739_s11 + $0x8] sm:$0x1e]  ;;  %6566 = vst [vmem:[#allocation62_spill] sm:$0xff] %v4916_v58 }
  0x73   : > { %745 = vmatpush1.bf16.msra.mxu0 %v4867_v44  ;;  %v4926_v44 = vld [vmem:[%s6433_s2 + $0xd4] ss:$8 sps:$4 sm:$0xff]  }
  0x74   : > { %1127 = vmatpush1.bf16.msra.mxu1 %v4872_v60  ;;  %746 = vmatprep.subr.bf16.mxu0 %v4877_v63  ;;  %6568 = vst [vmem:[#allocation64_spill] sm:$0xff] %v4926_v44  ;;  %v1150_v63 = vpack.c.bf16 %v1148_v62, %v1148_v62  ;;  %v4942_v60 = vld [vmem:[%s6433_s2 + $0xd0] ss:$8 sps:$4 sm:$0xff]   ;;  %v4954_v62 = vld [vmem:[%s6433_s2 + $0xe4] ss:$8 sps:$4 sm:$0xff]  }
  0x75   : > { %1128 = vmatprep.subr.bf16.mxu1 %v4882_v47  ;;  %v4931_v47 = vld [vmem:[%s6434_s3 + $0xd4] ss:$8 sps:$4 sm:$0xff]  }
  0x76   : > { %6569 = vst [vmem:[#allocation65_spill] sm:$0xff] %v4931_v47 }
  0x77   : > { %747 = vmatpush1.bf16.msra.mxu0 %v4891_v57  ;;  %v4947_v57 = vld [vmem:[%s6434_s3 + $0xd0] ss:$8 sps:$4 sm:$0xff]  }
  0x78   : > { %1129 = vmatpush1.bf16.msra.mxu1 %v4896_v61  ;;  %748 = vmatprep.subr.bf16.mxu0 %v4901_v59  ;;  %6570 = vst [vmem:[#allocation66_spill] sm:$0xff] %v4947_v57  ;;  %v1159_v59 = vshrl.u32 %v1150_v63, 16 }
  0x79   : > { %1130 = vmatprep.subr.bf16.mxu1 %v4906_v56  ;;  %v1161_v56 = vshll.u32 %v1150_v63, 16  ;;  %v6620_v63 = vld [vmem:[#allocation52_spill] sm:$0xff] }
  0x7b   : > { %749 = vmatpush1.bf16.msra.mxu0 %v4916_v58  ;;  %v4964_v58 = vld [vmem:[%s6433_s2 + $0xe0] ss:$8 sps:$4 sm:$0xff]   ;;  %v1163_v61 = vrot.slane %v1161_v56, 1 }
  0x7c   : > { %1131 = vmatpush1.bf16.msra.mxu1 %v4921_v55  ;;  %750 = vmatprep.subr.bf16.mxu0 %v4926_v44  ;;  %v4959_v55 = vld [vmem:[%s6434_s3 + $0xe4] ss:$8 sps:$4 sm:$0xff]   ;;  %v306_v44 = vld [vmem:[%s4739_s11] sm:$0xf] }
  0x7d   : > { %1132 = vmatprep.subr.bf16.mxu1 %v4931_v47  ;;  %v4971_v47 = vld [vmem:[%s6434_s3 + $0xe0] ss:$8 sps:$4 sm:$0xff]   ;;  %v308_v54 = vpack.c.bf16 %v306_v44, %v306_v44  ;;  %v6621_v44 = vld [vmem:[#allocation53_spill] sm:$0xff] }
  0x7e   : > { %v6618_v56 = vld [vmem:[#allocation50_spill] sm:$0xff] }
  0x7f   : > { %751 = vmatpush1.bf16.msra.mxu0 %v4942_v60 }
  0x80   : > { %1133 = vmatpush1.bf16.msra.mxu1 %v4947_v57  ;;  %752 = vmatprep.subr.bf16.mxu0 %v4954_v62  ;;  %v4980_v57 = vor.u32 %v1163_v61, %v1159_v59  ;;  %v6619_v61 = vld [vmem:[#allocation51_spill] sm:$0xff]  ;;  %v6622_v59 = vld [vmem:[#allocation54_spill] sm:$0xff] }
  0x81   : > { %1134 = vmatprep.subr.bf16.mxu1 %v4959_v55 }
  0x83   : > { %753 = vmatpush1.bf16.msra.mxu0 %v4964_v58 }
  0x84   : > { %1135 = vmatpush1.bf16.msra.mxu1 %v4971_v47  ;;  %1169 = vmatprep.subr.bf16.mxu0 %v4223_v0  ;;  %v1147_v0 = vld [vmem:[%s4739_s11] sm:$0x1e] }
  0x85   : > { %1251 = vmatprep.subr.bf16.mxu1 %v4228_v1  ;;  %v1149_v1 = vpack.c.bf16 %v1147_v0, %v1147_v0  ;;  %v6623_v0 = vld [vmem:[#allocation55_spill] sm:$0xff] }
  0x86   : > { %757 = vmatmul.mubr.bf16.vlgmr.msra.gmra.mrb[0].mxu0 %v308_v54 }
  0x87   : > { %1139 = vmatmul.mubr.bf16.vlgmr.msra.gmra.mrb[0].mxu1 %v308_v54  ;;  %1170 = vmatpush1.bf16.msra.mxu0 %v4234_v2  ;;  %v1154_v2 = vshll.u32 %v1149_v1, 16  ;;  %v6617_v54 = vld [vmem:[#allocation49_spill] sm:$0xff] }
  0x88   : > { %1252 = vmatpush1.bf16.msra.mxu1 %v4239_v3  ;;  %1171 = vmatprep.subr.bf16.mxu0 %v4245_v4  ;;  %v6571_v3 = vld [vmem:[#allocation3_spill] sm:$0xff]  ;;  %v6572_v4 = vld [vmem:[#allocation4_spill] sm:$0xff] }
  0x89   : > { %1253 = vmatprep.subr.bf16.mxu1 %v4252_v5  ;;  %3271 = vmatprep.mubr.msk.bf16.mxu0 %vm526_vm0, %v4980_v57  ;;  %v1152_v5 = vshrl.u32 %v1149_v1, 16  ;;  %v6624_v1 = vld [vmem:[#allocation56_spill] sm:$0xff] }
  0x8a   : > { %3273 = vmatprep.mubr.msk.bf16.mxu1 %vm526_vm0, %v4980_v57 }
  0x8b   : > { %1172 = vmatpush1.bf16.msra.mxu0 %v4257_v6  ;;  %v1156_v6 = vrot.slane %v1154_v2, 1  ;;  %v6625_v2 = vld [vmem:[#allocation57_spill] sm:$0xff] }
  0x8c   : > { %1254 = vmatpush1.bf16.msra.mxu1 %v4263_v7  ;;  %1173 = vmatprep.subr.bf16.mxu0 %v4269_v8  ;;  %v6573_v7 = vld [vmem:[#allocation5_spill] sm:$0xff]  ;;  %v6574_v8 = vld [vmem:[#allocation6_spill] sm:$0xff] }
  0x8d   : > { %1255 = vmatprep.subr.bf16.mxu1 %v4274_v9  ;;  %v6575_v9 = vld [vmem:[#allocation7_spill] sm:$0xff] }
  0x8f   : > { %1174 = vmatpush1.bf16.msra.mxu0 %v4279_v10  ;;  %v6576_v10 = vld [vmem:[#allocation8_spill] sm:$0xff] }
  0x90   : > { %1256 = vmatpush1.bf16.msra.mxu1 %v4284_v11  ;;  %1175 = vmatprep.subr.bf16.mxu0 %v4291_v12  ;;  %v5043_v11 = vor.u32 %v1156_v6, %v1152_v5  ;;  %v6577_v12 = vld [vmem:[#allocation9_spill] sm:$0xff]  ;;  %v6628_v5 = vld [vmem:[#allocation60_spill] sm:$0xff] }
  0x91   : > { %1257 = vmatprep.subr.bf16.mxu1 %v4298_v13  ;;  %v6578_v13 = vld [vmem:[#allocation10_spill] sm:$0xff]  ;;  %v6629_v6 = vld [vmem:[#allocation61_spill] sm:$0xff] }
  0x93   : > { %1176 = vmatpush1.bf16.msra.mxu0 %v4303_v14  ;;  %v6579_v14 = vld [vmem:[#allocation11_spill] sm:$0xff] }
  0x94   : > { %1258 = vmatpush1.bf16.msra.mxu1 %v4310_v15  ;;  %1177 = vmatprep.subr.bf16.mxu0 %v4315_v16  ;;  %v6580_v15 = vld [vmem:[#allocation12_spill] sm:$0xff]  ;;  %v6581_v16 = vld [vmem:[#allocation14_spill] sm:$0xff] }
  0x95   : > { %1259 = vmatprep.subr.bf16.mxu1 %v4322_v17  ;;  %v6582_v17 = vld [vmem:[#allocation15_spill] sm:$0xff] }
  0x97   : > { %1178 = vmatpush1.bf16.msra.mxu0 %v4327_v18  ;;  %v6583_v18 = vld [vmem:[#allocation16_spill] sm:$0xff] }
  0x98   : > { %1260 = vmatpush1.bf16.msra.mxu1 %v4332_v19  ;;  %1179 = vmatprep.subr.bf16.mxu0 %v4339_v20  ;;  %v6584_v19 = vld [vmem:[#allocation17_spill] sm:$0xff]  ;;  %v6585_v20 = vld [vmem:[#allocation2_spill] sm:$0xff] }
  0x99   : > { %1261 = vmatprep.subr.bf16.mxu1 %v4346_v21  ;;  %v6586_v21 = vld [vmem:[#allocation18_spill] sm:$0xff] }
  0x9b   : > { %1180 = vmatpush1.bf16.msra.mxu0 %v4351_v22  ;;  %v6587_v22 = vld [vmem:[#allocation19_spill] sm:$0xff] }
  0x9c   : > { %1262 = vmatpush1.bf16.msra.mxu1 %v4358_v23  ;;  %1181 = vmatprep.subr.bf16.mxu0 %v4363_v24  ;;  %v6588_v23 = vld [vmem:[#allocation20_spill] sm:$0xff]  ;;  %v6589_v24 = vld [vmem:[#allocation21_spill] sm:$0xff] }
  0x9d   : > { %1263 = vmatprep.subr.bf16.mxu1 %v4370_v25  ;;  %v6590_v25 = vld [vmem:[#allocation22_spill] sm:$0xff] }
  0x9f   : > { %1182 = vmatpush1.bf16.msra.mxu0 %v4375_v26  ;;  %v6591_v26 = vld [vmem:[#allocation23_spill] sm:$0xff] }
  0xa0   : > { %1264 = vmatpush1.bf16.msra.mxu1 %v4380_v27  ;;  %1183 = vmatprep.subr.bf16.mxu0 %v4387_v28  ;;  %v6592_v27 = vld [vmem:[#allocation24_spill] sm:$0xff]  ;;  %v6593_v28 = vld [vmem:[#allocation25_spill] sm:$0xff] }
  0xa1   : > { %1265 = vmatprep.subr.bf16.mxu1 %v4394_v29  ;;  %v6594_v29 = vld [vmem:[#allocation26_spill] sm:$0xff] }
  0xa3   : > { %1184 = vmatpush1.bf16.msra.mxu0 %v4401_v30  ;;  %v6595_v30 = vld [vmem:[#allocation27_spill] sm:$0xff] }
  0xa4   : > { %1266 = vmatpush1.bf16.msra.mxu1 %v4408_v31  ;;  %1185 = vmatprep.subr.bf16.mxu0 %v4413_v32  ;;  %v6596_v31 = vld [vmem:[#allocation28_spill] sm:$0xff]  ;;  %v6597_v32 = vld [vmem:[#allocation29_spill] sm:$0xff] }
  0xa5   : > { %1267 = vmatprep.subr.bf16.mxu1 %v4420_v33  ;;  %v6598_v33 = vld [vmem:[#allocation30_spill] sm:$0xff] }
  0xa7   : > { %1186 = vmatpush1.bf16.msra.mxu0 %v4429_v34  ;;  %v6599_v34 = vld [vmem:[#allocation31_spill] sm:$0xff] }
  0xa8   : > { %1268 = vmatpush1.bf16.msra.mxu1 %v4434_v35  ;;  %1187 = vmatprep.subr.bf16.mxu0 %v4441_v36  ;;  %v6600_v35 = vld [vmem:[#allocation32_spill] sm:$0xff]  ;;  %v6601_v36 = vld [vmem:[#allocation33_spill] sm:$0xff] }
  0xa9   : > { %1269 = vmatprep.subr.bf16.mxu1 %v4448_v37  ;;  %v6602_v37 = vld [vmem:[#allocation34_spill] sm:$0xff] }
  0xab   : > { %1188 = vmatpush1.bf16.msra.mxu0 %v4454_v38  ;;  %v6603_v38 = vld [vmem:[#allocation35_spill] sm:$0xff] }
  0xac   : > { %1270 = vmatpush1.bf16.msra.mxu1 %v4461_v39  ;;  %1189 = vmatprep.subr.bf16.mxu0 %v4466_v40  ;;  %v6604_v39 = vld [vmem:[#allocation36_spill] sm:$0xff]  ;;  %v6605_v40 = vld [vmem:[#allocation37_spill] sm:$0xff] }
  0xad   : > { %1271 = vmatprep.subr.bf16.mxu1 %v4473_v41  ;;  %v6606_v41 = vld [vmem:[#allocation38_spill] sm:$0xff] }
  0xaf   : > { %1190 = vmatpush1.bf16.msra.mxu0 %v4485_v42  ;;  %v6607_v42 = vld [vmem:[#allocation39_spill] sm:$0xff] }
  0xb0   : > { %1272 = vmatpush1.bf16.msra.mxu1 %v4490_v43  ;;  %1191 = vmatprep.subr.bf16.mxu0 %v4500_v45  ;;  %v6608_v43 = vld [vmem:[#allocation40_spill] sm:$0xff]  ;;  %v6609_v45 = vld [vmem:[#allocation41_spill] sm:$0xff] }
  0xb1   : > { %1273 = vmatprep.subr.bf16.mxu1 %v4505_v46  ;;  %v6610_v46 = vld [vmem:[#allocation42_spill] sm:$0xff] }
  0xb3   : > { %1192 = vmatpush1.bf16.msra.mxu0 %v4518_v48  ;;  %v6611_v48 = vld [vmem:[#allocation43_spill] sm:$0xff] }
  0xb4   : > { %1274 = vmatpush1.bf16.msra.mxu1 %v4523_v49  ;;  %1193 = vmatprep.subr.bf16.mxu0 %v4530_v50  ;;  %v6612_v49 = vld [vmem:[#allocation44_spill] sm:$0xff]  ;;  %v6613_v50 = vld [vmem:[#allocation45_spill] sm:$0xff] }
  0xb5   : > { %1275 = vmatprep.subr.bf16.mxu1 %v4535_v51  ;;  %v6614_v51 = vld [vmem:[#allocation46_spill] sm:$0xff] }
  0xb7   : > { %1194 = vmatpush1.bf16.msra.mxu0 %v4542_v52  ;;  %v6615_v52 = vld [vmem:[#allocation47_spill] sm:$0xff] }
  0xb8   : > { %1276 = vmatpush1.bf16.msra.mxu1 %v4547_v53  ;;  %1195 = vmatprep.subr.bf16.mxu0 %v6571_v3  ;;  %v6616_v53 = vld [vmem:[#allocation48_spill] sm:$0xff]  ;;  %v6626_v3 = vld [vmem:[#allocation58_spill] sm:$0xff] }
  0xb9   : > { %1277 = vmatprep.subr.bf16.mxu1 %v6572_v4  ;;  %v6627_v4 = vld [vmem:[#allocation59_spill] sm:$0xff] }
  0xbb   : > { %1196 = vmatpush1.bf16.msra.mxu0 %v6573_v7  ;;  %v6630_v7 = vld [vmem:[#allocation62_spill] sm:$0xff] }
  0xbc   : > { %1278 = vmatpush1.bf16.msra.mxu1 %v6574_v8  ;;  %1197 = vmatprep.subr.bf16.mxu0 %v6575_v9  ;;  %v6631_v8 = vld [vmem:[#allocation63_spill] sm:$0xff]  ;;  %v6632_v9 = vld [vmem:[#allocation64_spill] sm:$0xff] }
  0xbd   : > { %1279 = vmatprep.subr.bf16.mxu1 %v6576_v10  ;;  %v6633_v10 = vld [vmem:[#allocation65_spill] sm:$0xff] }
  0xbf   : > { %1198 = vmatpush1.bf16.msra.mxu0 %v6577_v12  ;;  %v6634_v12 = vld [vmem:[#allocation66_spill] sm:$0xff] }
  0xc0   : > { %1280 = vmatpush1.bf16.msra.mxu1 %v6578_v13  ;;  %1210 = vmatprep.subr.bf16.mxu0 %v6579_v14  ;;  %v5114_v13 = vld [vmem:[%s6433_s2 + $0x1e4] ss:$8 sps:$4 sm:$0xff]  }
  0xc1   : > { %1292 = vmatprep.subr.bf16.mxu1 %v6580_v15  ;;  %v5119_v14 = vld [vmem:[%s6434_s3 + $0x1e4] ss:$8 sps:$4 sm:$0xff]   ;;  %v5152_v15 = vld [vmem:[%s6433_s2 + $0x1f0] ss:$8 sps:$4 sm:$0xff]  }
  0xc2   : > { %1202 = vmatmul.mubr.bf16.vlgmr.msra.gmra.mrb[4].mxu0 %v5043_v11 }
  0xc3   : > { %1284 = vmatmul.mubr.bf16.vlgmr.msra.gmra.mrb[4].mxu1 %v5043_v11  ;;  %1211 = vmatpush1.bf16.msra.mxu0 %v6581_v16  ;;  %v5157_v16 = vld [vmem:[%s6434_s3 + $0x1f0] ss:$8 sps:$4 sm:$0xff]  }
  0xc4   : > { %1293 = vmatpush1.bf16.msra.mxu1 %v6582_v17  ;;  %1212 = vmatprep.subr.bf16.mxu0 %v6583_v18  ;;  %v5164_v17 = vld [vmem:[%s6433_s2 + $0x204] ss:$8 sps:$4 sm:$0xff]  }
  0xc5   : > { %1294 = vmatprep.subr.bf16.mxu1 %v6584_v19  ;;  %3272 = vmatprep.mubr.msk.bf16.mxu0 %vm526_vm0, %v6585_v20  ;;  %v5169_v18 = vld [vmem:[%s6434_s3 + $0x204] ss:$8 sps:$4 sm:$0xff]   ;;  %v5180_v19 = vld [vmem:[%s6433_s2 + $0x200] ss:$8 sps:$4 sm:$0xff]  }
  0xc6   : > { %3274 = vmatprep.mubr.msk.bf16.mxu1 %vm526_vm0, %v6585_v20  ;;  %v5185_v20 = vld [vmem:[%s6434_s3 + $0x200] ss:$8 sps:$4 sm:$0xff]  }
  0xc7   : > { %1213 = vmatpush1.bf16.msra.mxu0 %v6586_v21  ;;  %v5197_v21 = vld [vmem:[%s6434_s3 + $0x214] ss:$8 sps:$4 sm:$0xff]  }
  0xc8   : > { %1295 = vmatpush1.bf16.msra.mxu1 %v6587_v22  ;;  %1214 = vmatprep.subr.bf16.mxu0 %v6588_v23  ;;  %v5204_v22 = vld [vmem:[%s6433_s2 + $0x210] ss:$8 sps:$4 sm:$0xff]  }
  0xc9   : > { %1296 = vmatprep.subr.bf16.mxu1 %v6589_v24  ;;  %v5209_v23 = vld [vmem:[%s6434_s3 + $0x210] ss:$8 sps:$4 sm:$0xff]   ;;  %v5216_v24 = vld [vmem:[%s6433_s2 + $0x224] ss:$8 sps:$4 sm:$0xff]  }
  0xcb   : > { %1215 = vmatpush1.bf16.msra.mxu0 %v6590_v25  ;;  %v5221_v25 = vld [vmem:[%s6434_s3 + $0x224] ss:$8 sps:$4 sm:$0xff]  }
  0xcc   : > { %1297 = vmatpush1.bf16.msra.mxu1 %v6591_v26  ;;  %1216 = vmatprep.subr.bf16.mxu0 %v6592_v27  ;;  %v5228_v26 = vld [vmem:[%s6433_s2 + $0x220] ss:$8 sps:$4 sm:$0xff]  }
  0xcd   : > { %1298 = vmatprep.subr.bf16.mxu1 %v6593_v28  ;;  %v5233_v27 = vld [vmem:[%s6434_s3 + $0x220] ss:$8 sps:$4 sm:$0xff]   ;;  %v5240_v28 = vld [vmem:[%s6433_s2 + $0x234] ss:$8 sps:$4 sm:$0xff]  }
  0xcf   : > { %1217 = vmatpush1.bf16.msra.mxu0 %v6594_v29  ;;  %v5245_v29 = vld [vmem:[%s6434_s3 + $0x234] ss:$8 sps:$4 sm:$0xff]  }
  0xd0   : > { %1299 = vmatpush1.bf16.msra.mxu1 %v6595_v30  ;;  %1218 = vmatprep.subr.bf16.mxu0 %v6596_v31  ;;  %v5252_v30 = vld [vmem:[%s6433_s2 + $0x230] ss:$8 sps:$4 sm:$0xff]  }
  0xd1   : > { %1300 = vmatprep.subr.bf16.mxu1 %v6597_v32  ;;  %v5257_v31 = vld [vmem:[%s6434_s3 + $0x230] ss:$8 sps:$4 sm:$0xff]   ;;  %v5264_v32 = vld [vmem:[%s6433_s2 + $0x244] ss:$8 sps:$4 sm:$0xff]  }
  0xd3   : > { %1219 = vmatpush1.bf16.msra.mxu0 %v6598_v33  ;;  %v5269_v33 = vld [vmem:[%s6434_s3 + $0x244] ss:$8 sps:$4 sm:$0xff]  }
  0xd4   : > { %1301 = vmatpush1.bf16.msra.mxu1 %v6599_v34  ;;  %1220 = vmatprep.subr.bf16.mxu0 %v6600_v35  ;;  %v5276_v34 = vld [vmem:[%s6433_s2 + $0x240] ss:$8 sps:$4 sm:$0xff]  }
  0xd5   : > { %1302 = vmatprep.subr.bf16.mxu1 %v6601_v36  ;;  %v5281_v35 = vld [vmem:[%s6434_s3 + $0x240] ss:$8 sps:$4 sm:$0xff]   ;;  %v5288_v36 = vld [vmem:[%s6433_s2 + $0x254] ss:$8 sps:$4 sm:$0xff]  }
  0xd7   : > { %1221 = vmatpush1.bf16.msra.mxu0 %v6602_v37  ;;  %v5293_v37 = vld [vmem:[%s6434_s3 + $0x254] ss:$8 sps:$4 sm:$0xff]  }
  0xd8   : > { %1303 = vmatpush1.bf16.msra.mxu1 %v6603_v38  ;;  %1222 = vmatprep.subr.bf16.mxu0 %v6604_v39  ;;  %v5300_v38 = vld [vmem:[%s6433_s2 + $0x250] ss:$8 sps:$4 sm:$0xff]  }
  0xd9   : > { %1304 = vmatprep.subr.bf16.mxu1 %v6605_v40  ;;  %v5305_v39 = vld [vmem:[%s6434_s3 + $0x250] ss:$8 sps:$4 sm:$0xff]   ;;  %v5312_v40 = vld [vmem:[%s6433_s2 + $0x264] ss:$8 sps:$4 sm:$0xff]  }
  0xdb   : > { %1223 = vmatpush1.bf16.msra.mxu0 %v6606_v41  ;;  %v5317_v41 = vld [vmem:[%s6434_s3 + $0x264] ss:$8 sps:$4 sm:$0xff]  }
  0xdc   : > { %1305 = vmatpush1.bf16.msra.mxu1 %v6607_v42  ;;  %1224 = vmatprep.subr.bf16.mxu0 %v6608_v43  ;;  %v5324_v42 = vld [vmem:[%s6433_s2 + $0x260] ss:$8 sps:$4 sm:$0xff]  }
  0xdd   : > { %1306 = vmatprep.subr.bf16.mxu1 %v6609_v45  ;;  %v5329_v43 = vld [vmem:[%s6434_s3 + $0x260] ss:$8 sps:$4 sm:$0xff]   ;;  %v5336_v45 = vld [vmem:[%s6433_s2 + $0x274] ss:$8 sps:$4 sm:$0xff]  }
  0xdf   : > { %1225 = vmatpush1.bf16.msra.mxu0 %v6610_v46  ;;  %v5341_v46 = vld [vmem:[%s6434_s3 + $0x274] ss:$8 sps:$4 sm:$0xff]  }
  0xe0   : > { %1307 = vmatpush1.bf16.msra.mxu1 %v6611_v48  ;;  %1226 = vmatprep.subr.bf16.mxu0 %v6612_v49  ;;  %v5348_v48 = vld [vmem:[%s6433_s2 + $0x270] ss:$8 sps:$4 sm:$0xff]  }
  0xe1   : > { %1308 = vmatprep.subr.bf16.mxu1 %v6613_v50  ;;  %v5353_v49 = vld [vmem:[%s6434_s3 + $0x270] ss:$8 sps:$4 sm:$0xff]   ;;  %v5360_v50 = vld [vmem:[%s6433_s2 + $0x284] ss:$8 sps:$4 sm:$0xff]  }
  0xe3   : > { %1227 = vmatpush1.bf16.msra.mxu0 %v6614_v51  ;;  %v5365_v51 = vld [vmem:[%s6434_s3 + $0x284] ss:$8 sps:$4 sm:$0xff]  }
  0xe4   : > { %1309 = vmatpush1.bf16.msra.mxu1 %v6615_v52  ;;  %1228 = vmatprep.subr.bf16.mxu0 %v6616_v53  ;;  %v5372_v52 = vld [vmem:[%s6433_s2 + $0x280] ss:$8 sps:$4 sm:$0xff]  }
  0xe5   : > { %1310 = vmatprep.subr.bf16.mxu1 %v6617_v54  ;;  %v5377_v53 = vld [vmem:[%s6434_s3 + $0x280] ss:$8 sps:$4 sm:$0xff]   ;;  %v5384_v54 = vld [vmem:[%s6433_s2 + $0x294] ss:$8 sps:$4 sm:$0xff]  }
  0xe7   : > { %1229 = vmatpush1.bf16.msra.mxu0 %v6618_v56  ;;  %v5389_v56 = vld [vmem:[%s6434_s3 + $0x294] ss:$8 sps:$4 sm:$0xff]  }
  0xe8   : > { %1311 = vmatpush1.bf16.msra.mxu1 %v6619_v61  ;;  %1230 = vmatprep.subr.bf16.mxu0 %v6620_v63  ;;  %v5396_v61 = vld [vmem:[%s6433_s2 + $0x290] ss:$8 sps:$4 sm:$0xff]  }
  0xe9   : > { %1312 = vmatprep.subr.bf16.mxu1 %v6621_v44  ;;  %v5401_v63 = vld [vmem:[%s6434_s3 + $0x290] ss:$8 sps:$4 sm:$0xff]   ;;  %v5408_v44 = vld [vmem:[%s6433_s2 + $0x2a4] ss:$8 sps:$4 sm:$0xff]  }
  0xeb   : > { %1231 = vmatpush1.bf16.msra.mxu0 %v6622_v59  ;;  %v5413_v59 = vld [vmem:[%s6434_s3 + $0x2a4] ss:$8 sps:$4 sm:$0xff]  }
  0xec   : > { %1313 = vmatpush1.bf16.msra.mxu1 %v6623_v0  ;;  %1232 = vmatprep.subr.bf16.mxu0 %v6624_v1  ;;  %v1782_v0 = vld [vmem:[%s4480_s13 + $0x8] sm:$0x1e] }
  0xed   : > { %1314 = vmatprep.subr.bf16.mxu1 %v6625_v2  ;;  %v5421_v1 = vld [vmem:[%s6433_s2 + $0x2a0] ss:$8 sps:$4 sm:$0xff]  }
  0xee   : > { %v5426_v2 = vld [vmem:[%s6434_s3 + $0x2a0] ss:$8 sps:$4 sm:$0xff]  }
  0xef   : > { %1233 = vmatpush1.bf16.msra.mxu0 %v6626_v3  ;;  %v5433_v3 = vld [vmem:[%s6433_s2 + $0x2b4] ss:$8 sps:$4 sm:$0xff]  }
  0xf0   : > { %1315 = vmatpush1.bf16.msra.mxu1 %v6627_v4  ;;  %1234 = vmatprep.subr.bf16.mxu0 %v6628_v5  ;;  %v5438_v4 = vld [vmem:[%s6434_s3 + $0x2b4] ss:$8 sps:$4 sm:$0xff]   ;;  %v1784_v5 = vpack.c.bf16 %v1782_v0, %v1782_v0 }
  0xf1   : > { %1316 = vmatprep.subr.bf16.mxu1 %v6629_v6  ;;  %6636 = vst [vmem:[#allocation3_spill] sm:$0xff] %v5438_v4  ;;  %v5445_v6 = vld [vmem:[%s6433_s2 + $0x2b0] ss:$8 sps:$4 sm:$0xff]  }
  0xf2   : > { %v1793_v0 = vshrl.u32 %v1784_v5, 16 }
  0xf3   : > { %1235 = vmatpush1.bf16.msra.mxu0 %v6630_v7  ;;  %v5450_v7 = vld [vmem:[%s6434_s3 + $0x2b0] ss:$8 sps:$4 sm:$0xff]  }
  0xf4   : > { %1317 = vmatpush1.bf16.msra.mxu1 %v6631_v8  ;;  %1236 = vmatprep.subr.bf16.mxu0 %v6632_v9  ;;  %6637 = vst [vmem:[#allocation4_spill] sm:$0xff] %v5450_v7  ;;  %v5457_v8 = vld [vmem:[%s6433_s2 + $0x2c4] ss:$8 sps:$4 sm:$0xff]  }
  0xf5   : > { %1318 = vmatprep.subr.bf16.mxu1 %v6633_v10  ;;  %v5462_v9 = vld [vmem:[%s6434_s3 + $0x2c4] ss:$8 sps:$4 sm:$0xff]   ;;  %v1795_v10 = vshll.u32 %v1784_v5, 16  ;;  %v5839_v5 = vld [vmem:[%s6434_s3 + $0x380] ss:$8 sps:$4 sm:$0xff]  }
  0xf7   : > { %1237 = vmatpush1.bf16.msra.mxu0 %v4942_v60  ;;  %v5126_v60 = vld [vmem:[%s6433_s2 + $0x1e0] ss:$8 sps:$4 sm:$0xff]  }
  0xf8   : > { %1319 = vmatpush1.bf16.msra.mxu1 %v6634_v12  ;;  %1238 = vmatprep.subr.bf16.mxu0 %v4954_v62  ;;  %v6635_v62 = vld [vmem:[#allocation13_spill] sm:$0xff]  ;;  %v5469_v12 = vld [vmem:[%s6433_s2 + $0x2c0] ss:$8 sps:$4 sm:$0xff]  }
  0xf9   : > { %1320 = vmatprep.subr.bf16.mxu1 %v4959_v55  ;;  %v5131_v55 = vld [vmem:[%s6434_s3 + $0x1e0] ss:$8 sps:$4 sm:$0xff]  }
  0xfb   : > { %1239 = vmatpush1.bf16.msra.mxu0 %v4964_v58  ;;  %v5138_v58 = vld [vmem:[%s6433_s2 + $0x1f4] ss:$8 sps:$4 sm:$0xff]  }
  0xfc   : > { %1321 = vmatpush1.bf16.msra.mxu1 %v4971_v47  ;;  %1545 = vmatprep.subr.bf16.mxu0 %v5114_v13  ;;  %v5143_v47 = vld [vmem:[%s6434_s3 + $0x1f4] ss:$8 sps:$4 sm:$0xff]  }
  0xfd   : > { %1738 = vmatprep.subr.bf16.mxu1 %v5119_v14 }
  0xfe   : > { %1243 = vmatmul.mubr.bf16.vlgmr.msra.gmra.mrb[4].mxu0 %v6635_v62 }
  0xff   : > { %1325 = vmatmul.mubr.bf16.vlgmr.msra.gmra.mrb[4].mxu1 %v6635_v62  ;;  %1546 = vmatpush1.bf16.msra.mxu0 %v5126_v60  ;;  %v5474_v62 = vld [vmem:[%s6434_s3 + $0x2c0] ss:$8 sps:$4 sm:$0xff]  }
 0x100   : > { %1739 = vmatpush1.bf16.msra.mxu1 %v5131_v55  ;;  %1547 = vmatprep.subr.bf16.mxu0 %v5138_v58 }
 0x101   : > { %1740 = vmatprep.subr.bf16.mxu1 %v5143_v47  ;;  %3365 = vmatprep.mubr.msk.bf16.mxu0 %vm526_vm0, %v4980_v57 }
 0x102   : > { %3396 = vmatprep.mubr.msk.bf16.mxu1 %vm526_vm0, %v4980_v57  ;;  %v5192_v57 = vld [vmem:[%s6433_s2 + $0x214] ss:$8 sps:$4 sm:$0xff]  }
 0x103   : > { %1548 = vmatpush1.bf16.msra.mxu0 %v5152_v15 }
 0x104   : > { %1741 = vmatpush1.bf16.msra.mxu1 %v5157_v16  ;;  %1549 = vmatprep.subr.bf16.mxu0 %v5164_v17 }
 0x105   : > { %1742 = vmatprep.subr.bf16.mxu1 %v5169_v18 }
 0x107   : > { %1550 = vmatpush1.bf16.msra.mxu0 %v5180_v19 }
 0x108   : > { %1743 = vmatpush1.bf16.msra.mxu1 %v5185_v20  ;;  %1551 = vmatprep.subr.bf16.mxu0 %v5192_v57 }
 0x109   : > { %1744 = vmatprep.subr.bf16.mxu1 %v5197_v21 }
 0x10b   : > { %1552 = vmatpush1.bf16.msra.mxu0 %v5204_v22 }
 0x10c   : > { %1745 = vmatpush1.bf16.msra.mxu1 %v5209_v23  ;;  %1553 = vmatprep.subr.bf16.mxu0 %v5216_v24 }
 0x10d   : > { %1746 = vmatprep.subr.bf16.mxu1 %v5221_v25 }
 0x10f   : > { %1554 = vmatpush1.bf16.msra.mxu0 %v5228_v26 }
 0x110   : > { %1747 = vmatpush1.bf16.msra.mxu1 %v5233_v27  ;;  %1555 = vmatprep.subr.bf16.mxu0 %v5240_v28 }
 0x111   : > { %1748 = vmatprep.subr.bf16.mxu1 %v5245_v29 }
 0x113   : > { %1556 = vmatpush1.bf16.msra.mxu0 %v5252_v30 }
 0x114   : > { %1749 = vmatpush1.bf16.msra.mxu1 %v5257_v31  ;;  %1557 = vmatprep.subr.bf16.mxu0 %v5264_v32 }
 0x115   : > { %1750 = vmatprep.subr.bf16.mxu1 %v5269_v33 }
 0x117   : > { %1558 = vmatpush1.bf16.msra.mxu0 %v5276_v34 }
 0x118   : > { %1751 = vmatpush1.bf16.msra.mxu1 %v5281_v35  ;;  %1559 = vmatprep.subr.bf16.mxu0 %v5288_v36 }
 0x119   : > { %1752 = vmatprep.subr.bf16.mxu1 %v5293_v37 }
 0x11b   : > { %1560 = vmatpush1.bf16.msra.mxu0 %v5300_v38 }
 0x11c   : > { %1753 = vmatpush1.bf16.msra.mxu1 %v5305_v39  ;;  %1561 = vmatprep.subr.bf16.mxu0 %v5312_v40 }
 0x11d   : > { %1754 = vmatprep.subr.bf16.mxu1 %v5317_v41 }
 0x11f   : > { %1562 = vmatpush1.bf16.msra.mxu0 %v5324_v42 }
 0x120   : > { %1755 = vmatpush1.bf16.msra.mxu1 %v5329_v43  ;;  %1563 = vmatprep.subr.bf16.mxu0 %v5336_v45 }
 0x121   : > { %1756 = vmatprep.subr.bf16.mxu1 %v5341_v46 }
 0x123   : > { %1564 = vmatpush1.bf16.msra.mxu0 %v5348_v48 }
 0x124   : > { %1757 = vmatpush1.bf16.msra.mxu1 %v5353_v49  ;;  %1565 = vmatprep.subr.bf16.mxu0 %v5360_v50 }
 0x125   : > { %1758 = vmatprep.subr.bf16.mxu1 %v5365_v51 }
 0x127   : > { %1566 = vmatpush1.bf16.msra.mxu0 %v5372_v52 }
 0x128   : > { %1759 = vmatpush1.bf16.msra.mxu1 %v5377_v53  ;;  %1567 = vmatprep.subr.bf16.mxu0 %v5384_v54 }
 0x129   : > { %1760 = vmatprep.subr.bf16.mxu1 %v5389_v56 }
 0x12b   : > { %1568 = vmatpush1.bf16.msra.mxu0 %v5396_v61 }
 0x12c   : > { %1761 = vmatpush1.bf16.msra.mxu1 %v5401_v63  ;;  %1569 = vmatprep.subr.bf16.mxu0 %v5408_v44 }
 0x12d   : > { %1762 = vmatprep.subr.bf16.mxu1 %v5413_v59 }
 0x12f   : > { %1570 = vmatpush1.bf16.msra.mxu0 %v5421_v1 }
 0x130   : > { %1763 = vmatpush1.bf16.msra.mxu1 %v5426_v2  ;;  %1571 = vmatprep.subr.bf16.mxu0 %v5433_v3 }
 0x131   : > { %1764 = vmatprep.subr.bf16.mxu1 %v5438_v4  ;;  %v1797_v4 = vrot.slane %v1795_v10, 1  ;;  %v5870_v10 = vld [vmem:[%s6433_s2 + $0x3a4] ss:$8 sps:$4 sm:$0xff]  }
 0x133   : > { %1572 = vmatpush1.bf16.msra.mxu0 %v5445_v6 }
 0x134   : > { %1765 = vmatpush1.bf16.msra.mxu1 %v5450_v7  ;;  %1573 = vmatprep.subr.bf16.mxu0 %v5457_v8  ;;  %v5482_v7 = vor.u32 %v1797_v4, %v1793_v0  ;;  %v5834_v4 = vld [vmem:[%s6433_s2 + $0x380] ss:$8 sps:$4 sm:$0xff]  }
 0x135   : > { %1766 = vmatprep.subr.bf16.mxu1 %v5462_v9  ;;  %v5887_v0 = vld [vmem:[%s6434_s3 + $0x3a0] ss:$8 sps:$4 sm:$0xff]  }
 0x137   : > { %1574 = vmatpush1.bf16.msra.mxu0 %v5469_v12 }
 0x138   : > { %1767 = vmatpush1.bf16.msra.mxu1 %v5474_v62  ;;  %1803 = vmatprep.subr.bf16.mxu0 %v5114_v13 }
 0x139   : > { %1846 = vmatprep.subr.bf16.mxu1 %v5119_v14 }
 0x13a   : > { %1578 = vmatmul.mubr.bf16.vlgmr.msra.gmra.mrb[0].mxu0 %v5043_v11 }
 0x13b   : > { %1771 = vmatmul.mubr.bf16.vlgmr.msra.gmra.mrb[0].mxu1 %v5043_v11  ;;  %1804 = vmatpush1.bf16.msra.mxu0 %v5126_v60  ;;  %v1781_v11 = vld [vmem:[%s4480_s13] sm:$0x1e]  ;;  %v6638_v60 = vld [vmem:[#allocation3_spill] sm:$0xff] }
 0x13c   : > { %1847 = vmatpush1.bf16.msra.mxu1 %v5131_v55  ;;  %1805 = vmatprep.subr.bf16.mxu0 %v5138_v58  ;;  %v1783_v13 = vpack.c.bf16 %v1781_v11, %v1781_v11  ;;  %v5894_v11 = vld [vmem:[%s6433_s2 + $0x3b4] ss:$8 sps:$4 sm:$0xff]  }
 0x13d   : > { %1848 = vmatprep.subr.bf16.mxu1 %v5143_v47  ;;  %3397 = vmatprep.mubr.msk.bf16.mxu0 %vm526_vm0, %v5482_v7  ;;  %v6639_v47 = vld [vmem:[#allocation4_spill] sm:$0xff] }
 0x13e   : > { %3398 = vmatprep.mubr.msk.bf16.mxu1 %vm526_vm0, %v5482_v7  ;;  %v1788_v14 = vshll.u32 %v1783_v13, 16  ;;  %v1786_v55 = vshrl.u32 %v1783_v13, 16  ;;  %v5899_v13 = vld [vmem:[%s6434_s3 + $0x3b4] ss:$8 sps:$4 sm:$0xff]  }
 0x13f   : > { %1806 = vmatpush1.bf16.msra.mxu0 %v5152_v15  ;;  %v5550_v15 = vld [vmem:[%s6433_s2 + $0x2d4] ss:$8 sps:$4 sm:$0xff]  }
 0x140   : > { %1849 = vmatpush1.bf16.msra.mxu1 %v5157_v16  ;;  %1807 = vmatprep.subr.bf16.mxu0 %v5164_v17  ;;  %v1790_v58 = vrot.slane %v1788_v14, 1  ;;  %v5555_v16 = vld [vmem:[%s6434_s3 + $0x2d4] ss:$8 sps:$4 sm:$0xff]   ;;  %v2338_v14 = vld [vmem:[%s4739_s11 + $0x8] sm:$0x3c] }
 0x141   : > { %1850 = vmatprep.subr.bf16.mxu1 %v5169_v18  ;;  %v5564_v18 = vld [vmem:[%s6433_s2 + $0x2d0] ss:$8 sps:$4 sm:$0xff]  }
 0x142   : > { %v5557_v17 = vor.u32 %v1790_v58, %v1786_v55  ;;  %v5912_v55 = vld [vmem:[%s6434_s3 + $0x3b0] ss:$8 sps:$4 sm:$0xff]   ;;  %v2340_v58 = vpack.c.bf16 %v2338_v14, %v2338_v14  ;;  %v6332_v14 = vld [vmem:[%s6433_s2 + $0x4a4] ss:$8 sps:$4 sm:$0xff]  }
 0x143   : > { %1808 = vmatpush1.bf16.msra.mxu0 %v5180_v19  ;;  %v5569_v19 = vld [vmem:[%s6434_s3 + $0x2d0] ss:$8 sps:$4 sm:$0xff]  }
 0x144   : > { %1851 = vmatpush1.bf16.msra.mxu1 %v5185_v20  ;;  %1809 = vmatprep.subr.bf16.mxu0 %v5192_v57  ;;  %v5576_v20 = vld [vmem:[%s6433_s2 + $0x2e4] ss:$8 sps:$4 sm:$0xff]  }
 0x145   : > { %1852 = vmatprep.subr.bf16.mxu1 %v5197_v21  ;;  %v5581_v57 = vld [vmem:[%s6434_s3 + $0x2e4] ss:$8 sps:$4 sm:$0xff]   ;;  %v5590_v21 = vld [vmem:[%s6433_s2 + $0x2e0] ss:$8 sps:$4 sm:$0xff]  }
 0x147   : > { %1810 = vmatpush1.bf16.msra.mxu0 %v5204_v22  ;;  %v5595_v22 = vld [vmem:[%s6434_s3 + $0x2e0] ss:$8 sps:$4 sm:$0xff]  }
 0x148   : > { %1853 = vmatpush1.bf16.msra.mxu1 %v5209_v23  ;;  %1811 = vmatprep.subr.bf16.mxu0 %v5216_v24  ;;  %v5602_v23 = vld [vmem:[%s6433_s2 + $0x2f4] ss:$8 sps:$4 sm:$0xff]  }
 0x149   : > { %1854 = vmatprep.subr.bf16.mxu1 %v5221_v25  ;;  %v5607_v24 = vld [vmem:[%s6434_s3 + $0x2f4] ss:$8 sps:$4 sm:$0xff]   ;;  %v5618_v25 = vld [vmem:[%s6433_s2 + $0x2f0] ss:$8 sps:$4 sm:$0xff]  }
 0x14b   : > { %1812 = vmatpush1.bf16.msra.mxu0 %v5228_v26  ;;  %v5623_v26 = vld [vmem:[%s6434_s3 + $0x2f0] ss:$8 sps:$4 sm:$0xff]  }
 0x14c   : > { %1855 = vmatpush1.bf16.msra.mxu1 %v5233_v27  ;;  %1813 = vmatprep.subr.bf16.mxu0 %v5240_v28  ;;  %v5630_v27 = vld [vmem:[%s6433_s2 + $0x304] ss:$8 sps:$4 sm:$0xff]  }
 0x14d   : > { %1856 = vmatprep.subr.bf16.mxu1 %v5245_v29  ;;  %v5635_v28 = vld [vmem:[%s6434_s3 + $0x304] ss:$8 sps:$4 sm:$0xff]   ;;  %v5642_v29 = vld [vmem:[%s6433_s2 + $0x300] ss:$8 sps:$4 sm:$0xff]  }
 0x14f   : > { %1814 = vmatpush1.bf16.msra.mxu0 %v5252_v30  ;;  %v5647_v30 = vld [vmem:[%s6434_s3 + $0x300] ss:$8 sps:$4 sm:$0xff]  }
 0x150   : > { %1857 = vmatpush1.bf16.msra.mxu1 %v5257_v31  ;;  %1815 = vmatprep.subr.bf16.mxu0 %v5264_v32  ;;  %v5654_v31 = vld [vmem:[%s6433_s2 + $0x314] ss:$8 sps:$4 sm:$0xff]  }
 0x151   : > { %1858 = vmatprep.subr.bf16.mxu1 %v5269_v33  ;;  %v5659_v32 = vld [vmem:[%s6434_s3 + $0x314] ss:$8 sps:$4 sm:$0xff]   ;;  %v5666_v33 = vld [vmem:[%s6433_s2 + $0x310] ss:$8 sps:$4 sm:$0xff]  }
 0x153   : > { %1816 = vmatpush1.bf16.msra.mxu0 %v5276_v34  ;;  %v5671_v34 = vld [vmem:[%s6434_s3 + $0x310] ss:$8 sps:$4 sm:$0xff]  }
 0x154   : > { %1859 = vmatpush1.bf16.msra.mxu1 %v5281_v35  ;;  %1817 = vmatprep.subr.bf16.mxu0 %v5288_v36  ;;  %v5678_v35 = vld [vmem:[%s6433_s2 + $0x324] ss:$8 sps:$4 sm:$0xff]  }
 0x155   : > { %1860 = vmatprep.subr.bf16.mxu1 %v5293_v37  ;;  %v5683_v36 = vld [vmem:[%s6434_s3 + $0x324] ss:$8 sps:$4 sm:$0xff]   ;;  %v5690_v37 = vld [vmem:[%s6433_s2 + $0x320] ss:$8 sps:$4 sm:$0xff]  }
 0x157   : > { %1818 = vmatpush1.bf16.msra.mxu0 %v5300_v38  ;;  %v5695_v38 = vld [vmem:[%s6434_s3 + $0x320] ss:$8 sps:$4 sm:$0xff]  }
 0x158   : > { %1861 = vmatpush1.bf16.msra.mxu1 %v5305_v39  ;;  %1819 = vmatprep.subr.bf16.mxu0 %v5312_v40  ;;  %v5702_v39 = vld [vmem:[%s6433_s2 + $0x334] ss:$8 sps:$4 sm:$0xff]  }
 0x159   : > { %1862 = vmatprep.subr.bf16.mxu1 %v5317_v41  ;;  %v5707_v40 = vld [vmem:[%s6434_s3 + $0x334] ss:$8 sps:$4 sm:$0xff]   ;;  %v5714_v41 = vld [vmem:[%s6433_s2 + $0x330] ss:$8 sps:$4 sm:$0xff]  }
 0x15b   : > { %1820 = vmatpush1.bf16.msra.mxu0 %v5324_v42  ;;  %v5719_v42 = vld [vmem:[%s6434_s3 + $0x330] ss:$8 sps:$4 sm:$0xff]  }
 0x15c   : > { %1863 = vmatpush1.bf16.msra.mxu1 %v5329_v43  ;;  %1821 = vmatprep.subr.bf16.mxu0 %v5336_v45  ;;  %v5726_v43 = vld [vmem:[%s6433_s2 + $0x344] ss:$8 sps:$4 sm:$0xff]  }
 0x15d   : > { %1864 = vmatprep.subr.bf16.mxu1 %v5341_v46  ;;  %v5731_v45 = vld [vmem:[%s6434_s3 + $0x344] ss:$8 sps:$4 sm:$0xff]   ;;  %v5738_v46 = vld [vmem:[%s6433_s2 + $0x340] ss:$8 sps:$4 sm:$0xff]  }
 0x15f   : > { %1822 = vmatpush1.bf16.msra.mxu0 %v5348_v48  ;;  %v5743_v48 = vld [vmem:[%s6434_s3 + $0x340] ss:$8 sps:$4 sm:$0xff]  }
 0x160   : > { %1865 = vmatpush1.bf16.msra.mxu1 %v5353_v49  ;;  %1823 = vmatprep.subr.bf16.mxu0 %v5360_v50  ;;  %v5750_v49 = vld [vmem:[%s6433_s2 + $0x354] ss:$8 sps:$4 sm:$0xff]  }
 0x161   : > { %1866 = vmatprep.subr.bf16.mxu1 %v5365_v51  ;;  %v5755_v50 = vld [vmem:[%s6434_s3 + $0x354] ss:$8 sps:$4 sm:$0xff]   ;;  %v5762_v51 = vld [vmem:[%s6433_s2 + $0x350] ss:$8 sps:$4 sm:$0xff]  }
 0x163   : > { %1824 = vmatpush1.bf16.msra.mxu0 %v5372_v52  ;;  %v5767_v52 = vld [vmem:[%s6434_s3 + $0x350] ss:$8 sps:$4 sm:$0xff]  }
 0x164   : > { %1867 = vmatpush1.bf16.msra.mxu1 %v5377_v53  ;;  %1825 = vmatprep.subr.bf16.mxu0 %v5384_v54  ;;  %v5774_v53 = vld [vmem:[%s6433_s2 + $0x364] ss:$8 sps:$4 sm:$0xff]  }
 0x165   : > { %1868 = vmatprep.subr.bf16.mxu1 %v5389_v56  ;;  %v5779_v54 = vld [vmem:[%s6434_s3 + $0x364] ss:$8 sps:$4 sm:$0xff]   ;;  %v5786_v56 = vld [vmem:[%s6433_s2 + $0x360] ss:$8 sps:$4 sm:$0xff]  }
 0x167   : > { %1826 = vmatpush1.bf16.msra.mxu0 %v5396_v61  ;;  %v5791_v61 = vld [vmem:[%s6434_s3 + $0x360] ss:$8 sps:$4 sm:$0xff]  }
 0x168   : > { %1869 = vmatpush1.bf16.msra.mxu1 %v5401_v63  ;;  %1827 = vmatprep.subr.bf16.mxu0 %v5408_v44  ;;  %v5798_v63 = vld [vmem:[%s6433_s2 + $0x374] ss:$8 sps:$4 sm:$0xff]  }
 0x169   : > { %1870 = vmatprep.subr.bf16.mxu1 %v5413_v59  ;;  %v5803_v44 = vld [vmem:[%s6434_s3 + $0x374] ss:$8 sps:$4 sm:$0xff]   ;;  %v5810_v59 = vld [vmem:[%s6433_s2 + $0x370] ss:$8 sps:$4 sm:$0xff]  }
 0x16b   : > { %1828 = vmatpush1.bf16.msra.mxu0 %v5421_v1  ;;  %v5815_v1 = vld [vmem:[%s6434_s3 + $0x370] ss:$8 sps:$4 sm:$0xff]  }
 0x16c   : > { %1871 = vmatpush1.bf16.msra.mxu1 %v5426_v2  ;;  %1829 = vmatprep.subr.bf16.mxu0 %v5433_v3  ;;  %v5822_v2 = vld [vmem:[%s6433_s2 + $0x384] ss:$8 sps:$4 sm:$0xff]  }
 0x16d   : > { %1872 = vmatprep.subr.bf16.mxu1 %v6638_v60  ;;  %v5827_v3 = vld [vmem:[%s6434_s3 + $0x384] ss:$8 sps:$4 sm:$0xff]   ;;  %v5907_v60 = vld [vmem:[%s6433_s2 + $0x3b0] ss:$8 sps:$4 sm:$0xff]  }
 0x16f   : > { %1830 = vmatpush1.bf16.msra.mxu0 %v5445_v6  ;;  %v5846_v6 = vld [vmem:[%s6433_s2 + $0x394] ss:$8 sps:$4 sm:$0xff]  }
 0x170   : > { %1873 = vmatpush1.bf16.msra.mxu1 %v6639_v47  ;;  %1831 = vmatprep.subr.bf16.mxu0 %v5457_v8  ;;  %v5858_v8 = vld [vmem:[%s6433_s2 + $0x390] ss:$8 sps:$4 sm:$0xff]   ;;  %v5920_v47 = vrot.slane %v2340_v58, 1  ;;  %v6345_v58 = vld [vmem:[%s6433_s2 + $0x4a0] ss:$8 sps:$4 sm:$0xff]  }
 0x171   : > { %1874 = vmatprep.subr.bf16.mxu1 %v5462_v9  ;;  %v5863_v9 = vld [vmem:[%s6434_s3 + $0x390] ss:$8 sps:$4 sm:$0xff]  }
 0x173   : > { %1832 = vmatpush1.bf16.msra.mxu0 %v5469_v12  ;;  %v5875_v12 = vld [vmem:[%s6434_s3 + $0x3a4] ss:$8 sps:$4 sm:$0xff]  }
 0x174   : > { %1875 = vmatpush1.bf16.msra.mxu1 %v5474_v62  ;;  %2101 = vmatprep.subr.bf16.mxu0 %v5550_v15  ;;  %v5882_v62 = vld [vmem:[%s6433_s2 + $0x3a0] ss:$8 sps:$4 sm:$0xff]  }
 0x175   : > { %2294 = vmatprep.subr.bf16.mxu1 %v5555_v16 }
 0x176   : > { %1836 = vmatmul.mubr.bf16.vlgmr.msra.gmra.mrb[4].mxu0 %v5557_v17 }
 0x177   : > { %1879 = vmatmul.mubr.bf16.vlgmr.msra.gmra.mrb[4].mxu1 %v5557_v17  ;;  %2102 = vmatpush1.bf16.msra.mxu0 %v5564_v18 }
 0x178   : > { %2295 = vmatpush1.bf16.msra.mxu1 %v5569_v19  ;;  %2103 = vmatprep.subr.bf16.mxu0 %v5576_v20 }
 0x179   : > { %2296 = vmatprep.subr.bf16.mxu1 %v5581_v57  ;;  %3489 = vmatprep.mubr.msk.bf16.mxu0 %vm526_vm0, %v5482_v7 }
 0x17a   : > { %3520 = vmatprep.mubr.msk.bf16.mxu1 %vm526_vm0, %v5482_v7  ;;  %v5851_v7 = vld [vmem:[%s6434_s3 + $0x394] ss:$8 sps:$4 sm:$0xff]  }
 0x17b   : > { %2104 = vmatpush1.bf16.msra.mxu0 %v5590_v21 }
 0x17c   : > { %2297 = vmatpush1.bf16.msra.mxu1 %v5595_v22  ;;  %2105 = vmatprep.subr.bf16.mxu0 %v5602_v23 }
 0x17d   : > { %2298 = vmatprep.subr.bf16.mxu1 %v5607_v24 }
 0x17f   : > { %2106 = vmatpush1.bf16.msra.mxu0 %v5618_v25 }
 0x180   : > { %2299 = vmatpush1.bf16.msra.mxu1 %v5623_v26  ;;  %2107 = vmatprep.subr.bf16.mxu0 %v5630_v27 }
 0x181   : > { %2300 = vmatprep.subr.bf16.mxu1 %v5635_v28 }
 0x183   : > { %2108 = vmatpush1.bf16.msra.mxu0 %v5642_v29 }
 0x184   : > { %2301 = vmatpush1.bf16.msra.mxu1 %v5647_v30  ;;  %2109 = vmatprep.subr.bf16.mxu0 %v5654_v31 }
 0x185   : > { %2302 = vmatprep.subr.bf16.mxu1 %v5659_v32 }
 0x187   : > { %2110 = vmatpush1.bf16.msra.mxu0 %v5666_v33 }
 0x188   : > { %2303 = vmatpush1.bf16.msra.mxu1 %v5671_v34  ;;  %2111 = vmatprep.subr.bf16.mxu0 %v5678_v35 }
 0x189   : > { %2304 = vmatprep.subr.bf16.mxu1 %v5683_v36 }
 0x18b   : > { %2112 = vmatpush1.bf16.msra.mxu0 %v5690_v37 }
 0x18c   : > { %2305 = vmatpush1.bf16.msra.mxu1 %v5695_v38  ;;  %2113 = vmatprep.subr.bf16.mxu0 %v5702_v39 }
 0x18d   : > { %2306 = vmatprep.subr.bf16.mxu1 %v5707_v40 }
 0x18f   : > { %2114 = vmatpush1.bf16.msra.mxu0 %v5714_v41 }
 0x190   : > { %2307 = vmatpush1.bf16.msra.mxu1 %v5719_v42  ;;  %2115 = vmatprep.subr.bf16.mxu0 %v5726_v43 }
 0x191   : > { %2308 = vmatprep.subr.bf16.mxu1 %v5731_v45 }
 0x193   : > { %2116 = vmatpush1.bf16.msra.mxu0 %v5738_v46 }
 0x194   : > { %2309 = vmatpush1.bf16.msra.mxu1 %v5743_v48  ;;  %2117 = vmatprep.subr.bf16.mxu0 %v5750_v49 }
 0x195   : > { %2310 = vmatprep.subr.bf16.mxu1 %v5755_v50 }
 0x197   : > { %2118 = vmatpush1.bf16.msra.mxu0 %v5762_v51 }
 0x198   : > { %2311 = vmatpush1.bf16.msra.mxu1 %v5767_v52  ;;  %2119 = vmatprep.subr.bf16.mxu0 %v5774_v53 }
 0x199   : > { %2312 = vmatprep.subr.bf16.mxu1 %v5779_v54 }
 0x19b   : > { %2120 = vmatpush1.bf16.msra.mxu0 %v5786_v56 }
 0x19c   : > { %2313 = vmatpush1.bf16.msra.mxu1 %v5791_v61  ;;  %2121 = vmatprep.subr.bf16.mxu0 %v5798_v63 }
 0x19d   : > { %2314 = vmatprep.subr.bf16.mxu1 %v5803_v44 }
 0x19f   : > { %2122 = vmatpush1.bf16.msra.mxu0 %v5810_v59 }
 0x1a0   : > { %2315 = vmatpush1.bf16.msra.mxu1 %v5815_v1  ;;  %2123 = vmatprep.subr.bf16.mxu0 %v5822_v2 }
 0x1a1   : > { %2316 = vmatprep.subr.bf16.mxu1 %v5827_v3 }
 0x1a3   : > { %2124 = vmatpush1.bf16.msra.mxu0 %v5834_v4 }
 0x1a4   : > { %2317 = vmatpush1.bf16.msra.mxu1 %v5839_v5  ;;  %2125 = vmatprep.subr.bf16.mxu0 %v5846_v6 }
 0x1a5   : > { %2318 = vmatprep.subr.bf16.mxu1 %v5851_v7 }
 0x1a7   : > { %2126 = vmatpush1.bf16.msra.mxu0 %v5858_v8 }
 0x1a8   : > { %2319 = vmatpush1.bf16.msra.mxu1 %v5863_v9  ;;  %2127 = vmatprep.subr.bf16.mxu0 %v5870_v10 }
 0x1a9   : > { %2320 = vmatprep.subr.bf16.mxu1 %v5875_v12 }
 0x1ab   : > { %2128 = vmatpush1.bf16.msra.mxu0 %v5882_v62 }
 0x1ac   : > { %2321 = vmatpush1.bf16.msra.mxu1 %v5887_v0  ;;  %2129 = vmatprep.subr.bf16.mxu0 %v5894_v11 }
 0x1ad   : > { %2322 = vmatprep.subr.bf16.mxu1 %v5899_v13 }
 0x1af   : > { %2130 = vmatpush1.bf16.msra.mxu0 %v5907_v60 }
 0x1b0   : > { %2323 = vmatpush1.bf16.msra.mxu1 %v5912_v55  ;;  %2349 = vmatprep.subr.bf16.mxu0 %v5550_v15  ;;  %v2337_v15 = vld [vmem:[%s4739_s11] sm:$0x3c] }
 0x1b1   : > { %2392 = vmatprep.subr.bf16.mxu1 %v5555_v16  ;;  %v2339_v16 = vpack.c.bf16 %v2337_v15, %v2337_v15 }
 0x1b2   : > { %2134 = vmatmul.mubr.bf16.vlgmr.msra.gmra.mrb[0].mxu0 %v5557_v17 }
 0x1b3   : > { %2327 = vmatmul.mubr.bf16.vlgmr.msra.gmra.mrb[0].mxu1 %v5557_v17  ;;  %2350 = vmatpush1.bf16.msra.mxu0 %v5564_v18  ;;  %v5988_v17 = vld [vmem:[%s6433_s2 + $0x3c4] ss:$8 sps:$4 sm:$0xff]  }
 0x1b4   : > { %2393 = vmatpush1.bf16.msra.mxu1 %v5569_v19  ;;  %2351 = vmatprep.subr.bf16.mxu0 %v5576_v20  ;;  %v5993_v18 = vld [vmem:[%s6434_s3 + $0x3c4] ss:$8 sps:$4 sm:$0xff]   ;;  %v5995_v19 = vrot.slane %v2339_v16, 1  ;;  %v6002_v20 = vld [vmem:[%s6433_s2 + $0x3c0] ss:$8 sps:$4 sm:$0xff]  }
 0x1b5   : > { %2394 = vmatprep.subr.bf16.mxu1 %v5581_v57  ;;  %3521 = vmatprep.mubr.msk.bf16.mxu0 %vm526_vm0, %v5920_v47  ;;  %v6007_v57 = vld [vmem:[%s6434_s3 + $0x3c0] ss:$8 sps:$4 sm:$0xff]  }
 0x1b6   : > { %3522 = vmatprep.mubr.msk.bf16.mxu1 %vm526_vm0, %v5920_v47 }
 0x1b7   : > { %2352 = vmatpush1.bf16.msra.mxu0 %v5590_v21  ;;  %v6014_v21 = vld [vmem:[%s6433_s2 + $0x3d4] ss:$8 sps:$4 sm:$0xff]  }
 0x1b8   : > { %2395 = vmatpush1.bf16.msra.mxu1 %v5595_v22  ;;  %2353 = vmatprep.subr.bf16.mxu0 %v5602_v23  ;;  %v6019_v22 = vld [vmem:[%s6434_s3 + $0x3d4] ss:$8 sps:$4 sm:$0xff]   ;;  %v6028_v23 = vld [vmem:[%s6433_s2 + $0x3d0] ss:$8 sps:$4 sm:$0xff]  }
 0x1b9   : > { %2396 = vmatprep.subr.bf16.mxu1 %v5607_v24  ;;  %v6033_v24 = vld [vmem:[%s6434_s3 + $0x3d0] ss:$8 sps:$4 sm:$0xff]  }
 0x1bb   : > { %2354 = vmatpush1.bf16.msra.mxu0 %v5618_v25  ;;  %v6040_v25 = vld [vmem:[%s6433_s2 + $0x3e4] ss:$8 sps:$4 sm:$0xff]  }
 0x1bc   : > { %2397 = vmatpush1.bf16.msra.mxu1 %v5623_v26  ;;  %2355 = vmatprep.subr.bf16.mxu0 %v5630_v27  ;;  %v6045_v26 = vld [vmem:[%s6434_s3 + $0x3e4] ss:$8 sps:$4 sm:$0xff]   ;;  %v6056_v27 = vld [vmem:[%s6433_s2 + $0x3e0] ss:$8 sps:$4 sm:$0xff]  }
 0x1bd   : > { %2398 = vmatprep.subr.bf16.mxu1 %v5635_v28  ;;  %v6061_v28 = vld [vmem:[%s6434_s3 + $0x3e0] ss:$8 sps:$4 sm:$0xff]  }
 0x1bf   : > { %2356 = vmatpush1.bf16.msra.mxu0 %v5642_v29  ;;  %v6068_v29 = vld [vmem:[%s6433_s2 + $0x3f4] ss:$8 sps:$4 sm:$0xff]  }
 0x1c0   : > { %2399 = vmatpush1.bf16.msra.mxu1 %v5647_v30  ;;  %2357 = vmatprep.subr.bf16.mxu0 %v5654_v31  ;;  %v6073_v30 = vld [vmem:[%s6434_s3 + $0x3f4] ss:$8 sps:$4 sm:$0xff]   ;;  %v6080_v31 = vld [vmem:[%s6433_s2 + $0x3f0] ss:$8 sps:$4 sm:$0xff]  }
 0x1c1   : > { %2400 = vmatprep.subr.bf16.mxu1 %v5659_v32  ;;  %v6085_v32 = vld [vmem:[%s6434_s3 + $0x3f0] ss:$8 sps:$4 sm:$0xff]  }
 0x1c3   : > { %2358 = vmatpush1.bf16.msra.mxu0 %v5666_v33  ;;  %v6092_v33 = vld [vmem:[%s6433_s2 + $0x404] ss:$8 sps:$4 sm:$0xff]  }
 0x1c4   : > { %2401 = vmatpush1.bf16.msra.mxu1 %v5671_v34  ;;  %2359 = vmatprep.subr.bf16.mxu0 %v5678_v35  ;;  %v6097_v34 = vld [vmem:[%s6434_s3 + $0x404] ss:$8 sps:$4 sm:$0xff]   ;;  %v6104_v35 = vld [vmem:[%s6433_s2 + $0x400] ss:$8 sps:$4 sm:$0xff]  }
 0x1c5   : > { %2402 = vmatprep.subr.bf16.mxu1 %v5683_v36  ;;  %v6109_v36 = vld [vmem:[%s6434_s3 + $0x400] ss:$8 sps:$4 sm:$0xff]  }
 0x1c7   : > { %2360 = vmatpush1.bf16.msra.mxu0 %v5690_v37  ;;  %v6116_v37 = vld [vmem:[%s6433_s2 + $0x414] ss:$8 sps:$4 sm:$0xff]  }
 0x1c8   : > { %2403 = vmatpush1.bf16.msra.mxu1 %v5695_v38  ;;  %2361 = vmatprep.subr.bf16.mxu0 %v5702_v39  ;;  %v6121_v38 = vld [vmem:[%s6434_s3 + $0x414] ss:$8 sps:$4 sm:$0xff]   ;;  %v6128_v39 = vld [vmem:[%s6433_s2 + $0x410] ss:$8 sps:$4 sm:$0xff]  }
 0x1c9   : > { %2404 = vmatprep.subr.bf16.mxu1 %v5707_v40  ;;  %v6133_v40 = vld [vmem:[%s6434_s3 + $0x410] ss:$8 sps:$4 sm:$0xff]  }
 0x1cb   : > { %2362 = vmatpush1.bf16.msra.mxu0 %v5714_v41  ;;  %v6140_v41 = vld [vmem:[%s6433_s2 + $0x424] ss:$8 sps:$4 sm:$0xff]  }
 0x1cc   : > { %2405 = vmatpush1.bf16.msra.mxu1 %v5719_v42  ;;  %2363 = vmatprep.subr.bf16.mxu0 %v5726_v43  ;;  %v6145_v42 = vld [vmem:[%s6434_s3 + $0x424] ss:$8 sps:$4 sm:$0xff]   ;;  %v6152_v43 = vld [vmem:[%s6433_s2 + $0x420] ss:$8 sps:$4 sm:$0xff]  }
 0x1cd   : > { %2406 = vmatprep.subr.bf16.mxu1 %v5731_v45  ;;  %v6157_v45 = vld [vmem:[%s6434_s3 + $0x420] ss:$8 sps:$4 sm:$0xff]  }
 0x1cf   : > { %2364 = vmatpush1.bf16.msra.mxu0 %v5738_v46  ;;  %v6164_v46 = vld [vmem:[%s6433_s2 + $0x434] ss:$8 sps:$4 sm:$0xff]  }
 0x1d0   : > { %2407 = vmatpush1.bf16.msra.mxu1 %v5743_v48  ;;  %2365 = vmatprep.subr.bf16.mxu0 %v5750_v49  ;;  %v6169_v48 = vld [vmem:[%s6434_s3 + $0x434] ss:$8 sps:$4 sm:$0xff]   ;;  %v6176_v49 = vld [vmem:[%s6433_s2 + $0x430] ss:$8 sps:$4 sm:$0xff]  }
 0x1d1   : > { %2408 = vmatprep.subr.bf16.mxu1 %v5755_v50  ;;  %v6181_v50 = vld [vmem:[%s6434_s3 + $0x430] ss:$8 sps:$4 sm:$0xff]  }
 0x1d3   : > { %2366 = vmatpush1.bf16.msra.mxu0 %v5762_v51  ;;  %v6188_v51 = vld [vmem:[%s6433_s2 + $0x444] ss:$8 sps:$4 sm:$0xff]  }
 0x1d4   : > { %2409 = vmatpush1.bf16.msra.mxu1 %v5767_v52  ;;  %2367 = vmatprep.subr.bf16.mxu0 %v5774_v53  ;;  %v6193_v52 = vld [vmem:[%s6434_s3 + $0x444] ss:$8 sps:$4 sm:$0xff]   ;;  %v6200_v53 = vld [vmem:[%s6433_s2 + $0x440] ss:$8 sps:$4 sm:$0xff]  }
 0x1d5   : > { %2410 = vmatprep.subr.bf16.mxu1 %v5779_v54  ;;  %v6205_v54 = vld [vmem:[%s6434_s3 + $0x440] ss:$8 sps:$4 sm:$0xff]  }
 0x1d7   : > { %2368 = vmatpush1.bf16.msra.mxu0 %v5786_v56  ;;  %v6212_v56 = vld [vmem:[%s6433_s2 + $0x454] ss:$8 sps:$4 sm:$0xff]  }
 0x1d8   : > { %2411 = vmatpush1.bf16.msra.mxu1 %v5791_v61  ;;  %2369 = vmatprep.subr.bf16.mxu0 %v5798_v63  ;;  %v6217_v61 = vld [vmem:[%s6434_s3 + $0x454] ss:$8 sps:$4 sm:$0xff]   ;;  %v6224_v63 = vld [vmem:[%s6433_s2 + $0x450] ss:$8 sps:$4 sm:$0xff]  }
 0x1d9   : > { %2412 = vmatprep.subr.bf16.mxu1 %v5803_v44  ;;  %v6229_v44 = vld [vmem:[%s6434_s3 + $0x450] ss:$8 sps:$4 sm:$0xff]  }
 0x1db   : > { %2370 = vmatpush1.bf16.msra.mxu0 %v5810_v59  ;;  %v6236_v59 = vld [vmem:[%s6433_s2 + $0x464] ss:$8 sps:$4 sm:$0xff]  }
 0x1dc   : > { %2413 = vmatpush1.bf16.msra.mxu1 %v5815_v1  ;;  %2371 = vmatprep.subr.bf16.mxu0 %v5822_v2  ;;  %v6241_v1 = vld [vmem:[%s6434_s3 + $0x464] ss:$8 sps:$4 sm:$0xff]   ;;  %v6248_v2 = vld [vmem:[%s6433_s2 + $0x460] ss:$8 sps:$4 sm:$0xff]  }
 0x1dd   : > { %2414 = vmatprep.subr.bf16.mxu1 %v5827_v3  ;;  %v6253_v3 = vld [vmem:[%s6434_s3 + $0x460] ss:$8 sps:$4 sm:$0xff]  }
 0x1df   : > { %2372 = vmatpush1.bf16.msra.mxu0 %v5834_v4  ;;  %v6260_v4 = vld [vmem:[%s6433_s2 + $0x474] ss:$8 sps:$4 sm:$0xff]  }
 0x1e0   : > { %2415 = vmatpush1.bf16.msra.mxu1 %v5839_v5  ;;  %2373 = vmatprep.subr.bf16.mxu0 %v5846_v6  ;;  %v6265_v5 = vld [vmem:[%s6434_s3 + $0x474] ss:$8 sps:$4 sm:$0xff]   ;;  %v6272_v6 = vld [vmem:[%s6433_s2 + $0x470] ss:$8 sps:$4 sm:$0xff]  }
 0x1e1   : > { %2416 = vmatprep.subr.bf16.mxu1 %v5851_v7  ;;  %v6277_v7 = vld [vmem:[%s6434_s3 + $0x470] ss:$8 sps:$4 sm:$0xff]  }
 0x1e3   : > { %2374 = vmatpush1.bf16.msra.mxu0 %v5858_v8  ;;  %v6284_v8 = vld [vmem:[%s6433_s2 + $0x484] ss:$8 sps:$4 sm:$0xff]  }
 0x1e4   : > { %2417 = vmatpush1.bf16.msra.mxu1 %v5863_v9  ;;  %2375 = vmatprep.subr.bf16.mxu0 %v5870_v10  ;;  %v6289_v9 = vld [vmem:[%s6434_s3 + $0x484] ss:$8 sps:$4 sm:$0xff]   ;;  %v6296_v10 = vld [vmem:[%s6433_s2 + $0x480] ss:$8 sps:$4 sm:$0xff]  }
 0x1e5   : > { %2418 = vmatprep.subr.bf16.mxu1 %v5875_v12  ;;  %v6301_v12 = vld [vmem:[%s6434_s3 + $0x480] ss:$8 sps:$4 sm:$0xff]  }
 0x1e7   : > { %2376 = vmatpush1.bf16.msra.mxu0 %v5882_v62  ;;  %v6308_v62 = vld [vmem:[%s6433_s2 + $0x494] ss:$8 sps:$4 sm:$0xff]  }
 0x1e8   : > { %2419 = vmatpush1.bf16.msra.mxu1 %v5887_v0  ;;  %2377 = vmatprep.subr.bf16.mxu0 %v5894_v11  ;;  %v6313_v0 = vld [vmem:[%s6434_s3 + $0x494] ss:$8 sps:$4 sm:$0xff]   ;;  %v6320_v11 = vld [vmem:[%s6433_s2 + $0x490] ss:$8 sps:$4 sm:$0xff]  }
 0x1e9   : > { %2420 = vmatprep.subr.bf16.mxu1 %v5899_v13  ;;  %v6325_v13 = vld [vmem:[%s6434_s3 + $0x490] ss:$8 sps:$4 sm:$0xff]  }
 0x1eb   : > { %2378 = vmatpush1.bf16.msra.mxu0 %v5907_v60  ;;  %v6337_v60 = vld [vmem:[%s6434_s3 + $0x4a4] ss:$8 sps:$4 sm:$0xff]  }
 0x1ec   : > { %2421 = vmatpush1.bf16.msra.mxu1 %v5912_v55  ;;  %2647 = vmatprep.subr.bf16.mxu0 %v5988_v17  ;;  %v2884_v55 = vld [vmem:[%s4480_s13 + $0x8] sm:$0x3c] }
 0x1ed   : > { %2840 = vmatprep.subr.bf16.mxu1 %v5993_v18  ;;  %v2886_v15 = vpack.c.bf16 %v2884_v55, %v2884_v55 }
 0x1ee   : > { %2382 = vmatmul.mubr.bf16.vlgmr.msra.gmra.mrb[4].mxu0 %v5995_v19 }
 0x1ef   : > { %2425 = vmatmul.mubr.bf16.vlgmr.msra.gmra.mrb[4].mxu1 %v5995_v19  ;;  %2648 = vmatpush1.bf16.msra.mxu0 %v6002_v20  ;;  %v2890_v16 = vrot.slane %v2886_v15, 1 }
 0x1f0   : > { %2841 = vmatpush1.bf16.msra.mxu1 %v6007_v57  ;;  %2649 = vmatprep.subr.bf16.mxu0 %v6014_v21 }
 0x1f1   : > { %2842 = vmatprep.subr.bf16.mxu1 %v6019_v22  ;;  %3613 = vmatprep.mubr.msk.bf16.mxu0 %vm526_vm0, %v5920_v47 }
 0x1f2   : > { %3644 = vmatprep.mubr.msk.bf16.mxu1 %vm526_vm0, %v5920_v47  ;;  %v6350_v47 = vld [vmem:[%s6434_s3 + $0x4a0] ss:$8 sps:$4 sm:$0xff]  }
 0x1f3   : > { %2650 = vmatpush1.bf16.msra.mxu0 %v6028_v23 }
 0x1f4   : > { %2843 = vmatpush1.bf16.msra.mxu1 %v6033_v24  ;;  %2651 = vmatprep.subr.bf16.mxu0 %v6040_v25 }
 0x1f5   : > { %2844 = vmatprep.subr.bf16.mxu1 %v6045_v26 }
 0x1f7   : > { %2652 = vmatpush1.bf16.msra.mxu0 %v6056_v27 }
 0x1f8   : > { %2845 = vmatpush1.bf16.msra.mxu1 %v6061_v28  ;;  %2653 = vmatprep.subr.bf16.mxu0 %v6068_v29 }
 0x1f9   : > { %2846 = vmatprep.subr.bf16.mxu1 %v6073_v30 }
 0x1fb   : > { %2654 = vmatpush1.bf16.msra.mxu0 %v6080_v31 }
 0x1fc   : > { %2847 = vmatpush1.bf16.msra.mxu1 %v6085_v32  ;;  %2655 = vmatprep.subr.bf16.mxu0 %v6092_v33 }
 0x1fd   : > { %2848 = vmatprep.subr.bf16.mxu1 %v6097_v34 }
 0x1ff   : > { %2656 = vmatpush1.bf16.msra.mxu0 %v6104_v35 }
 0x200   : > { %2849 = vmatpush1.bf16.msra.mxu1 %v6109_v36  ;;  %2657 = vmatprep.subr.bf16.mxu0 %v6116_v37 }
 0x201   : > { %2850 = vmatprep.subr.bf16.mxu1 %v6121_v38 }
 0x203   : > { %2658 = vmatpush1.bf16.msra.mxu0 %v6128_v39 }
 0x204   : > { %2851 = vmatpush1.bf16.msra.mxu1 %v6133_v40  ;;  %2659 = vmatprep.subr.bf16.mxu0 %v6140_v41 }
 0x205   : > { %2852 = vmatprep.subr.bf16.mxu1 %v6145_v42 }
 0x207   : > { %2660 = vmatpush1.bf16.msra.mxu0 %v6152_v43 }
 0x208   : > { %2853 = vmatpush1.bf16.msra.mxu1 %v6157_v45  ;;  %2661 = vmatprep.subr.bf16.mxu0 %v6164_v46 }
 0x209   : > { %2854 = vmatprep.subr.bf16.mxu1 %v6169_v48 }
 0x20b   : > { %2662 = vmatpush1.bf16.msra.mxu0 %v6176_v49 }
 0x20c   : > { %2855 = vmatpush1.bf16.msra.mxu1 %v6181_v50  ;;  %2663 = vmatprep.subr.bf16.mxu0 %v6188_v51 }
 0x20d   : > { %2856 = vmatprep.subr.bf16.mxu1 %v6193_v52 }
 0x20f   : > { %2664 = vmatpush1.bf16.msra.mxu0 %v6200_v53 }
 0x210   : > { %2857 = vmatpush1.bf16.msra.mxu1 %v6205_v54  ;;  %2665 = vmatprep.subr.bf16.mxu0 %v6212_v56 }
 0x211   : > { %2858 = vmatprep.subr.bf16.mxu1 %v6217_v61 }
 0x213   : > { %2666 = vmatpush1.bf16.msra.mxu0 %v6224_v63 }
 0x214   : > { %2859 = vmatpush1.bf16.msra.mxu1 %v6229_v44  ;;  %2667 = vmatprep.subr.bf16.mxu0 %v6236_v59 }
 0x215   : > { %2860 = vmatprep.subr.bf16.mxu1 %v6241_v1 }
 0x217   : > { %2668 = vmatpush1.bf16.msra.mxu0 %v6248_v2 }
 0x218   : > { %2861 = vmatpush1.bf16.msra.mxu1 %v6253_v3  ;;  %2669 = vmatprep.subr.bf16.mxu0 %v6260_v4 }
 0x219   : > { %2862 = vmatprep.subr.bf16.mxu1 %v6265_v5 }
 0x21b   : > { %2670 = vmatpush1.bf16.msra.mxu0 %v6272_v6 }
 0x21c   : > { %2863 = vmatpush1.bf16.msra.mxu1 %v6277_v7  ;;  %2671 = vmatprep.subr.bf16.mxu0 %v6284_v8 }
 0x21d   : > { %2864 = vmatprep.subr.bf16.mxu1 %v6289_v9 }
 0x21f   : > { %2672 = vmatpush1.bf16.msra.mxu0 %v6296_v10 }
 0x220   : > { %2865 = vmatpush1.bf16.msra.mxu1 %v6301_v12  ;;  %2673 = vmatprep.subr.bf16.mxu0 %v6308_v62 }
 0x221   : > { %2866 = vmatprep.subr.bf16.mxu1 %v6313_v0 }
 0x223   : > { %2674 = vmatpush1.bf16.msra.mxu0 %v6320_v11 }
 0x224   : > { %2867 = vmatpush1.bf16.msra.mxu1 %v6325_v13  ;;  %2675 = vmatprep.subr.bf16.mxu0 %v6332_v14 }
 0x225   : > { %2868 = vmatprep.subr.bf16.mxu1 %v6337_v60 }
 0x227   : > { %2676 = vmatpush1.bf16.msra.mxu0 %v6345_v58 }
 0x228   : > { %2869 = vmatpush1.bf16.msra.mxu1 %v6350_v47  ;;  %2895 = vmatprep.subr.bf16.mxu0 %v5988_v17  ;;  %v2883_v17 = vld [vmem:[%s4480_s13] sm:$0x3c] }
 0x229   : > { %2938 = vmatprep.subr.bf16.mxu1 %v5993_v18  ;;  %v2885_v18 = vpack.c.bf16 %v2883_v17, %v2883_v17 }
 0x22a   : > { %2680 = vmatmul.mubr.bf16.vlgmr.msra.gmra.mrb[0].mxu0 %v5995_v19 }
 0x22b   : > { %2873 = vmatmul.mubr.bf16.vlgmr.msra.gmra.mrb[0].mxu1 %v5995_v19  ;;  %2896 = vmatpush1.bf16.msra.mxu0 %v6002_v20  ;;  %v2889_v19 = vrot.slane %v2885_v18, 1 }
 0x22c   : > { %2939 = vmatpush1.bf16.msra.mxu1 %v6007_v57  ;;  %2897 = vmatprep.subr.bf16.mxu0 %v6014_v21 }
 0x22d   : > { %2940 = vmatprep.subr.bf16.mxu1 %v6019_v22  ;;  %3645 = vmatprep.mubr.msk.bf16.mxu0 %vm526_vm0, %v2890_v16 }
 0x22e   : > { %3646 = vmatprep.mubr.msk.bf16.mxu1 %vm526_vm0, %v2890_v16 }
 0x22f   : > { %2898 = vmatpush1.bf16.msra.mxu0 %v6028_v23 }
 0x230   : > { %2941 = vmatpush1.bf16.msra.mxu1 %v6033_v24  ;;  %2899 = vmatprep.subr.bf16.mxu0 %v6040_v25 }
 0x231   : > { %2942 = vmatprep.subr.bf16.mxu1 %v6045_v26 }
 0x233   : > { %2900 = vmatpush1.bf16.msra.mxu0 %v6056_v27 }
 0x234   : > { %2943 = vmatpush1.bf16.msra.mxu1 %v6061_v28  ;;  %2901 = vmatprep.subr.bf16.mxu0 %v6068_v29  ;;  %v2989_v29 = vlaneseq }
 0x235   : > { %2944 = vmatprep.subr.bf16.mxu1 %v6073_v30 }
 0x236   : > { %v2990_v30 = vshrl.u32 %v2989_v29, 7 }
 0x237   : > { %2902 = vmatpush1.bf16.msra.mxu0 %v6080_v31 }
 0x238   : > { %2945 = vmatpush1.bf16.msra.mxu1 %v6085_v32  ;;  %2903 = vmatprep.subr.bf16.mxu0 %v6092_v33  ;;  %v2991_v31 = vsub.s32 0, %v2990_v30  ;;  %v2987_v32 = vld [vmem:[%s6435_s4] sm:$0x3]  ;;  %v2995_v33 = vsub.s32 1, %v2990_v30 }
 0x239   : > { %2946 = vmatprep.subr.bf16.mxu1 %v6097_v34 }
 0x23b   : > { %2904 = vmatpush1.bf16.msra.mxu0 %v6104_v35 }
 0x23c   : > { %2947 = vmatpush1.bf16.msra.mxu1 %v6109_v36  ;;  %2905 = vmatprep.subr.bf16.mxu0 %v6116_v37  ;;  %v2992_v37 = vrot.slane %v2987_v32, %v2991_v31 }
 0x23d   : > { %2948 = vmatprep.subr.bf16.mxu1 %v6121_v38 }
 0x23f   : > { %2906 = vmatpush1.bf16.msra.mxu0 %v6128_v39 }
 0x240   : > { %2949 = vmatpush1.bf16.msra.mxu1 %v6133_v40  ;;  %2907 = vmatprep.subr.bf16.mxu0 %v6140_v41  ;;  %v2996_v41 = vrot.slane %v2987_v32, %v2995_v33 }
 0x241   : > { %2950 = vmatprep.subr.bf16.mxu1 %v6145_v42 }
 0x243   : > { %2908 = vmatpush1.bf16.msra.mxu0 %v6152_v43 }
 0x244   : > { %2951 = vmatpush1.bf16.msra.mxu1 %v6157_v45  ;;  %2909 = vmatprep.subr.bf16.mxu0 %v6164_v46 }
 0x245   : > { %2952 = vmatprep.subr.bf16.mxu1 %v6169_v48 }
 0x247   : > { %2910 = vmatpush1.bf16.msra.mxu0 %v6176_v49 }
 0x248   : > { %2953 = vmatpush1.bf16.msra.mxu1 %v6181_v50  ;;  %2911 = vmatprep.subr.bf16.mxu0 %v6188_v51 }
 0x249   : > { %2954 = vmatprep.subr.bf16.mxu1 %v6193_v52 }
 0x24b   : > { %2912 = vmatpush1.bf16.msra.mxu0 %v6200_v53 }
 0x24c   : > { %2955 = vmatpush1.bf16.msra.mxu1 %v6205_v54  ;;  %2913 = vmatprep.subr.bf16.mxu0 %v6212_v56 }
 0x24d   : > { %2956 = vmatprep.subr.bf16.mxu1 %v6217_v61 }
 0x24f   : > { %2914 = vmatpush1.bf16.msra.mxu0 %v6224_v63 }
 0x250   : > { %2957 = vmatpush1.bf16.msra.mxu1 %v6229_v44  ;;  %2915 = vmatprep.subr.bf16.mxu0 %v6236_v59 }
 0x251   : > { %2958 = vmatprep.subr.bf16.mxu1 %v6241_v1 }
 0x253   : > { %2916 = vmatpush1.bf16.msra.mxu0 %v6248_v2 }
 0x254   : > { %2959 = vmatpush1.bf16.msra.mxu1 %v6253_v3  ;;  %2917 = vmatprep.subr.bf16.mxu0 %v6260_v4 }
 0x255   : > { %2960 = vmatprep.subr.bf16.mxu1 %v6265_v5 }
 0x257   : > { %2918 = vmatpush1.bf16.msra.mxu0 %v6272_v6 }
 0x258   : > { %2961 = vmatpush1.bf16.msra.mxu1 %v6277_v7  ;;  %2919 = vmatprep.subr.bf16.mxu0 %v6284_v8 }
 0x259   : > { %2962 = vmatprep.subr.bf16.mxu1 %v6289_v9 }
 0x25b   : > { %2920 = vmatpush1.bf16.msra.mxu0 %v6296_v10 }
 0x25c   : > { %2963 = vmatpush1.bf16.msra.mxu1 %v6301_v12  ;;  %2921 = vmatprep.subr.bf16.mxu0 %v6308_v62 }
 0x25d   : > { %2964 = vmatprep.subr.bf16.mxu1 %v6313_v0 }
 0x25f   : > { %2922 = vmatpush1.bf16.msra.mxu0 %v6320_v11 }
 0x260   : > { %2965 = vmatpush1.bf16.msra.mxu1 %v6325_v13  ;;  %2923 = vmatprep.subr.bf16.mxu0 %v6332_v14 }
 0x261   : > { %2966 = vmatprep.subr.bf16.mxu1 %v6337_v60 }
 0x263   : > { %2924 = vmatpush1.bf16.msra.mxu0 %v6345_v58 }
 0x264   : > { %2967 = vmatpush1.bf16.msra.mxu1 %v6350_v47 }
 0x266   : > { %2928 = vmatmul.mubr.bf16.vlgmr.msra.gmra.mrb[4].mxu0 %v2889_v19 }
 0x267   : > { %2971 = vmatmul.mubr.bf16.vlgmr.msra.gmra.mrb[4].mxu1 %v2889_v19 }
 0x2fd   : > { %v2681_v20 = vpop.f32.mrb[0].mxu0 }
 0x2fe   : > { %v2874_v57 = vpop.f32.mrb[0].mxu1  ;;  %v2683_v22 = vpop.f32.mrb[1].mxu0 }
 0x2ff   : > { %v2981_v21 = vmax.f32 %v2681_v20, %v2874_v57  ;;  %v2876_v23 = vpop.f32.mrb[1].mxu1  ;;  %v2685_v25 = vpop.f32.mrb[2].mxu0 }
 0x300   : > { %v2982_v24 = vmax.f32 %v2683_v22, %v2876_v23  ;;  %v2878_v26 = vpop.f32.mrb[2].mxu1  ;;  %v2686_v27 = vpop.f32.mrb[3].mxu0 }
 0x301   : > { %v2879_v28 = vpop.f32.mrb[3].mxu1 }
 0x339   : > { %v2929_v34 = vpop.f32.mrb[4].mxu0 }
 0x33a   : > { %v2972_v35 = vpop.f32.mrb[4].mxu1  ;;  %v2931_v38 = vpop.f32.mrb[5].mxu0 }
 0x33b   : > { %v2983_v36 = vmax.f32 %v2929_v34, %v2972_v35  ;;  %v2974_v39 = vpop.f32.mrb[5].mxu1  ;;  %v2933_v42 = vpop.f32.mrb[6].mxu0 }
 0x33c   : > { %v2984_v40 = vmax.f32 %v2931_v38, %v2974_v39  ;;  %v2976_v43 = vpop.f32.mrb[6].mxu1  ;;  %v2934_v46 = vpop.f32.mrb[7].mxu0 }
 0x33d   : > { %v2985_v45 = vmax.f32 %v2981_v21, %v2983_v36  ;;  %v2977_v48 = vpop.f32.mrb[7].mxu1 }
 0x33e   : > { %v2986_v49 = vmax.f32 %v2982_v24, %v2984_v40 }
 0x33f   : > { %v2999_v50 = vadd.f32 %v2992_v37, %v2985_v45 }
 0x340   : > { %v3000_v51 = vadd.f32 %v2996_v41, %v2986_v49 }
 0x342   : > { %v3003_v52 = vcombine.low %v2999_v50, %v3000_v51 }
 0x344   : > { %3008 = vst.msk [vmem:[%s244_s29] sm:$0xff] %vm3007_vm3, %v3003_v52 }
 0x345 PF: > { %s15_s18 = sadd.s32 1, %s4180_s18  }
 0x346   : > { %p12_p4 = scmp.ge.s32.totalorder %s15_s18, 6  }
 0x348   :  { %14 = sbr.rel (!%p12_p4) target bundleno = 1 (0x1), region = 81 }

</bundles_post_ra>
